<compile_context>
chip_gen: v7x
topology: tpu7x:2x2x1
jax: 0.10.0
libtpu: 0.0.40
codegen_flags: <defaults>
</compile_context>

<pallas_src>
import jax
import jax.numpy as jnp
from jax.experimental import pallas as pl
from jax.experimental.pallas import tpu as pltpu

# Layer dims of the PyTorch module: 8 -> 16 -> 32 -> 64 -> 1.
_DIMS = [(8, 16), (16, 32), (32, 64), (64, 1)]
# Offsets of each layer's bias inside the concatenated [128, 1] bias column.
_B_OFF = (0, 16, 48, 112)            # 16 + 32 + 64 + 1 = 113, padded to 128
_BIAS_LEN = 128
# Bias slices are sublane slices of an f32 column -> offsets must stay 8-aligned.
assert all(off % 8 == 0 for off in _B_OFF), _B_OFF

# The x input block is [TB, 8] f32; in VMEM its 8 lanes pad to 128, i.e.
# ~512 B per batch row per buffer -> cap TB so double-buffered x + f32
# intermediates stay far under even v5e's 16 MiB scoped-VMEM default.
_MAX_TILE = 4096


def _round_up(v, m):
    return -(-v // m) * m


def _pick_batch_tile(B, batch_tile):
    """Pick (tile, num_steps).

    Tiles are multiples of 128 (lane-dense output blocks), big enough to
    amortize the ~0.35 us/step grid overhead, and the step count is kept even
    when small so v7x's two TensorCores split the 'parallel' axis evenly
    (harmless on single-TC v5e/v6e).  At large step counts an odd count costs
    <~2%, so we don't fight the rounding there.
    """
    tb_cap = max(128, (min(batch_tile, _MAX_TILE) // 128) * 128)
    b_pad = _round_up(B, 128)
    nb = pl.cdiv(b_pad, tb_cap)
    if nb > 1 and nb % 2:
        nb += 1                       # even split for v7x megacore balance
    elif nb == 1 and b_pad >= 2048:
        nb = 2                        # big enough to feed both TCs on v7x
    tb = max(128, _round_up(pl.cdiv(b_pad, nb), 128))
    nb = pl.cdiv(b_pad, tb)
    return tb, nb


def mlp_kernel(x_ref, w1_ref, w2_ref, w3_ref, w4_ref, bias_ref, o_ref):
    """One batch tile of the fused MLP.

    x_ref:    [TB, 8]  f32   (natural PyTorch layout, read straight from HBM)
    w1..w3:   [out,in] bf16  (MXU weights, VMEM-resident across the grid)
    w4_ref:   [64, 1]  f32   (final layer done on the VPU/XLU, not the MXU)
    bias_ref: [128, 1] f32   (b1|b2|b3|b4 concatenated -> one resident DMA)
    o_ref:    [1,  TB] f32   (lane-dense -> unmasked vst stores)
    """
    # In-kernel layout change: batch -> lanes, features -> sublanes, then bf16.
    x = x_ref[...].T.astype(jnp.bfloat16)            # [8, TB] bf16

    b_all = bias_ref[...]                            # f32 [128, 1]
    b1 = b_all[_B_OFF[0]:_B_OFF[1]]                  # [16, 1]
    b2 = b_all[_B_OFF[1]:_B_OFF[2]]                  # [32, 1]
    b3 = b_all[_B_OFF[2]:_B_OFF[3]]                  # [64, 1]
    b4 = b_all[_B_OFF[3]:_B_OFF[3] + 1]              # [1, 1]

    # bf16 MXU matmuls with f32 accumulation.  ReLU for h1/h2 runs after the
    # bf16 cast (identical values; packed 16-sublane bf16 VPU on v6e/v7x).
    # TODO(synk): if bundle dumps show the vector-extended (MXU push) slot
    # saturating, move this tiny 8x16 layer to VPU multiply-adds.
    h1 = jnp.dot(w1_ref[...], x, preferred_element_type=jnp.float32) + b1
    h1 = jnp.maximum(h1.astype(jnp.bfloat16), 0.0)   # [16, TB] bf16

    h2 = jnp.dot(w2_ref[...], h1, preferred_element_type=jnp.float32) + b2
    h2 = jnp.maximum(h2.astype(jnp.bfloat16), 0.0)   # [32, TB] bf16

    h3 = jnp.dot(w3_ref[...], h2, preferred_element_type=jnp.float32) + b3
    h3 = jnp.maximum(h3, 0.0)                        # [64, TB] f32 (feeds VPU tail)

    # Final Linear(64, 1): VPU broadcast-multiply + XLU sublane reduce.
    out = jnp.sum(w4_ref[...] * h3, axis=0, keepdims=True) + b4   # [1, TB] f32
    o_ref[...] = out.astype(o_ref.dtype)


def binary_classification_forward(x, params, *, batch_tile=2048):
    """x: [B, 8] float32 -> [B, 1] float32 (matches BinaryClassification.forward)."""
    B = x.shape[0]
    tb, nb = _pick_batch_tile(B, batch_tile)
    b_pad = tb * nb
    if b_pad != B:
        # Only when B isn't tile-aligned; padded rows compute garbage that is
        # sliced off below (no in-kernel reduction over the batch axis).
        x = jnp.pad(x, ((0, b_pad - B), (0, 0)))

    def resident(shape):
        # Same block on every grid step -> stays VMEM-resident (fetched once).
        return pl.BlockSpec(shape, lambda i: (0, 0))

    # VMEM: 2x double-buffered x blocks ([TB,8] f32 pads to TB*128*4 B each)
    # + 2x [1,TB] f32 output blocks + resident weights/biases + intermediates
    # is well under 8 MiB at the TB<=4096 cap -> fits every generation's
    # scoped-VMEM default; no vmem_limit_bytes override needed.
    out_t = pl.pallas_call(
        mlp_kernel,
        out_shape=jax.ShapeDtypeStruct((1, b_pad), jnp.float32),
        grid=(nb,),
        in_specs=[
            pl.BlockSpec((tb, 8), lambda i: (i, 0)),   # x: tiled over batch rows
            resident(params["w1"].shape),
            resident(params["w2"].shape),
            resident(params["w3"].shape),
            resident(params["w4"].shape),
            resident(params["bias"].shape),
        ],
        out_specs=pl.BlockSpec((1, tb), lambda i: (0, i)),
        compiler_params=pltpu.CompilerParams(
            # Batch tiles are independent -> sharded across both TCs on v7x,
            # harmless no-op on v5e/v6e.  Default double-buffering is plenty.
            dimension_semantics=("parallel",),
        ),
    )(x, params["w1"], params["w2"], params["w3"], params["w4"], params["bias"])
    # [1, B] -> [B, 1] via slice + new axis (layout-trivial, no transpose pass).
    return out_t[0, :B][:, None]


def init_params(key):
    """PyTorch nn.Linear default init (U[-1/sqrt(fan_in), +1/sqrt(fan_in)]).

    Weights stored [out, in] (kernel computes W @ h).  The three MXU weights
    are bf16; the final 64->1 weight stays f32 as a [64, 1] column for the VPU
    reduction.  Biases are kept individually (f32) for the pure-JAX reference
    and concatenated into a single [128, 1] f32 column for the kernel.
    """
    params = {}
    biases = []
    for idx, (fan_in, fan_out) in enumerate(_DIMS, start=1):
        key, kw, kb = jax.random.split(key, 3)
        bound = 1.0 / (fan_in ** 0.5)
        w = jax.random.uniform(kw, (fan_out, fan_in), jnp.float32,
                               minval=-bound, maxval=bound)
        b = jax.random.uniform(kb, (fan_out,), jnp.float32,
                               minval=-bound, maxval=bound)
        if idx < 4:
            params[f"w{idx}"] = w.astype(jnp.bfloat16)
        else:
            params["w4"] = w.T                       # [64, 1] f32
        params[f"b{idx}"] = b
        biases.append(b)
    bias_cat = jnp.concatenate(biases)               # [113]
    bias_cat = jnp.pad(bias_cat, (0, _BIAS_LEN - bias_cat.shape[0]))
    params["bias"] = bias_cat.reshape(_BIAS_LEN, 1)  # [128, 1] f32
    return params


def reference_forward(x, params):
    """Pure-JAX reference with the same (bf16-in, f32-accumulate) precision."""
    h = x.T.astype(jnp.bfloat16)                     # [8, B]
    h = jnp.dot(params["w1"], h, preferred_element_type=jnp.float32) \
        + params["b1"][:, None]
    h = jnp.maximum(h.astype(jnp.bfloat16), 0.0)
    h = jnp.dot(params["w2"], h, preferred_element_type=jnp.float32) \
        + params["b2"][:, None]
    h = jnp.maximum(h.astype(jnp.bfloat16), 0.0)
    h = jnp.dot(params["w3"], h, preferred_element_type=jnp.float32) \
        + params["b3"][:, None]
    h = jnp.maximum(h, 0.0)
    out = jnp.sum(params["w4"] * h, axis=0, keepdims=True) + params["b4"][:, None]
    return out.T                                     # [B, 1]


if __name__ == "__main__":
    key = jax.random.PRNGKey(0)
    key, kx = jax.random.split(key)
    # B=4096 keeps the demo tiny but exercises a multi-step, megacore-balanced
    # grid (tile 2048, 2 steps).  NOTE: bit-parity with a pure-f32 PyTorch
    # forward is O(1e-3) off due to the bf16 MXU path.
    B = 4096
    x = jax.random.normal(kx, (B, 8), jnp.float32)

    params = init_params(key)

    out = binary_classification_forward(x, params, batch_tile=2048)
    out = jax.block_until_ready(out)

    ref = reference_forward(x, params)
    assert out.shape == (B, 1), out.shape
    assert jnp.allclose(out, ref, atol=1e-3, rtol=1e-3), (
        float(jnp.max(jnp.abs(out - ref))))

    # Also check a tile-unaligned batch (padding path + single-step grid).
    B2 = 300
    x2 = jax.random.normal(jax.random.PRNGKey(1), (B2, 8), jnp.float32)
    out2 = jax.block_until_ready(binary_classification_forward(x2, params))
    ref2 = reference_forward(x2, params)
    assert out2.shape == (B2, 1), out2.shape
    assert jnp.allclose(out2, ref2, atol=1e-3, rtol=1e-3), (
        float(jnp.max(jnp.abs(out2 - ref2))))

    print("KERNEL_OK")
</pallas_src>

<mosaic_0001>
module attributes {stable_mosaic.version = 11 : i64} {
  func.func @mlp_kernel(%arg0: i32, %arg1: memref<2048x8xf32, #tpu.memory_space<vmem>>, %arg2: memref<16x8xbf16, #tpu.memory_space<vmem>>, %arg3: memref<32x16xbf16, #tpu.memory_space<vmem>>, %arg4: memref<64x32xbf16, #tpu.memory_space<vmem>>, %arg5: memref<64x1xf32, #tpu.memory_space<vmem>>, %arg6: memref<128x1xf32, #tpu.memory_space<vmem>>, %arg7: memref<1x2048xf32, #tpu.memory_space<vmem>>) attributes {dimension_semantics = [#tpu.dimension_semantics<parallel>], iteration_bounds = array<i64: 2>, scalar_prefetch = 0 : i64, scratch_operands = 0 : i64, tpu.core_type = #tpu.core_type<tc>, window_params = [{transform_indices = @transform_0, window_bounds = array<i64: 2048, 8>}, {pipeline_mode = #tpu.pipeline_mode<synchronous>, transform_indices = @transform_1, window_bounds = array<i64: 16, 8>}, {pipeline_mode = #tpu.pipeline_mode<synchronous>, transform_indices = @transform_2, window_bounds = array<i64: 32, 16>}, {pipeline_mode = #tpu.pipeline_mode<synchronous>, transform_indices = @transform_3, window_bounds = array<i64: 64, 32>}, {pipeline_mode = #tpu.pipeline_mode<synchronous>, transform_indices = @transform_4, window_bounds = array<i64: 64, 1>}, {pipeline_mode = #tpu.pipeline_mode<synchronous>, transform_indices = @transform_5, window_bounds = array<i64: 128, 1>}, {transform_indices = @transform_6, window_bounds = array<i64: 1, 2048>}]} {
    %c0 = arith.constant 0 : index
    %c0_0 = arith.constant 0 : index
    %0 = vector.load %arg1[%c0, %c0_0] : memref<2048x8xf32, #tpu.memory_space<vmem>>, vector<2048x8xf32>
    %1 = tpu.transpose %0, [1, 0] : vector<2048x8xf32> -> vector<8x2048xf32>
    %2 = arith.truncf %1 : vector<8x2048xf32> to vector<8x2048xbf16>
    %c0_1 = arith.constant 0 : index
    %c0_2 = arith.constant 0 : index
    %3 = vector.load %arg6[%c0_1, %c0_2] : memref<128x1xf32, #tpu.memory_space<vmem>>, vector<128x1xf32>
    %4 = vector.extract_strided_slice %3 {offsets = [0, 0], sizes = [16, 1], strides = [1, 1]} : vector<128x1xf32> to vector<16x1xf32>
    %5 = vector.extract_strided_slice %3 {offsets = [16, 0], sizes = [32, 1], strides = [1, 1]} : vector<128x1xf32> to vector<32x1xf32>
    %6 = vector.extract_strided_slice %3 {offsets = [48, 0], sizes = [64, 1], strides = [1, 1]} : vector<128x1xf32> to vector<64x1xf32>
    %7 = vector.extract_strided_slice %3 {offsets = [112, 0], sizes = [1, 1], strides = [1, 1]} : vector<128x1xf32> to vector<1x1xf32>
    %c0_3 = arith.constant 0 : index
    %c0_4 = arith.constant 0 : index
    %8 = vector.load %arg2[%c0_3, %c0_4] : memref<16x8xbf16, #tpu.memory_space<vmem>>, vector<16x8xbf16>
    %cst = arith.constant dense<0.000000e+00> : vector<16x2048xf32>
    %9 = tpu.matmul %8, %2, %cst {dimension_numbers = #tpu.dot_dimension_numbers<[1], [0], [0], [1], [0, 0, 1, 1], [], []>} : vector<16x8xbf16>, vector<8x2048xbf16>, vector<16x2048xf32> -> vector<16x2048xf32>
    %10 = vector.broadcast %4 : vector<16x1xf32> to vector<16x2048xf32>
    %11 = arith.addf %9, %10 : vector<16x2048xf32>
    %12 = arith.truncf %11 : vector<16x2048xf32> to vector<16x2048xbf16>
    %cst_5 = arith.constant 0.000000e+00 : bf16
    %13 = vector.broadcast %cst_5 : bf16 to vector<16x2048xbf16>
    %14 = arith.maximumf %12, %13 : vector<16x2048xbf16>
    %c0_6 = arith.constant 0 : index
    %c0_7 = arith.constant 0 : index
    %15 = vector.load %arg3[%c0_6, %c0_7] : memref<32x16xbf16, #tpu.memory_space<vmem>>, vector<32x16xbf16>
    %cst_8 = arith.constant dense<0.000000e+00> : vector<32x2048xf32>
    %16 = tpu.matmul %15, %14, %cst_8 {dimension_numbers = #tpu.dot_dimension_numbers<[1], [0], [0], [1], [0, 0, 1, 1], [], []>} : vector<32x16xbf16>, vector<16x2048xbf16>, vector<32x2048xf32> -> vector<32x2048xf32>
    %17 = vector.broadcast %5 : vector<32x1xf32> to vector<32x2048xf32>
    %18 = arith.addf %16, %17 : vector<32x2048xf32>
    %19 = arith.truncf %18 : vector<32x2048xf32> to vector<32x2048xbf16>
    %cst_9 = arith.constant 0.000000e+00 : bf16
    %20 = vector.broadcast %cst_9 : bf16 to vector<32x2048xbf16>
    %21 = arith.maximumf %19, %20 : vector<32x2048xbf16>
    %c0_10 = arith.constant 0 : index
    %c0_11 = arith.constant 0 : index
    %22 = vector.load %arg4[%c0_10, %c0_11] : memref<64x32xbf16, #tpu.memory_space<vmem>>, vector<64x32xbf16>
    %cst_12 = arith.constant dense<0.000000e+00> : vector<64x2048xf32>
    %23 = tpu.matmul %22, %21, %cst_12 {dimension_numbers = #tpu.dot_dimension_numbers<[1], [0], [0], [1], [0, 0, 1, 1], [], []>} : vector<64x32xbf16>, vector<32x2048xbf16>, vector<64x2048xf32> -> vector<64x2048xf32>
    %24 = vector.broadcast %6 : vector<64x1xf32> to vector<64x2048xf32>
    %25 = arith.addf %23, %24 : vector<64x2048xf32>
    %cst_13 = arith.constant 0.000000e+00 : f32
    %26 = vector.broadcast %cst_13 : f32 to vector<64x2048xf32>
    %27 = arith.maximumf %25, %26 : vector<64x2048xf32>
    %c0_14 = arith.constant 0 : index
    %c0_15 = arith.constant 0 : index
    %28 = vector.load %arg5[%c0_14, %c0_15] : memref<64x1xf32, #tpu.memory_space<vmem>>, vector<64x1xf32>
    %29 = vector.broadcast %28 : vector<64x1xf32> to vector<64x2048xf32>
    %30 = arith.mulf %29, %27 : vector<64x2048xf32>
    %cst_16 = arith.constant dense<0.000000e+00> : vector<2048xf32>
    %31 = vector.multi_reduction <add>, %30, %cst_16 [0] : vector<64x2048xf32> to vector<2048xf32>
    %32 = vector.shape_cast %31 : vector<2048xf32> to vector<1x2048xf32>
    %33 = vector.broadcast %7 : vector<1x1xf32> to vector<1x2048xf32>
    %34 = arith.addf %32, %33 : vector<1x2048xf32>
    %c0_17 = arith.constant 0 : index
    %c0_18 = arith.constant 0 : index
    %35 = vector.load %arg7[%c0_17, %c0_18] : memref<1x2048xf32, #tpu.memory_space<vmem>>, vector<1x2048xf32>
    tpu.vector_store %arg7[%c0_17, %c0_18], %34 {strides = array<i32>} : memref<1x2048xf32, #tpu.memory_space<vmem>>, vector<1x2048xf32>,
    return
  }
  func.func @transform_0(%arg0: i32) -> (i32, i32) {
    %c0_i32 = arith.constant 0 : i32
    %c0_i32_0 = arith.constant 0 : i32
    return %arg0, %c0_i32 : i32, i32
  }
  func.func @transform_1(%arg0: i32) -> (i32, i32) {
    %c0_i32 = arith.constant 0 : i32
    %c0_i32_0 = arith.constant 0 : i32
    %c0_i32_1 = arith.constant 0 : i32
    return %c0_i32, %c0_i32_0 : i32, i32
  }
  func.func @transform_2(%arg0: i32) -> (i32, i32) {
    %c0_i32 = arith.constant 0 : i32
    %c0_i32_0 = arith.constant 0 : i32
    %c0_i32_1 = arith.constant 0 : i32
    return %c0_i32, %c0_i32_0 : i32, i32
  }
  func.func @transform_3(%arg0: i32) -> (i32, i32) {
    %c0_i32 = arith.constant 0 : i32
    %c0_i32_0 = arith.constant 0 : i32
    %c0_i32_1 = arith.constant 0 : i32
    return %c0_i32, %c0_i32_0 : i32, i32
  }
  func.func @transform_4(%arg0: i32) -> (i32, i32) {
    %c0_i32 = arith.constant 0 : i32
    %c0_i32_0 = arith.constant 0 : i32
    %c0_i32_1 = arith.constant 0 : i32
    return %c0_i32, %c0_i32_0 : i32, i32
  }
  func.func @transform_5(%arg0: i32) -> (i32, i32) {
    %c0_i32 = arith.constant 0 : i32
    %c0_i32_0 = arith.constant 0 : i32
    %c0_i32_1 = arith.constant 0 : i32
    return %c0_i32, %c0_i32_0 : i32, i32
  }
  func.func @transform_6(%arg0: i32) -> (i32, i32) {
    %c0_i32 = arith.constant 0 : i32
    %c0_i32_0 = arith.constant 0 : i32
    return %c0_i32, %arg0 : i32, i32
  }
}

</mosaic_0001>

<bundles_post_ra>
// kernel: tpu_custom_call.1
= control target key start
LH: loop header
LB: loop body
LE: loop exit
PB: predicated region body
PF: predicated region fallthrough
CT: control target
= control target key end

     0   :  { %11 = vsyncpa [#allocation3], 0  ;;  %s5178_s0 = inlined_call_operand.vmem [shape: f32[4096,8], index: 0, kind: input, shape index: {}]   ;;  %s5179_s1 = inlined_call_operand.vmem [shape: bf16[16,8], index: 1, kind: input, shape index: {}]   ;;  %s5180_s2 = inlined_call_operand.vmem [shape: bf16[32,16], index: 2, kind: input, shape index: {}]   ;;  %s5181_s3 = inlined_call_operand.vmem [shape: bf16[64,32], index: 3, kind: input, shape index: {}]   ;;  %s5182_s4 = inlined_call_operand.vmem [shape: f32[64,1], index: 4, kind: input, shape index: {}]   ;;  %s5183_s5 = inlined_call_operand.vmem [shape: f32[128,1], index: 5, kind: input, shape index: {}]   ;;  %s5184_s6 = inlined_call_operand.hbm [shape: f32[1,4096], index: 6, kind: output, shape index: {}]  }
   0x1   :  { %13 = vsyncpa [#allocation3 + $0x1], 0  ;;  %s3950_s21 = smov 0   ;;  %s3952_s22 = smov 0  }
   0x2   :  { %s3954_s23 = smov 0   ;;  %s3956_s24 = smov 0  }
   0x3 LB: > { %s3417_s25 = sadd.s32 4294967295, %s3910_s24   ;;  %s3418_s26 = sadd.s32 4294967294, %s3910_s24   ;;  %s3910_s24 = sphi %s3956_s24, %s5200_s24   ;;  %s3906_s23 = sphi %s3954_s23, %s5199_s23   ;;  %s3902_s22 = sphi %s3952_s22, %s5198_s22   ;;  %s3898_s21 = sphi %s3950_s21, %s5197_s21  }
   0x4   : > { %s3973_s27 = sadd.s32 1, %s3910_s24   ;;  %s157_s28 = sadd.s32 1, %s3906_s23 }
   0x5   : > { %s154_s29 = ssub.s32 %s3910_s24, %s3973_s27  ;;  %p167_p0 = scmp.ne.s32.totalorder %s3906_s23, %s3902_s22 }
   0x6   : > { %p155_p1 = scmp.eq.s32.totalorder %s154_s29, 0  ;;  %p168_p2 = scmp.eq.s32.totalorder %s3417_s25, 1 }
   0x7   : > { %p173_p3 = scmp.ne.s32.totalorder %s3902_s22, %s3898_s21  ;;  %p174_p4 = scmp.eq.s32.totalorder %s3418_s26, 1 }
   0x8   : > { %s3983_s30 = scalar_select %p155_p1, %s3906_s23, %s157_s28  }
   0x9   : > { %p3985_p5 = por %p168_p2, %p167_p0  ;;  %p3989_p6 = por %p174_p4, %p173_p3 }
   0xa   : > { %p3421_p7 = scmp.ge.s32.totalorder %s3910_s24, 1  ;;  %p216_p8 = scmp.lt.s32.totalorder %s3910_s24, 3 }
   0xc   : > { %p217_p9 = pnand %p3421_p7, %p216_p8 }
   0xe   : > { %220 = sbr.rel (%p217_p9) target bundleno = 1108 (0x454), region = 44 }
  0x15   : > { %s3995_s9 = sshll.u32 %s3417_s25, 8  ;;  %vm1074_vm0 = vcmask 1043456   ;;  %vm1070_vm1 = vcmask 64512   ;;  %vm1533_vm2 = vcmask 130048   ;;  %vm2096_vm3 = vcmask 261120   ;;  %s243_s15 = sand.u32 1, %s3902_s22  }
  0x16   : > { %p247_p10 = scmp.lt.s32.totalorder %s3995_s9, 511  ;;  %s3422_s16 = sshll.u32 %s243_s15, 4 }
  0x17   : > { %s5029_s17 = scalar_lea.vmem [#allocation2], %s3422_s16  ;;  %s5133_s25 = scalar_lea.hbm %s5184_s6, %s3995_s9 }
  0x18   : > { %s248_s10 = scalar_select %p247_p10, %s3995_s9, 511 }
  0x19   : > { %s3359_s18 = sshll.u32 %s5029_s17, 4  ;;  %s3345_s26 = scalar_lea.sflag [#allocation3], %s243_s15  ;;  %s5135_s18 = int_to_ptr.vmem [resolvable:$true] %s3359_s18 }
  0x1a   : > { %s3424_s11 = sshll.u32 %s248_s10, 3  ;;  %s3848_s28 = scalar_lea.vmem %s5135_s18, 256 }
  0x1b   : > { %s4002_s14 = scalar_lea.vmem %s5178_s0, %s3424_s11  ;;  %p3849_p11 = scmp.ne.s32.totalorder %s5135_s18, %s3848_s28 }
  0x1c   : > { %v286_v0 = vld [vmem:[%s4002_s14 + $0x100] sm:$0xff]  ;;  %v287_v5 = vld [vmem:[%s4002_s14 + $0x108] sm:$0xff]  ;;  %v288_v12 = vld [vmem:[%s4002_s14 + $0x110] sm:$0xff]  ;;  %s3914_s29 = smov [#allocation2]  }
  0x1d   : > { %v302_v1 = vld [vmem:[%s4002_s14 + $0x180] sm:$0xff]  ;;  %v303_v6 = vld [vmem:[%s4002_s14 + $0x188] sm:$0xff]  ;;  %v304_v13 = vld [vmem:[%s4002_s14 + $0x190] sm:$0xff]  ;;  %p3850_p12 = pnand %p3849_p11, %p3985_p5  ;;  %s3852_s10 = sshll.u32 %s3914_s29, 4  ;;  %s3853_s10 = int_to_ptr.vmem [resolvable:$false] %s3852_s10 }
  0x1e   : > { %v254_v2 = vld [vmem:[%s4002_s14] sm:$0xff]  ;;  %v3580_v3 = vpack.i.bf16 %v302_v1, %v286_v0  ;;  %v255_v8 = vld [vmem:[%s4002_s14 + $0x8] sm:$0xff]  ;;  %v3582_v10 = vpack.i.bf16 %v303_v6, %v287_v5  ;;  %v256_v14 = vld [vmem:[%s4002_s14 + $0x10] sm:$0xff]  ;;  %v3584_v16 = vpack.i.bf16 %v304_v13, %v288_v12  ;;  %s3854_s11 = scalar_lea.vmem %s3853_s10, 512  ;;  %p3855_p0 = scmp.lt.s32.totalorder %s5135_s18, %s3853_s10 }
  0x1f   : > { %v270_v4 = vld [vmem:[%s4002_s14 + $0x80] sm:$0xff]  ;;  %v271_v9 = vld [vmem:[%s4002_s14 + $0x88] sm:$0xff]  ;;  %v272_v15 = vld [vmem:[%s4002_s14 + $0x90] sm:$0xff]  ;;  %p3851_p13 = pneg %p3850_p12  ;;  %p3856_p1 = scmp.lt.s32.totalorder %s3854_s11, %s3848_s28 }
  0x20   : > { %v3543_v7 = vpack.i.bf16 %v270_v4, %v254_v2  ;;  %3581 = vxpose.xlu1.b32.start [1/16] (narrow) %v3580_v3, 8  ;;  %v3545_v11 = vpack.i.bf16 %v271_v9, %v255_v8  ;;  %v3547_v17 = vpack.i.bf16 %v272_v15, %v256_v14  ;;  %v289_v18 = vld [vmem:[%s4002_s14 + $0x118] sm:$0xff]  ;;  %v290_v24 = vld [vmem:[%s4002_s14 + $0x120] sm:$0xff]  ;;  %v291_v30 = vld [vmem:[%s4002_s14 + $0x128] sm:$0xff] }
  0x21   : > { %v305_v19 = vld [vmem:[%s4002_s14 + $0x198] sm:$0xff]  ;;  %v306_v25 = vld [vmem:[%s4002_s14 + $0x1a0] sm:$0xff]  ;;  %v307_v31 = vld [vmem:[%s4002_s14 + $0x1a8] sm:$0xff]  ;;  %p3857_p2 = por %p3856_p1, %p3855_p0 }
  0x22   : > { %3544 = vxpose.xlu0.b32.start [1/16] (narrow) %v3543_v7, 8  ;;  %v257_v20 = vld [vmem:[%s4002_s14 + $0x18] sm:$0xff]  ;;  %v3586_v22 = vpack.i.bf16 %v305_v19, %v289_v18  ;;  %v258_v26 = vld [vmem:[%s4002_s14 + $0x20] sm:$0xff]  ;;  %v3588_v28 = vpack.i.bf16 %v306_v25, %v290_v24  ;;  %v259_v32 = vld [vmem:[%s4002_s14 + $0x28] sm:$0xff]  ;;  %v3590_v34 = vpack.i.bf16 %v307_v31, %v291_v30 }
  0x23   : > { %v273_v21 = vld [vmem:[%s4002_s14 + $0x98] sm:$0xff]  ;;  %v274_v27 = vld [vmem:[%s4002_s14 + $0xa0] sm:$0xff]  ;;  %v275_v33 = vld [vmem:[%s4002_s14 + $0xa8] sm:$0xff]  ;;  %p3858_p3 = pnand %p3857_p2, %p3851_p13 }
  0x24   : > { %3583 = vxpose.xlu1.b32.cont [2/16] (narrow) %v3582_v10, 8  ;;  %v3549_v23 = vpack.i.bf16 %v273_v21, %v257_v20  ;;  %v3551_v29 = vpack.i.bf16 %v274_v27, %v258_v26  ;;  %v3553_v35 = vpack.i.bf16 %v275_v33, %v259_v32  ;;  %v292_v36 = vld [vmem:[%s4002_s14 + $0x130] sm:$0xff]  ;;  %v293_v42 = vld [vmem:[%s4002_s14 + $0x138] sm:$0xff]  ;;  %v294_v48 = vld [vmem:[%s4002_s14 + $0x140] sm:$0xff] }
  0x25   : > { %v308_v37 = vld [vmem:[%s4002_s14 + $0x1b0] sm:$0xff]  ;;  %v309_v43 = vld [vmem:[%s4002_s14 + $0x1b8] sm:$0xff]  ;;  %v310_v49 = vld [vmem:[%s4002_s14 + $0x1c0] sm:$0xff] }
  0x26   : > { %3546 = vxpose.xlu0.b32.cont [2/16] (narrow) %v3545_v11, 8  ;;  %v260_v38 = vld [vmem:[%s4002_s14 + $0x30] sm:$0xff]  ;;  %v3592_v40 = vpack.i.bf16 %v308_v37, %v292_v36  ;;  %v261_v44 = vld [vmem:[%s4002_s14 + $0x38] sm:$0xff]  ;;  %v3594_v46 = vpack.i.bf16 %v309_v43, %v293_v42  ;;  %v262_v50 = vld [vmem:[%s4002_s14 + $0x40] sm:$0xff]  ;;  %v3596_v52 = vpack.i.bf16 %v310_v49, %v294_v48 }
  0x27   : > { %v276_v39 = vld [vmem:[%s4002_s14 + $0xb0] sm:$0xff]  ;;  %v277_v45 = vld [vmem:[%s4002_s14 + $0xb8] sm:$0xff]  ;;  %v278_v51 = vld [vmem:[%s4002_s14 + $0xc0] sm:$0xff] }
  0x28   : > { %3585 = vxpose.xlu1.b32.cont [3/16] (narrow) %v3584_v16, 8  ;;  %v3555_v41 = vpack.i.bf16 %v276_v39, %v260_v38  ;;  %v3557_v47 = vpack.i.bf16 %v277_v45, %v261_v44  ;;  %v3559_v53 = vpack.i.bf16 %v278_v51, %v262_v50  ;;  %v295_v54 = vld [vmem:[%s4002_s14 + $0x148] sm:$0xff]  ;;  %v296_v60 = vld [vmem:[%s4002_s14 + $0x150] sm:$0xff]  ;;  %v297_v2 = vld [vmem:[%s4002_s14 + $0x158] sm:$0xff] }
  0x29   : > { %v311_v55 = vld [vmem:[%s4002_s14 + $0x1c8] sm:$0xff]  ;;  %v312_v61 = vld [vmem:[%s4002_s14 + $0x1d0] sm:$0xff]  ;;  %v313_v3 = vld [vmem:[%s4002_s14 + $0x1d8] sm:$0xff] }
  0x2a   : > { %3548 = vxpose.xlu0.b32.cont [3/16] (narrow) %v3547_v17, 8  ;;  %v263_v56 = vld [vmem:[%s4002_s14 + $0x48] sm:$0xff]  ;;  %v3598_v58 = vpack.i.bf16 %v311_v55, %v295_v54  ;;  %v264_v62 = vld [vmem:[%s4002_s14 + $0x50] sm:$0xff]  ;;  %v3600_v0 = vpack.i.bf16 %v312_v61, %v296_v60  ;;  %v265_v4 = vld [vmem:[%s4002_s14 + $0x58] sm:$0xff]  ;;  %v3602_v6 = vpack.i.bf16 %v313_v3, %v297_v2  ;;  %v3912_v2 = vmov 0  }
  0x2b   : > { %v279_v57 = vld [vmem:[%s4002_s14 + $0xc8] sm:$0xff]  ;;  %v280_v63 = vld [vmem:[%s4002_s14 + $0xd0] sm:$0xff]  ;;  %v281_v5 = vld [vmem:[%s4002_s14 + $0xd8] sm:$0xff]  ;;  %1155 = vmatprep.mubr.bf16.mxu0 %v3912_v2  ;;  %1198 = vmatprep.mubr.bf16.mxu1 %v3912_v2 }
  0x2c   : > { %3587 = vxpose.xlu1.b32.cont [4/16] (narrow) %v3586_v22, 8  ;;  %v3561_v59 = vpack.i.bf16 %v279_v57, %v263_v56  ;;  %v3563_v1 = vpack.i.bf16 %v280_v63, %v264_v62  ;;  %v3565_v7 = vpack.i.bf16 %v281_v5, %v265_v4  ;;  %v298_v8 = vld [vmem:[%s4002_s14 + $0x160] sm:$0xff]  ;;  %v299_v14 = vld [vmem:[%s4002_s14 + $0x168] sm:$0xff]  ;;  %v300_v20 = vld [vmem:[%s4002_s14 + $0x170] sm:$0xff] }
  0x2d   : > { %v314_v9 = vld [vmem:[%s4002_s14 + $0x1e0] sm:$0xff]  ;;  %v315_v15 = vld [vmem:[%s4002_s14 + $0x1e8] sm:$0xff]  ;;  %v316_v21 = vld [vmem:[%s4002_s14 + $0x1f0] sm:$0xff] }
  0x2e   : > { %3550 = vxpose.xlu0.b32.cont [4/16] (narrow) %v3549_v23, 8  ;;  %v266_v10 = vld [vmem:[%s4002_s14 + $0x60] sm:$0xff]  ;;  %v3604_v12 = vpack.i.bf16 %v314_v9, %v298_v8  ;;  %v267_v16 = vld [vmem:[%s4002_s14 + $0x68] sm:$0xff]  ;;  %v3606_v18 = vpack.i.bf16 %v315_v15, %v299_v14  ;;  %v268_v22 = vld [vmem:[%s4002_s14 + $0x70] sm:$0xff]  ;;  %v3608_v24 = vpack.i.bf16 %v316_v21, %v300_v20 }
  0x2f   : > { %v282_v11 = vld [vmem:[%s4002_s14 + $0xe0] sm:$0xff]  ;;  %v283_v17 = vld [vmem:[%s4002_s14 + $0xe8] sm:$0xff]  ;;  %v284_v23 = vld [vmem:[%s4002_s14 + $0xf0] sm:$0xff] }
  0x30   : > { %3589 = vxpose.xlu1.b32.cont [5/16] (narrow) %v3588_v28, 8  ;;  %v3567_v13 = vpack.i.bf16 %v282_v11, %v266_v10  ;;  %v3569_v19 = vpack.i.bf16 %v283_v17, %v267_v16  ;;  %v3571_v25 = vpack.i.bf16 %v284_v23, %v268_v22  ;;  %v301_v26 = vld [vmem:[%s4002_s14 + $0x178] sm:$0xff]  ;;  %v350_v32 = vld [vmem:[%s4002_s14 + $0x300] sm:$0xff]  ;;  %v351_v38 = vld [vmem:[%s4002_s14 + $0x308] sm:$0xff] }
  0x31   : > { %v317_v27 = vld [vmem:[%s4002_s14 + $0x1f8] sm:$0xff]  ;;  %v366_v33 = vld [vmem:[%s4002_s14 + $0x380] sm:$0xff]  ;;  %v367_v39 = vld [vmem:[%s4002_s14 + $0x388] sm:$0xff] }
  0x32   : > { %3552 = vxpose.xlu0.b32.cont [5/16] (narrow) %v3551_v29, 8  ;;  %v269_v28 = vld [vmem:[%s4002_s14 + $0x78] sm:$0xff]  ;;  %v3610_v30 = vpack.i.bf16 %v317_v27, %v301_v26  ;;  %v3654_v36 = vpack.i.bf16 %v366_v33, %v350_v32  ;;  %v3656_v42 = vpack.i.bf16 %v367_v39, %v351_v38  ;;  %v352_v44 = vld [vmem:[%s4002_s14 + $0x310] sm:$0xff]  ;;  %v354_v56 = vld [vmem:[%s4002_s14 + $0x320] sm:$0xff] }
  0x33   : > { %v285_v29 = vld [vmem:[%s4002_s14 + $0xf8] sm:$0xff]  ;;  %v368_v45 = vld [vmem:[%s4002_s14 + $0x390] sm:$0xff]  ;;  %v370_v57 = vld [vmem:[%s4002_s14 + $0x3a0] sm:$0xff] }
  0x34   : > { %3591 = vxpose.xlu1.b32.cont [6/16] (narrow) %v3590_v34, 8  ;;  %v3573_v31 = vpack.i.bf16 %v285_v29, %v269_v28  ;;  %v318_v34 = vld [vmem:[%s4002_s14 + $0x200] sm:$0xff]  ;;  %v3658_v48 = vpack.i.bf16 %v368_v45, %v352_v44  ;;  %v353_v50 = vld [vmem:[%s4002_s14 + $0x318] sm:$0xff]  ;;  %v3662_v60 = vpack.i.bf16 %v370_v57, %v354_v56  ;;  %v355_v62 = vld [vmem:[%s4002_s14 + $0x328] sm:$0xff] }
  0x35   : > { %v369_v51 = vld [vmem:[%s4002_s14 + $0x398] sm:$0xff]  ;;  %v371_v63 = vld [vmem:[%s4002_s14 + $0x3a8] sm:$0xff]  ;;  %v356_v5 = vld [vmem:[%s4002_s14 + $0x330] sm:$0xff] }
  0x36   : > { %3554 = vxpose.xlu0.b32.cont [6/16] (narrow) %v3553_v35, 8  ;;  %v334_v35 = vld [vmem:[%s4002_s14 + $0x280] sm:$0xff]  ;;  %v3660_v54 = vpack.i.bf16 %v369_v51, %v353_v50  ;;  %v3664_v3 = vpack.i.bf16 %v371_v63, %v355_v62  ;;  %v340_v8 = vld [vmem:[%s4002_s14 + $0x2b0] sm:$0xff]  ;;  %v357_v11 = vld [vmem:[%s4002_s14 + $0x338] sm:$0xff] }
  0x37   : > { %v3617_v37 = vpack.i.bf16 %v334_v35, %v318_v34  ;;  %v341_v14 = vld [vmem:[%s4002_s14 + $0x2b8] sm:$0xff]  ;;  %v358_v17 = vld [vmem:[%s4002_s14 + $0x340] sm:$0xff]  ;;  %v359_v23 = vld [vmem:[%s4002_s14 + $0x348] sm:$0xff] }
  0x38   : > { %3593 = vxpose.xlu1.b32.cont [7/16] (narrow) %v3592_v40, 8  ;;  %v319_v40 = vld [vmem:[%s4002_s14 + $0x208] sm:$0xff]  ;;  %v342_v20 = vld [vmem:[%s4002_s14 + $0x2c0] sm:$0xff]  ;;  %v360_v29 = vld [vmem:[%s4002_s14 + $0x350] sm:$0xff] }
  0x39   : > { %v343_v26 = vld [vmem:[%s4002_s14 + $0x2c8] sm:$0xff]  ;;  %v344_v32 = vld [vmem:[%s4002_s14 + $0x2d0] sm:$0xff]  ;;  %v361_v35 = vld [vmem:[%s4002_s14 + $0x358] sm:$0xff] }
  0x3a   : > { %3556 = vxpose.xlu0.b32.cont [7/16] (narrow) %v3555_v41, 8  ;;  %v335_v41 = vld [vmem:[%s4002_s14 + $0x288] sm:$0xff]  ;;  %v345_v38 = vld [vmem:[%s4002_s14 + $0x2d8] sm:$0xff]  ;;  %v346_v44 = vld [vmem:[%s4002_s14 + $0x2e0] sm:$0xff] }
  0x3b   : > { %v3619_v43 = vpack.i.bf16 %v335_v41, %v319_v40  ;;  %v362_v41 = vld [vmem:[%s4002_s14 + $0x360] sm:$0xff]  ;;  %v347_v50 = vld [vmem:[%s4002_s14 + $0x2e8] sm:$0xff]  ;;  %v348_v56 = vld [vmem:[%s4002_s14 + $0x2f0] sm:$0xff] }
  0x3c   : > { %3595 = vxpose.xlu1.b32.cont [8/16] (narrow) %v3594_v46, 8  ;;  %v320_v46 = vld [vmem:[%s4002_s14 + $0x210] sm:$0xff]  ;;  %v349_v62 = vld [vmem:[%s4002_s14 + $0x2f8] sm:$0xff] }
  0x3e   : > { %3558 = vxpose.xlu0.b32.cont [8/16] (narrow) %v3557_v47, 8  ;;  %v336_v47 = vld [vmem:[%s4002_s14 + $0x290] sm:$0xff] }
  0x3f   : > { %v3621_v49 = vpack.i.bf16 %v336_v47, %v320_v46  ;;  %v363_v47 = vld [vmem:[%s4002_s14 + $0x368] sm:$0xff] }
  0x40   : > { %3597 = vxpose.xlu1.b32.cont [9/16] (narrow) %v3596_v52, 8  ;;  %v321_v52 = vld [vmem:[%s4002_s14 + $0x218] sm:$0xff] }
  0x42   : > { %3560 = vxpose.xlu0.b32.cont [9/16] (narrow) %v3559_v53, 8  ;;  %v337_v53 = vld [vmem:[%s4002_s14 + $0x298] sm:$0xff] }
  0x43   : > { %v3623_v55 = vpack.i.bf16 %v337_v53, %v321_v52  ;;  %v364_v53 = vld [vmem:[%s4002_s14 + $0x370] sm:$0xff] }
  0x44   : > { %3599 = vxpose.xlu1.b32.cont [10/16] (narrow) %v3598_v58, 8  ;;  %v322_v58 = vld [vmem:[%s4002_s14 + $0x220] sm:$0xff] }
  0x46   : > { %3562 = vxpose.xlu0.b32.cont [10/16] (narrow) %v3561_v59, 8  ;;  %v338_v59 = vld [vmem:[%s4002_s14 + $0x2a0] sm:$0xff] }
  0x47   : > { %v3625_v61 = vpack.i.bf16 %v338_v59, %v322_v58  ;;  %v365_v59 = vld [vmem:[%s4002_s14 + $0x378] sm:$0xff] }
  0x48   : > { %3601 = vxpose.xlu1.b32.cont [11/16] (narrow) %v3600_v0, 8  ;;  %v323_v0 = vld [vmem:[%s4002_s14 + $0x228] sm:$0xff] }
  0x4a   : > { %3564 = vxpose.xlu0.b32.cont [11/16] (narrow) %v3563_v1, 8  ;;  %v339_v1 = vld [vmem:[%s4002_s14 + $0x2a8] sm:$0xff] }
  0x4b   : > { %v3627_v4 = vpack.i.bf16 %v339_v1, %v323_v0  ;;  %v414_v1 = vld [vmem:[%s4002_s14 + $0x500] sm:$0xff] }
  0x4c   : > { %3603 = vxpose.xlu1.b32.cont [12/16] (narrow) %v3602_v6, 8  ;;  %v372_v6 = vld [vmem:[%s4002_s14 + $0x3b0] sm:$0xff] }
  0x4d   : > { %v3666_v9 = vpack.i.bf16 %v372_v6, %v356_v5  ;;  %v398_v5 = vld [vmem:[%s4002_s14 + $0x480] sm:$0xff] }
  0x4e   : > { %3566 = vxpose.xlu0.b32.cont [12/16] (narrow) %v3565_v7, 8  ;;  %v324_v7 = vld [vmem:[%s4002_s14 + $0x230] sm:$0xff] }
  0x4f   : > { %v3629_v10 = vpack.i.bf16 %v340_v8, %v324_v7  ;;  %v415_v7 = vld [vmem:[%s4002_s14 + $0x508] sm:$0xff] }
  0x50   : > { %3605 = vxpose.xlu1.b32.cont [13/16] (narrow) %v3604_v12, 8  ;;  %v373_v12 = vld [vmem:[%s4002_s14 + $0x3b8] sm:$0xff] }
  0x51   : > { %v3668_v15 = vpack.i.bf16 %v373_v12, %v357_v11  ;;  %v399_v11 = vld [vmem:[%s4002_s14 + $0x488] sm:$0xff] }
  0x52   : > { %3568 = vxpose.xlu0.b32.cont [13/16] (narrow) %v3567_v13, 8  ;;  %v325_v13 = vld [vmem:[%s4002_s14 + $0x238] sm:$0xff] }
  0x53   : > { %v3631_v16 = vpack.i.bf16 %v341_v14, %v325_v13 }
  0x54   : > { %3607 = vxpose.xlu1.b32.cont [14/16] (narrow) %v3606_v18, 8  ;;  %v374_v18 = vld [vmem:[%s4002_s14 + $0x3c0] sm:$0xff] }
  0x55   : > { %v3670_v21 = vpack.i.bf16 %v374_v18, %v358_v17 }
  0x56   : > { %3570 = vxpose.xlu0.b32.cont [14/16] (narrow) %v3569_v19, 8  ;;  %v326_v19 = vld [vmem:[%s4002_s14 + $0x240] sm:$0xff] }
  0x57   : > { %v3633_v22 = vpack.i.bf16 %v342_v20, %v326_v19  ;;  %v384_v20 = vld [vmem:[%s4002_s14 + $0x410] sm:$0xff] }
  0x58   : > { %3609 = vxpose.xlu1.b32.cont [15/16] (narrow) %v3608_v24, 8  ;;  %v375_v24 = vld [vmem:[%s4002_s14 + $0x3c8] sm:$0xff] }
  0x59   : > { %v3672_v27 = vpack.i.bf16 %v375_v24, %v359_v23 }
  0x5a   : > { %3572 = vxpose.xlu0.b32.cont [15/16] (narrow) %v3571_v25, 8  ;;  %v327_v25 = vld [vmem:[%s4002_s14 + $0x248] sm:$0xff] }
  0x5b   : > { %v3635_v28 = vpack.i.bf16 %v343_v26, %v327_v25 }
  0x5c   : > { %3611 = vxpose.xlu1.b32.end [16/16] (narrow) %v3610_v30, 8  ;;  %v376_v30 = vld [vmem:[%s4002_s14 + $0x3d0] sm:$0xff] }
  0x5d   : > { %v3674_v33 = vpack.i.bf16 %v376_v30, %v360_v29  ;;  %v417_v30 = vld [vmem:[%s4002_s14 + $0x518] sm:$0xff] }
  0x5e   : > { %3574 = vxpose.xlu0.b32.end [16/16] (narrow) %v3573_v31, 8  ;;  %v328_v31 = vld [vmem:[%s4002_s14 + $0x250] sm:$0xff] }
  0x5f   : > { %v3637_v34 = vpack.i.bf16 %v344_v32, %v328_v31  ;;  %v433_v31 = vld [vmem:[%s4002_s14 + $0x598] sm:$0xff] }
  0x60   : > { %3655 = vxpose.xlu1.b32.start [1/16] (narrow) %v3654_v36, 8  ;;  %v377_v36 = vld [vmem:[%s4002_s14 + $0x3d8] sm:$0xff] }
  0x61   : > { %v3676_v39 = vpack.i.bf16 %v377_v36, %v361_v35  ;;  %v401_v35 = vld [vmem:[%s4002_s14 + $0x498] sm:$0xff] }
  0x62   : > { %3618 = vxpose.xlu0.b32.start [1/16] (narrow) %v3617_v37, 8  ;;  %v329_v37 = vld [vmem:[%s4002_s14 + $0x258] sm:$0xff] }
  0x63   : > { %v3639_v40 = vpack.i.bf16 %v345_v38, %v329_v37  ;;  %v3734_v37 = vpack.i.bf16 %v433_v31, %v417_v30  ;;  %v427_v30 = vld [vmem:[%s4002_s14 + $0x568] sm:$0xff] }
  0x64   : > { %3657 = vxpose.xlu1.b32.cont [2/16] (narrow) %v3656_v42, 8  ;;  %v378_v42 = vld [vmem:[%s4002_s14 + $0x3e0] sm:$0xff]  ;;  %v443_v31 = vld [vmem:[%s4002_s14 + $0x5e8] sm:$0xff] }
  0x65   : > { %v3678_v45 = vpack.i.bf16 %v378_v42, %v362_v41  ;;  %v386_v41 = vld [vmem:[%s4002_s14 + $0x420] sm:$0xff] }
  0x66   : > { %3620 = vxpose.xlu0.b32.cont [2/16] (narrow) %v3619_v43, 8  ;;  %v330_v43 = vld [vmem:[%s4002_s14 + $0x260] sm:$0xff] }
  0x67   : > { %v3641_v46 = vpack.i.bf16 %v346_v44, %v330_v43  ;;  %v402_v42 = vld [vmem:[%s4002_s14 + $0x4a0] sm:$0xff] }
  0x68   : > { %3659 = vxpose.xlu1.b32.cont [3/16] (narrow) %v3658_v48, 8  ;;  %v379_v48 = vld [vmem:[%s4002_s14 + $0x3e8] sm:$0xff]  ;;  %v3699_v44 = vpack.i.bf16 %v402_v42, %v386_v41 }
  0x69   : > { %v3680_v51 = vpack.i.bf16 %v379_v48, %v363_v47  ;;  %v387_v47 = vld [vmem:[%s4002_s14 + $0x428] sm:$0xff] }
  0x6a   : > { %3622 = vxpose.xlu0.b32.cont [3/16] (narrow) %v3621_v49, 8  ;;  %v331_v49 = vld [vmem:[%s4002_s14 + $0x268] sm:$0xff] }
  0x6b   : > { %v3643_v52 = vpack.i.bf16 %v347_v50, %v331_v49  ;;  %v403_v48 = vld [vmem:[%s4002_s14 + $0x4a8] sm:$0xff] }
  0x6c   : > { %3661 = vxpose.xlu1.b32.cont [4/16] (narrow) %v3660_v54, 8  ;;  %v380_v54 = vld [vmem:[%s4002_s14 + $0x3f0] sm:$0xff]  ;;  %v3701_v50 = vpack.i.bf16 %v403_v48, %v387_v47 }
  0x6d   : > { %v3682_v57 = vpack.i.bf16 %v380_v54, %v364_v53  ;;  %v388_v53 = vld [vmem:[%s4002_s14 + $0x430] sm:$0xff] }
  0x6e   : > { %3624 = vxpose.xlu0.b32.cont [4/16] (narrow) %v3623_v55, 8  ;;  %v332_v55 = vld [vmem:[%s4002_s14 + $0x270] sm:$0xff] }
  0x6f   : > { %v3645_v58 = vpack.i.bf16 %v348_v56, %v332_v55  ;;  %v404_v54 = vld [vmem:[%s4002_s14 + $0x4b0] sm:$0xff] }
  0x70   : > { %3663 = vxpose.xlu1.b32.cont [5/16] (narrow) %v3662_v60, 8  ;;  %v381_v60 = vld [vmem:[%s4002_s14 + $0x3f8] sm:$0xff]  ;;  %v3703_v56 = vpack.i.bf16 %v404_v54, %v388_v53  ;;  %v479_v54 = vld [vmem:[%s4002_s14 + $0x708] sm:$0xff] }
  0x71   : > { %v3684_v63 = vpack.i.bf16 %v381_v60, %v365_v59  ;;  %v389_v59 = vld [vmem:[%s4002_s14 + $0x438] sm:$0xff] }
  0x72   : > { %3626 = vxpose.xlu0.b32.cont [5/16] (narrow) %v3625_v61, 8  ;;  %v333_v61 = vld [vmem:[%s4002_s14 + $0x278] sm:$0xff] }
  0x73   : > { %v3647_v0 = vpack.i.bf16 %v349_v62, %v333_v61  ;;  %v405_v60 = vld [vmem:[%s4002_s14 + $0x4b8] sm:$0xff] }
  0x74   : > { %3665 = vxpose.xlu1.b32.cont [6/16] (narrow) %v3664_v3, 8  ;;  %v430_v3 = vld [vmem:[%s4002_s14 + $0x580] sm:$0xff]  ;;  %v3705_v62 = vpack.i.bf16 %v405_v60, %v389_v59 }
  0x75   : > { %v3728_v6 = vpack.i.bf16 %v430_v3, %v414_v1  ;;  %v390_v1 = vld [vmem:[%s4002_s14 + $0x440] sm:$0xff] }
  0x76   : > { %3628 = vxpose.xlu0.b32.cont [6/16] (narrow) %v3627_v4, 8  ;;  %v382_v4 = vld [vmem:[%s4002_s14 + $0x400] sm:$0xff] }
  0x77   : > { %v3691_v8 = vpack.i.bf16 %v398_v5, %v382_v4  ;;  %v406_v3 = vld [vmem:[%s4002_s14 + $0x4c0] sm:$0xff] }
  0x78   : > { %3667 = vxpose.xlu1.b32.cont [7/16] (narrow) %v3666_v9, 8  ;;  %v431_v9 = vld [vmem:[%s4002_s14 + $0x588] sm:$0xff]  ;;  %v3707_v5 = vpack.i.bf16 %v406_v3, %v390_v1 }
  0x79   : > { %v3730_v12 = vpack.i.bf16 %v431_v9, %v415_v7  ;;  %v439_v7 = vld [vmem:[%s4002_s14 + $0x5c8] sm:$0xff] }
  0x7a   : > { %3630 = vxpose.xlu0.b32.cont [7/16] (narrow) %v3629_v10, 8  ;;  %v383_v10 = vld [vmem:[%s4002_s14 + $0x408] sm:$0xff] }
  0x7b   : > { %v3693_v13 = vpack.i.bf16 %v399_v11, %v383_v10  ;;  %v407_v9 = vld [vmem:[%s4002_s14 + $0x4c8] sm:$0xff] }
  0x7c   : > { %3669 = vxpose.xlu1.b32.cont [8/16] (narrow) %v3668_v15, 8  ;;  %v416_v15 = vld [vmem:[%s4002_s14 + $0x510] sm:$0xff] }
  0x7e   : > { %3632 = vxpose.xlu0.b32.cont [8/16] (narrow) %v3631_v16, 8  ;;  %v432_v16 = vld [vmem:[%s4002_s14 + $0x590] sm:$0xff] }
  0x7f   : > { %v3732_v26 = vpack.i.bf16 %v432_v16, %v416_v15  ;;  %v408_v15 = vld [vmem:[%s4002_s14 + $0x4d0] sm:$0xff] }
  0x80   : > { %3671 = vxpose.xlu1.b32.cont [9/16] (narrow) %v3670_v21, 8  ;;  %v400_v21 = vld [vmem:[%s4002_s14 + $0x490] sm:$0xff] }
  0x81   : > { %v3695_v29 = vpack.i.bf16 %v400_v21, %v384_v20  ;;  %v393_v20 = vld [vmem:[%s4002_s14 + $0x458] sm:$0xff] }
  0x82   : > { %3634 = vxpose.xlu0.b32.cont [9/16] (narrow) %v3633_v22, 8  ;;  %v409_v21 = vld [vmem:[%s4002_s14 + $0x4d8] sm:$0xff] }
  0x84   : > { %3673 = vxpose.xlu1.b32.cont [10/16] (narrow) %v3672_v27, 8 }
  0x86   : > { %3636 = vxpose.xlu0.b32.cont [10/16] (narrow) %v3635_v28, 8 }
  0x88   : > { %3675 = vxpose.xlu1.b32.cont [11/16] (narrow) %v3674_v33, 8  ;;  %v4153_v33 = vld [vmem:[%s5179_s1] sm:$0xff]  }
  0x8a   : > { %3638 = vxpose.xlu0.b32.cont [11/16] (narrow) %v3637_v34, 8  ;;  %v385_v34 = vld [vmem:[%s4002_s14 + $0x418] sm:$0xff] }
  0x8b   : > { %v3697_v38 = vpack.i.bf16 %v401_v35, %v385_v34  ;;  %v411_v34 = vld [vmem:[%s4002_s14 + $0x4e8] sm:$0xff]  ;;  %v3754_v35 = vpack.i.bf16 %v443_v31, %v427_v30 }
  0x8c   : > { %3677 = vxpose.xlu1.b32.cont [12/16] (narrow) %v3676_v39, 8  ;;  %v418_v39 = vld [vmem:[%s4002_s14 + $0x520] sm:$0xff]  ;;  %v451_v30 = vld [vmem:[%s4002_s14 + $0x628] sm:$0xff] }
  0x8d   : > { %v467_v31 = vld [vmem:[%s4002_s14 + $0x6a8] sm:$0xff] }
  0x8e   : > { %3640 = vxpose.xlu0.b32.cont [12/16] (narrow) %v3639_v40, 8  ;;  %v434_v40 = vld [vmem:[%s4002_s14 + $0x5a0] sm:$0xff] }
  0x8f   : > { %v3736_v43 = vpack.i.bf16 %v434_v40, %v418_v39  ;;  %v396_v39 = vld [vmem:[%s4002_s14 + $0x470] sm:$0xff] }
  0x90   : > { %3679 = vxpose.xlu1.b32.cont [13/16] (narrow) %v3678_v45, 8  ;;  %v419_v45 = vld [vmem:[%s4002_s14 + $0x528] sm:$0xff]  ;;  %v412_v40 = vld [vmem:[%s4002_s14 + $0x4f0] sm:$0xff] }
  0x91   : > { %v3719_v42 = vpack.i.bf16 %v412_v40, %v396_v39 }
  0x92   : > { %3642 = vxpose.xlu0.b32.cont [13/16] (narrow) %v3641_v46, 8  ;;  %v435_v46 = vld [vmem:[%s4002_s14 + $0x5a8] sm:$0xff] }
  0x93   : > { %v3738_v49 = vpack.i.bf16 %v435_v46, %v419_v45  ;;  %v397_v45 = vld [vmem:[%s4002_s14 + $0x478] sm:$0xff] }
  0x94   : > { %3681 = vxpose.xlu1.b32.cont [14/16] (narrow) %v3680_v51, 8  ;;  %v420_v51 = vld [vmem:[%s4002_s14 + $0x530] sm:$0xff]  ;;  %v413_v46 = vld [vmem:[%s4002_s14 + $0x4f8] sm:$0xff] }
  0x95   : > { %v3721_v48 = vpack.i.bf16 %v413_v46, %v397_v45 }
  0x96   : > { %3644 = vxpose.xlu0.b32.cont [14/16] (narrow) %v3643_v52, 8  ;;  %v436_v52 = vld [vmem:[%s4002_s14 + $0x5b0] sm:$0xff] }
  0x97   : > { %v3740_v55 = vpack.i.bf16 %v436_v52, %v420_v51  ;;  %v446_v51 = vld [vmem:[%s4002_s14 + $0x600] sm:$0xff] }
  0x98   : > { %3683 = vxpose.xlu1.b32.cont [15/16] (narrow) %v3682_v57, 8  ;;  %v421_v57 = vld [vmem:[%s4002_s14 + $0x538] sm:$0xff]  ;;  %v462_v52 = vld [vmem:[%s4002_s14 + $0x680] sm:$0xff] }
  0x9a   : > { %3646 = vxpose.xlu0.b32.cont [15/16] (narrow) %v3645_v58, 8  ;;  %v437_v58 = vld [vmem:[%s4002_s14 + $0x5b8] sm:$0xff] }
  0x9b   : > { %v3742_v61 = vpack.i.bf16 %v437_v58, %v421_v57  ;;  %v447_v57 = vld [vmem:[%s4002_s14 + $0x608] sm:$0xff] }
  0x9c   : > { %3685 = vxpose.xlu1.b32.end [16/16] (narrow) %v3684_v63, 8  ;;  %v422_v63 = vld [vmem:[%s4002_s14 + $0x540] sm:$0xff]  ;;  %v463_v58 = vld [vmem:[%s4002_s14 + $0x688] sm:$0xff] }
  0x9d   : > { %v3767_v60 = vpack.i.bf16 %v463_v58, %v447_v57 }
  0x9e   : > { %3648 = vxpose.xlu0.b32.end [16/16] (narrow) %v3647_v0, 8  ;;  %v438_v0 = vld [vmem:[%s4002_s14 + $0x5c0] sm:$0xff] }
  0x9f   : > { %v3744_v4 = vpack.i.bf16 %v438_v0, %v422_v63  ;;  %v496_v63 = vld [vmem:[%s4002_s14 + $0x790] sm:$0xff] }
  0xa0   : > { %3729 = vxpose.xlu1.b32.start [1/16] (narrow) %v3728_v6, 8  ;;  %v3612_v14 = vpop.trf.xlu1  ;;  %v423_v6 = vld [vmem:[%s4002_s14 + $0x548] sm:$0xff] }
  0xa1   : > { %v3616_v18 = vunpack.i.h.bf16 %v3612_v14  ;;  %v3613_v19 = vunpack.i.l.bf16 %v3612_v14  ;;  %v3746_v10 = vpack.i.bf16 %v439_v7, %v423_v6  ;;  %v392_v14 = vld [vmem:[%s4002_s14 + $0x450] sm:$0xff] }
  0xa2   : > { %3692 = vxpose.xlu0.b32.start [1/16] (narrow) %v3691_v8, 8  ;;  %v3575_v17 = vpop.trf.xlu0  ;;  %v391_v8 = vld [vmem:[%s4002_s14 + $0x448] sm:$0xff] }
  0xa3   : > { %v3579_v22 = vunpack.i.h.bf16 %v3575_v17  ;;  %v3576_v23 = vunpack.i.l.bf16 %v3575_v17  ;;  %v1025_v24 = vpack.c.bf16 %v3616_v18, %v3616_v18  ;;  %v1024_v25 = vpack.c.bf16 %v3613_v19, %v3613_v19  ;;  %v425_v18 = vld [vmem:[%s4002_s14 + $0x558] sm:$0xff] }
  0xa4   : > { %3731 = vxpose.xlu1.b32.cont [2/16] (narrow) %v3730_v12, 8  ;;  %v3709_v11 = vpack.i.bf16 %v407_v9, %v391_v8  ;;  %v424_v12 = vld [vmem:[%s4002_s14 + $0x550] sm:$0xff]  ;;  %v3711_v17 = vpack.i.bf16 %v408_v15, %v392_v14  ;;  %v441_v19 = vld [vmem:[%s4002_s14 + $0x5d8] sm:$0xff] }
  0xa5   : > { %v1023_v27 = vpack.c.bf16 %v3579_v22, %v3579_v22  ;;  %v1022_v28 = vpack.c.bf16 %v3576_v23, %v3576_v23  ;;  %3428 = vmatprep.subr.msk.bf16.mxu1 %vm1074_vm0, %v1025_v24  ;;  %v1082_v32 = vsel %vm1074_vm0, %v1024_v25, 0  ;;  %v3750_v22 = vpack.i.bf16 %v441_v19, %v425_v18  ;;  %v426_v24 = vld [vmem:[%s4002_s14 + $0x560] sm:$0xff]  ;;  %v481_v14 = vld [vmem:[%s4002_s14 + $0x718] sm:$0xff] }
  0xa6   : > { %3694 = vxpose.xlu0.b32.cont [2/16] (narrow) %v3693_v13, 8  ;;  %1167 = vmatpush1.bf16.msra.mxu1 %v1082_v32  ;;  %v440_v13 = vld [vmem:[%s4002_s14 + $0x5d0] sm:$0xff]  ;;  %v3713_v23 = vpack.i.bf16 %v409_v21, %v393_v20  ;;  %v442_v25 = vld [vmem:[%s4002_s14 + $0x5e0] sm:$0xff]  ;;  %v395_v32 = vld [vmem:[%s4002_s14 + $0x468] sm:$0xff] }
  0xa7   : > { %3426 = vmatprep.subr.msk.bf16.mxu0 %vm1074_vm0, %v1023_v27  ;;  %v1076_v36 = vsel %vm1074_vm0, %v1022_v28, 0  ;;  %v3748_v16 = vpack.i.bf16 %v440_v13, %v424_v12  ;;  %v410_v27 = vld [vmem:[%s4002_s14 + $0x4e0] sm:$0xff]  ;;  %v3752_v28 = vpack.i.bf16 %v442_v25, %v426_v24  ;;  %v497_v15 = vld [vmem:[%s4002_s14 + $0x798] sm:$0xff] }
  0xa8   : > { %1124 = vmatpush1.bf16.msra.mxu0 %v1076_v36  ;;  %3733 = vxpose.xlu1.b32.cont [3/16] (narrow) %v3732_v26, 8  ;;  %v394_v26 = vld [vmem:[%s4002_s14 + $0x460] sm:$0xff]  ;;  %v3717_v36 = vpack.i.bf16 %v411_v34, %v395_v32  ;;  %v465_v18 = vld [vmem:[%s4002_s14 + $0x698] sm:$0xff]  ;;  %v3808_v20 = vpack.i.bf16 %v497_v15, %v481_v14  ;;  %v3775_v34 = vpack.i.bf16 %v467_v31, %v451_v30  ;;  %v491_v14 = vld [vmem:[%s4002_s14 + $0x768] sm:$0xff] }
  0xa9   : > { %3429 = vmatmul.mubr.msk.bf16.vlgmr.msra.gmra.mrb[0].mxu1 %vm1070_vm1, %v4153_v33  ;;  %v450_v24 = vld [vmem:[%s4002_s14 + $0x620] sm:$0xff]  ;;  %v507_v15 = vld [vmem:[%s4002_s14 + $0x7e8] sm:$0xff] }
  0xaa   : > { %3696 = vxpose.xlu0.b32.cont [3/16] (narrow) %v3695_v29, 8  ;;  %1284 = vmatprep.mubr.bf16.mxu1 %v3912_v2  ;;  %v3715_v29 = vpack.i.bf16 %v410_v27, %v394_v26  ;;  %v466_v25 = vld [vmem:[%s4002_s14 + $0x6a0] sm:$0xff] }
  0xab   : > { %3427 = vmatmul.mubr.msk.bf16.vlgmr.msra.gmra.mrb[0].mxu0 %vm1070_vm1, %v4153_v33  ;;  %v3773_v27 = vpack.i.bf16 %v466_v25, %v450_v24 }
  0xac   : > { %1241 = vmatprep.mubr.bf16.mxu0 %v3912_v2  ;;  %3735 = vxpose.xlu1.b32.cont [4/16] (narrow) %v3734_v37, 8  ;;  %v428_v37 = vld [vmem:[%s4002_s14 + $0x570] sm:$0xff] }
  0xae   : > { %3698 = vxpose.xlu0.b32.cont [4/16] (narrow) %v3697_v38, 8  ;;  %v444_v38 = vld [vmem:[%s4002_s14 + $0x5f0] sm:$0xff] }
  0xaf   : > { %v3756_v41 = vpack.i.bf16 %v444_v38, %v428_v37  ;;  %v452_v37 = vld [vmem:[%s4002_s14 + $0x630] sm:$0xff] }
  0xb0   : > { %3737 = vxpose.xlu1.b32.cont [5/16] (narrow) %v3736_v43, 8  ;;  %v429_v43 = vld [vmem:[%s4002_s14 + $0x578] sm:$0xff]  ;;  %v468_v38 = vld [vmem:[%s4002_s14 + $0x6b0] sm:$0xff] }
  0xb1   : > { %v3777_v40 = vpack.i.bf16 %v468_v38, %v452_v37 }
  0xb2   : > { %3700 = vxpose.xlu0.b32.cont [5/16] (narrow) %v3699_v44, 8  ;;  %v445_v44 = vld [vmem:[%s4002_s14 + $0x5f8] sm:$0xff] }
  0xb3   : > { %v3758_v47 = vpack.i.bf16 %v445_v44, %v429_v43  ;;  %v453_v43 = vld [vmem:[%s4002_s14 + $0x638] sm:$0xff] }
  0xb4   : > { %3739 = vxpose.xlu1.b32.cont [6/16] (narrow) %v3738_v49, 8  ;;  %v478_v49 = vld [vmem:[%s4002_s14 + $0x700] sm:$0xff]  ;;  %v469_v44 = vld [vmem:[%s4002_s14 + $0x6b8] sm:$0xff] }
  0xb5   : > { %v3779_v46 = vpack.i.bf16 %v469_v44, %v453_v43 }
  0xb6   : > { %3702 = vxpose.xlu0.b32.cont [6/16] (narrow) %v3701_v50, 8  ;;  %v494_v50 = vld [vmem:[%s4002_s14 + $0x780] sm:$0xff] }
  0xb7   : > { %v3802_v53 = vpack.i.bf16 %v494_v50, %v478_v49  ;;  %v454_v49 = vld [vmem:[%s4002_s14 + $0x640] sm:$0xff] }
  0xb8   : > { %3741 = vxpose.xlu1.b32.cont [7/16] (narrow) %v3740_v55, 8  ;;  %v3765_v55 = vpack.i.bf16 %v462_v52, %v446_v51  ;;  %v470_v50 = vld [vmem:[%s4002_s14 + $0x6c0] sm:$0xff] }
  0xb9   : > { %v3781_v52 = vpack.i.bf16 %v470_v50, %v454_v49  ;;  %v1042_v49 = vld [vmem:[%s5183_s5 + $0x20] sm:$0xff]  ;;  %v1044_v50 = vld [vmem:[%s5183_s5 + $0x30] sm:$0xff] }
  0xba   : > { %3704 = vxpose.xlu0.b32.cont [7/16] (narrow) %v3703_v56, 8  ;;  %v495_v56 = vld [vmem:[%s4002_s14 + $0x788] sm:$0xff] }
  0xbb   : > { %v3804_v59 = vpack.i.bf16 %v495_v56, %v479_v54  ;;  %v503_v54 = vld [vmem:[%s4002_s14 + $0x7c8] sm:$0xff] }
  0xbc   : > { %3743 = vxpose.xlu1.b32.cont [8/16] (narrow) %v3742_v61, 8  ;;  %v471_v56 = vld [vmem:[%s4002_s14 + $0x6c8] sm:$0xff] }
  0xbe   : > { %3706 = vxpose.xlu0.b32.cont [8/16] (narrow) %v3705_v62, 8  ;;  %v480_v62 = vld [vmem:[%s4002_s14 + $0x710] sm:$0xff] }
  0xc0   : > { %3745 = vxpose.xlu1.b32.cont [9/16] (narrow) %v3744_v4, 8  ;;  %v448_v4 = vld [vmem:[%s4002_s14 + $0x610] sm:$0xff] }
  0xc2   : > { %3708 = vxpose.xlu0.b32.cont [9/16] (narrow) %v3707_v5, 8  ;;  %v464_v5 = vld [vmem:[%s4002_s14 + $0x690] sm:$0xff] }
  0xc3   : > { %v3769_v13 = vpack.i.bf16 %v464_v5, %v448_v4  ;;  %v457_v4 = vld [vmem:[%s4002_s14 + $0x658] sm:$0xff] }
  0xc4   : > { %3747 = vxpose.xlu1.b32.cont [10/16] (narrow) %v3746_v10, 8  ;;  %v3806_v10 = vpack.i.bf16 %v496_v63, %v480_v62  ;;  %v472_v62 = vld [vmem:[%s4002_s14 + $0x6d0] sm:$0xff]  ;;  %v473_v5 = vld [vmem:[%s4002_s14 + $0x6d8] sm:$0xff] }
  0xc6   : > { %3710 = vxpose.xlu0.b32.cont [10/16] (narrow) %v3709_v11, 8 }
  0xc8   : > { %3749 = vxpose.xlu1.b32.cont [11/16] (narrow) %v3748_v16, 8 }
  0xca   : > { %3712 = vxpose.xlu0.b32.cont [11/16] (narrow) %v3711_v17, 8  ;;  %v449_v17 = vld [vmem:[%s4002_s14 + $0x618] sm:$0xff] }
  0xcb   : > { %v3771_v21 = vpack.i.bf16 %v465_v18, %v449_v17  ;;  %v475_v17 = vld [vmem:[%s4002_s14 + $0x6e8] sm:$0xff]  ;;  %v3828_v18 = vpack.i.bf16 %v507_v15, %v491_v14  ;;  %v1052_v15 = vld [vmem:[%s5183_s5 + $0x70] sm:$0xff] }
  0xcc   : > { %3751 = vxpose.xlu1.b32.cont [12/16] (narrow) %v3750_v22, 8  ;;  %v482_v22 = vld [vmem:[%s4002_s14 + $0x720] sm:$0xff] }
  0xce   : > { %3714 = vxpose.xlu0.b32.cont [12/16] (narrow) %v3713_v23, 8  ;;  %v498_v23 = vld [vmem:[%s4002_s14 + $0x7a0] sm:$0xff] }
  0xcf   : > { %v3810_v26 = vpack.i.bf16 %v498_v23, %v482_v22  ;;  %v460_v22 = vld [vmem:[%s4002_s14 + $0x670] sm:$0xff] }
  0xd0   : > { %3753 = vxpose.xlu1.b32.cont [13/16] (narrow) %v3752_v28, 8  ;;  %v483_v28 = vld [vmem:[%s4002_s14 + $0x728] sm:$0xff]  ;;  %v476_v23 = vld [vmem:[%s4002_s14 + $0x6f0] sm:$0xff] }
  0xd1   : > { %v3793_v25 = vpack.i.bf16 %v476_v23, %v460_v22 }
  0xd2   : > { %3716 = vxpose.xlu0.b32.cont [13/16] (narrow) %v3715_v29, 8  ;;  %v499_v29 = vld [vmem:[%s4002_s14 + $0x7a8] sm:$0xff] }
  0xd3   : > { %v3812_v32 = vpack.i.bf16 %v499_v29, %v483_v28  ;;  %v461_v28 = vld [vmem:[%s4002_s14 + $0x678] sm:$0xff] }
  0xd4   : > { %3755 = vxpose.xlu1.b32.cont [14/16] (narrow) %v3754_v35, 8  ;;  %v484_v35 = vld [vmem:[%s4002_s14 + $0x730] sm:$0xff]  ;;  %v477_v29 = vld [vmem:[%s4002_s14 + $0x6f8] sm:$0xff] }
  0xd5   : > { %v3795_v31 = vpack.i.bf16 %v477_v29, %v461_v28 }
  0xd6   : > { %3718 = vxpose.xlu0.b32.cont [14/16] (narrow) %v3717_v36, 8  ;;  %v500_v36 = vld [vmem:[%s4002_s14 + $0x7b0] sm:$0xff] }
  0xd7   : > { %v3814_v39 = vpack.i.bf16 %v500_v36, %v484_v35 }
  0xd8   : > { %3757 = vxpose.xlu1.b32.cont [15/16] (narrow) %v3756_v41, 8  ;;  %v485_v41 = vld [vmem:[%s4002_s14 + $0x738] sm:$0xff] }
  0xda   : > { %3720 = vxpose.xlu0.b32.cont [15/16] (narrow) %v3719_v42, 8  ;;  %v501_v42 = vld [vmem:[%s4002_s14 + $0x7b8] sm:$0xff] }
  0xdb   : > { %v3816_v45 = vpack.i.bf16 %v501_v42, %v485_v41 }
  0xdc   : > { %3759 = vxpose.xlu1.b32.end [16/16] (narrow) %v3758_v47, 8  ;;  %v486_v47 = vld [vmem:[%s4002_s14 + $0x740] sm:$0xff] }
  0xde   : > { %3722 = vxpose.xlu0.b32.end [16/16] (narrow) %v3721_v48, 8  ;;  %v502_v48 = vld [vmem:[%s4002_s14 + $0x7c0] sm:$0xff] }
  0xdf   : > { %v3818_v51 = vpack.i.bf16 %v502_v48, %v486_v47  ;;  %v1041_v47 = vld [vmem:[%s5183_s5 + $0x18] sm:$0xff]  ;;  %v1038_v48 = vld [vmem:[%s5183_s5] sm:$0xff] }
  0xe0   : > { %3803 = vxpose.xlu1.b32.start [1/16] (narrow) %v3802_v53, 8  ;;  %v3686_v61 = vpop.trf.xlu1  ;;  %v487_v53 = vld [vmem:[%s4002_s14 + $0x748] sm:$0xff] }
  0xe1   : > { %v3690_v0 = vunpack.i.h.bf16 %v3686_v61  ;;  %v3687_v1 = vunpack.i.l.bf16 %v3686_v61  ;;  %v3820_v57 = vpack.i.bf16 %v503_v54, %v487_v53  ;;  %v456_v61 = vld [vmem:[%s4002_s14 + $0x650] sm:$0xff]  ;;  %v1045_v53 = vld [vmem:[%s5183_s5 + $0x38] sm:$0xff]  ;;  %v2821_v54 = vld [vmem:[%s5182_s4] sm:$0xff] }
  0xe2   : > { %3766 = vxpose.xlu0.b32.start [1/16] (narrow) %v3765_v55, 8  ;;  %v3649_v3 = vpop.trf.xlu0  ;;  %v455_v55 = vld [vmem:[%s4002_s14 + $0x648] sm:$0xff] }
  0xe3   : > { %v3653_v6 = vunpack.i.h.bf16 %v3649_v3  ;;  %v3650_v7 = vunpack.i.l.bf16 %v3649_v3  ;;  %v1029_v8 = vpack.c.bf16 %v3690_v0, %v3690_v0  ;;  %v1028_v9 = vpack.c.bf16 %v3687_v1, %v3687_v1  ;;  %v489_v1 = vld [vmem:[%s4002_s14 + $0x758] sm:$0xff] }
  0xe4   : > { %3805 = vxpose.xlu1.b32.cont [2/16] (narrow) %v3804_v59, 8  ;;  %v3783_v58 = vpack.i.bf16 %v471_v56, %v455_v55  ;;  %v488_v59 = vld [vmem:[%s4002_s14 + $0x750] sm:$0xff]  ;;  %v3785_v0 = vpack.i.bf16 %v472_v62, %v456_v61  ;;  %v505_v3 = vld [vmem:[%s4002_s14 + $0x7d8] sm:$0xff]  ;;  %v1047_v55 = vld [vmem:[%s5183_s5 + $0x48] sm:$0xff] }
  0xe5   : > { %v1027_v11 = vpack.c.bf16 %v3653_v6, %v3653_v6  ;;  %v1026_v12 = vpack.c.bf16 %v3650_v7, %v3650_v7  ;;  %3432 = vmatprep.subr.msk.bf16.mxu1 %vm1074_vm0, %v1029_v8  ;;  %v1094_v16 = vsel %vm1074_vm0, %v1028_v9, 0  ;;  %v3824_v6 = vpack.i.bf16 %v505_v3, %v489_v1  ;;  %v490_v8 = vld [vmem:[%s4002_s14 + $0x760] sm:$0xff]  ;;  %v1048_v56 = vld [vmem:[%s5183_s5 + $0x50] sm:$0xff]  ;;  %v2824_v61 = vld [vmem:[%s5182_s4 + $0x18] sm:$0xff] }
  0xe6   : > { %3768 = vxpose.xlu0.b32.cont [2/16] (narrow) %v3767_v60, 8  ;;  %1253 = vmatpush1.bf16.msra.mxu1 %v1094_v16  ;;  %v504_v60 = vld [vmem:[%s4002_s14 + $0x7d0] sm:$0xff]  ;;  %v3787_v7 = vpack.i.bf16 %v473_v5, %v457_v4  ;;  %v506_v9 = vld [vmem:[%s4002_s14 + $0x7e0] sm:$0xff]  ;;  %v459_v16 = vld [vmem:[%s4002_s14 + $0x668] sm:$0xff] }
  0xe7   : > { %3430 = vmatprep.subr.msk.bf16.mxu0 %vm1074_vm0, %v1027_v11  ;;  %v1088_v19 = vsel %vm1074_vm0, %v1026_v12, 0  ;;  %v3822_v63 = vpack.i.bf16 %v504_v60, %v488_v59  ;;  %v474_v11 = vld [vmem:[%s4002_s14 + $0x6e0] sm:$0xff]  ;;  %v3826_v12 = vpack.i.bf16 %v506_v9, %v490_v8  ;;  %v2823_v59 = vld [vmem:[%s5182_s4 + $0x10] sm:$0xff] }
  0xe8   : > { %1210 = vmatpush1.bf16.msra.mxu0 %v1088_v19  ;;  %3807 = vxpose.xlu1.b32.cont [3/16] (narrow) %v3806_v10, 8  ;;  %v458_v10 = vld [vmem:[%s4002_s14 + $0x660] sm:$0xff]  ;;  %v3791_v19 = vpack.i.bf16 %v475_v17, %v459_v16  ;;  %v2828_v16 = vld [vmem:[%s5182_s4 + $0x38] sm:$0xff] }
  0xe9   : > { %3433 = vmatmul.mubr.msk.bf16.vlgmr.msra.gmra.mrb[4].mxu1 %vm1070_vm1, %v4153_v33  ;;  %v1050_v60 = vld [vmem:[%s5183_s5 + $0x60] sm:$0xff] }
  0xea   : > { %3770 = vxpose.xlu0.b32.cont [3/16] (narrow) %v3769_v13, 8  ;;  %1370 = vmatprep.mubr.bf16.mxu1 %v3912_v2  ;;  %v3789_v13 = vpack.i.bf16 %v474_v11, %v458_v10  ;;  %v2827_v11 = vld [vmem:[%s5182_s4 + $0x30] sm:$0xff] }
  0xeb   : > { %3431 = vmatmul.mubr.msk.bf16.vlgmr.msra.gmra.mrb[4].mxu0 %vm1070_vm1, %v4153_v33 }
  0xec   : > { %1327 = vmatprep.mubr.bf16.mxu0 %v3912_v2  ;;  %3809 = vxpose.xlu1.b32.cont [4/16] (narrow) %v3808_v20, 8  ;;  %v492_v20 = vld [vmem:[%s4002_s14 + $0x770] sm:$0xff] }
  0xee   : > { %3772 = vxpose.xlu0.b32.cont [4/16] (narrow) %v3771_v21, 8  ;;  %v508_v21 = vld [vmem:[%s4002_s14 + $0x7f0] sm:$0xff] }
  0xef   : > { %v3830_v24 = vpack.i.bf16 %v508_v21, %v492_v20 }
  0xf0   : > { %3811 = vxpose.xlu1.b32.cont [5/16] (narrow) %v3810_v26, 8  ;;  %v493_v26 = vld [vmem:[%s4002_s14 + $0x778] sm:$0xff] }
  0xf2   : > { %3774 = vxpose.xlu0.b32.cont [5/16] (narrow) %v3773_v27, 8  ;;  %v509_v27 = vld [vmem:[%s4002_s14 + $0x7f8] sm:$0xff] }
  0xf3   : > { %v3832_v30 = vpack.i.bf16 %v509_v27, %v493_v26 }
  0xf4   : > { %3813 = vxpose.xlu1.b32.cont [6/16] (narrow) %v3812_v32, 8 }
  0xf6   : > { %3776 = vxpose.xlu0.b32.cont [6/16] (narrow) %v3775_v34, 8 }
  0xf8   : > { %3815 = vxpose.xlu1.b32.cont [7/16] (narrow) %v3814_v39, 8 }
  0xfa   : > { %3778 = vxpose.xlu0.b32.cont [7/16] (narrow) %v3777_v40, 8 }
  0xfc   : > { %3817 = vxpose.xlu1.b32.cont [8/16] (narrow) %v3816_v45, 8  ;;  %v1039_v45 = vld [vmem:[%s5183_s5 + $0x8] sm:$0xff] }
  0xfe   : > { %3780 = vxpose.xlu0.b32.cont [8/16] (narrow) %v3779_v46, 8  ;;  %v1040_v46 = vld [vmem:[%s5183_s5 + $0x10] sm:$0xff] }
 0x100   : > { %3819 = vxpose.xlu1.b32.cont [9/16] (narrow) %v3818_v51, 8  ;;  %v1043_v51 = vld [vmem:[%s5183_s5 + $0x28] sm:$0xff] }
 0x102   : > { %3782 = vxpose.xlu0.b32.cont [9/16] (narrow) %v3781_v52, 8  ;;  %v1046_v52 = vld [vmem:[%s5183_s5 + $0x40] sm:$0xff] }
 0x104   : > { %3821 = vxpose.xlu1.b32.cont [10/16] (narrow) %v3820_v57, 8  ;;  %v2822_v57 = vld [vmem:[%s5182_s4 + $0x8] sm:$0xff] }
 0x106   : > { %3784 = vxpose.xlu0.b32.cont [10/16] (narrow) %v3783_v58, 8  ;;  %v1049_v58 = vld [vmem:[%s5183_s5 + $0x58] sm:$0xff] }
 0x108   : > { %3823 = vxpose.xlu1.b32.cont [11/16] (narrow) %v3822_v63, 8  ;;  %v1051_v63 = vld [vmem:[%s5183_s5 + $0x68] sm:$0xff] }
 0x10a   : > { %3786 = vxpose.xlu0.b32.cont [11/16] (narrow) %v3785_v0, 8  ;;  %v2825_v0 = vld [vmem:[%s5182_s4 + $0x20] sm:$0xff] }
 0x10c   : > { %3825 = vxpose.xlu1.b32.cont [12/16] (narrow) %v3824_v6, 8 }
 0x10e   : > { %3788 = vxpose.xlu0.b32.cont [12/16] (narrow) %v3787_v7, 8 }
 0x110   : > { %3827 = vxpose.xlu1.b32.cont [13/16] (narrow) %v3826_v12, 8 }
 0x112   : > { %3790 = vxpose.xlu0.b32.cont [13/16] (narrow) %v3789_v13, 8  ;;  %v2826_v13 = vld [vmem:[%s5182_s4 + $0x28] sm:$0xff] }
 0x114   : > { %3829 = vxpose.xlu1.b32.cont [14/16] (narrow) %v3828_v18, 8 }
 0x116   : > { %3792 = vxpose.xlu0.b32.cont [14/16] (narrow) %v3791_v19, 8 }
 0x118   : > { %3831 = vxpose.xlu1.b32.cont [15/16] (narrow) %v3830_v24, 8 }
 0x11a   : > { %3794 = vxpose.xlu0.b32.cont [15/16] (narrow) %v3793_v25, 8 }
 0x11c   : > { %3833 = vxpose.xlu1.b32.end [16/16] (narrow) %v3832_v30, 8 }
 0x11e   : > { %3796 = vxpose.xlu0.b32.end [16/16] (narrow) %v3795_v31, 8 }
 0x120   : > { %v3760_v32 = vpop.trf.xlu1 }
 0x121   : > { %v3764_v34 = vunpack.i.h.bf16 %v3760_v32  ;;  %v3761_v35 = vunpack.i.l.bf16 %v3760_v32 }
 0x122   : > { %v3723_v36 = vpop.trf.xlu0 }
 0x123   : > { %v3727_v37 = vunpack.i.h.bf16 %v3723_v36  ;;  %v3724_v38 = vunpack.i.l.bf16 %v3723_v36  ;;  %v1033_v39 = vpack.c.bf16 %v3764_v34, %v3764_v34  ;;  %v1032_v40 = vpack.c.bf16 %v3761_v35, %v3761_v35 }
 0x125   : > { %v1031_v41 = vpack.c.bf16 %v3727_v37, %v3727_v37  ;;  %v1030_v42 = vpack.c.bf16 %v3724_v38, %v3724_v38  ;;  %3436 = vmatprep.subr.msk.bf16.mxu1 %vm1074_vm0, %v1033_v39  ;;  %v1106_v43 = vsel %vm1074_vm0, %v1032_v40, 0 }
 0x126   : > { %1339 = vmatpush1.bf16.msra.mxu1 %v1106_v43 }
 0x127   : > { %3434 = vmatprep.subr.msk.bf16.mxu0 %vm1074_vm0, %v1031_v41  ;;  %v1100_v44 = vsel %vm1074_vm0, %v1030_v42, 0 }
 0x128   : > { %1296 = vmatpush1.bf16.msra.mxu0 %v1100_v44 }
 0x129   : > { %3437 = vmatmul.mubr.msk.bf16.vlgmr.msra.gmra.mrb[8].mxu1 %vm1070_vm1, %v4153_v33 }
 0x12a   : > { %1456 = vmatprep.mubr.bf16.mxu1 %v3912_v2 }
 0x12b   : > { %3435 = vmatmul.mubr.msk.bf16.vlgmr.msra.gmra.mrb[8].mxu0 %vm1070_vm1, %v4153_v33 }
 0x12c   : > { %1413 = vmatprep.mubr.bf16.mxu0 %v3912_v2 }
 0x13a   : > { %3840 = vset.pattern.permute.xlu1 %v3912_v2 }
 0x13b   : > { %1062 = vperm.xlu1 %3840, %v1039_v45  }
 0x13f   : > { %1505 = vperm.xlu1 %3840, %v1040_v46  }
 0x143   : > { %1510 = vperm.xlu1 %3840, %v1041_v47  }
 0x147   : > { %3839 = vset.pattern.permute.xlu0 %v3912_v2  ;;  %1515 = vperm.xlu1 %3840, %v1042_v49  }
 0x148   : > { %1057 = vperm.xlu0 %3839, %v1038_v48  }
 0x14b   : > { %2038 = vperm.xlu1 %3840, %v1044_v50  }
 0x14c   : > { %1520 = vperm.xlu0 %3839, %v1043_v51  }
 0x14f   : > { %2048 = vperm.xlu1 %3840, %v1046_v52  }
 0x150   : > { %2043 = vperm.xlu0 %3839, %v1045_v53  }
 0x153   : > { %2831 = vperm.xlu1 %3840, %v2821_v54  }
 0x154   : > { %2053 = vperm.xlu0 %3839, %v1047_v55  }
 0x157   : > { %2058 = vperm.xlu1 %3840, %v1048_v56  }
 0x158   : > { %2836 = vperm.xlu0 %3839, %v2822_v57  }
 0x15b   : > { %2063 = vperm.xlu1 %3840, %v1049_v58  }
 0x15c   : > { %2841 = vperm.xlu0 %3839, %v2823_v59  }
 0x15f   : > { %2068 = vperm.xlu1 %3840, %v1050_v60  }
 0x160   : > { %2846 = vperm.xlu0 %3839, %v2824_v61   ;;  %v3834_v62 = vpop.trf.xlu1 }
 0x161   : > { %v3838_v1 = vunpack.i.h.bf16 %v3834_v62  ;;  %v3835_v3 = vunpack.i.l.bf16 %v3834_v62 }
 0x162   : > { %v3797_v4 = vpop.trf.xlu0 }
 0x163   : > { %v3801_v5 = vunpack.i.h.bf16 %v3797_v4  ;;  %v3798_v6 = vunpack.i.l.bf16 %v3797_v4  ;;  %v1037_v7 = vpack.c.bf16 %v3838_v1, %v3838_v1  ;;  %v1036_v8 = vpack.c.bf16 %v3835_v3, %v3835_v3  ;;  %2073 = vperm.xlu1 %3840, %v1051_v63   ;;  %v4407_v1 = vld [vmem:[%s5180_s2] sm:$0xff]  }
 0x164   : > { %2851 = vperm.xlu0 %3839, %v2825_v0  }
 0x165   : > { %v1035_v9 = vpack.c.bf16 %v3801_v5, %v3801_v5  ;;  %v1034_v10 = vpack.c.bf16 %v3798_v6, %v3798_v6  ;;  %3440 = vmatprep.subr.msk.bf16.mxu1 %vm1074_vm0, %v1037_v7  ;;  %v1118_v12 = vsel %vm1074_vm0, %v1036_v8, 0  ;;  %v4420_v5 = vld [vmem:[%s5180_s2 + $0x8] sm:$0xff]  }
 0x166   : > { %1425 = vmatpush1.bf16.msra.mxu1 %v1118_v12 }
 0x167   : > { %3438 = vmatprep.subr.msk.bf16.mxu0 %vm1074_vm0, %v1035_v9  ;;  %v1112_v14 = vsel %vm1074_vm0, %v1034_v10, 0  ;;  %2861 = vperm.xlu1 %3840, %v2827_v11  }
 0x168   : > { %1382 = vmatpush1.bf16.msra.mxu0 %v1112_v14  ;;  %2856 = vperm.xlu0 %3839, %v2826_v13  }
 0x169   : > { %3441 = vmatmul.mubr.msk.bf16.vlgmr.msra.gmra.mrb[12].mxu1 %vm1070_vm1, %v4153_v33 }
 0x16a   : > { %1625 = vmatprep.mubr.bf16.mxu1 %v3912_v2 }
 0x16b   : > { %3439 = vmatmul.mubr.msk.bf16.vlgmr.msra.gmra.mrb[12].mxu0 %vm1070_vm1, %v4153_v33  ;;  %3207 = vperm.xlu1 %3840, %v1052_v15  }
 0x16c   : > { %1572 = vmatprep.mubr.bf16.mxu0 %v3912_v2  ;;  %2866 = vperm.xlu0 %3839, %v2828_v16  }
 0x17c   : > { %v1200_v17 = vpop.f32.mrb[0].mxu1 }
 0x17d   : > { %v1202_v19 = vpop.f32.mrb[1].mxu1 }
 0x17e   : > { %v1157_v18 = vpop.f32.mrb[0].mxu0  ;;  %v1204_v21 = vpop.f32.mrb[2].mxu1 }
 0x17f   : > { %v1159_v20 = vpop.f32.mrb[1].mxu0  ;;  %v1206_v23 = vpop.f32.mrb[3].mxu1 }
 0x180   : > { %v1161_v22 = vpop.f32.mrb[2].mxu0 }
 0x181   : > { %v1163_v24 = vpop.f32.mrb[3].mxu0 }
 0x1ba   : > { %v4378_v32 = vpop.permute.xlu1 %1062 }
 0x1bb   : > { %v1162_v34 = vadd.f32 %v1161_v22, %v4378_v32  ;;  %v1205_v35 = vadd.f32 %v1204_v21, %v4378_v32  ;;  %v1207_v36 = vadd.f32 %v1206_v23, %v4378_v32  ;;  %v1164_v37 = vadd.f32 %v1163_v24, %v4378_v32 }
 0x1bc   : > { %v1286_v25 = vpop.f32.mrb[4].mxu1 }
 0x1bd   : > { %v1288_v27 = vpop.f32.mrb[5].mxu1 }
 0x1be   : > { %v1243_v26 = vpop.f32.mrb[4].mxu0  ;;  %v1290_v33 = vpop.f32.mrb[6].mxu1 }
 0x1bf   : > { %v1245_v28 = vpop.f32.mrb[5].mxu0  ;;  %v1292_v31 = vpop.f32.mrb[7].mxu1  ;;  %v1291_v40 = vadd.f32 %v1290_v33, %v4378_v32 }
 0x1c0   : > { %v1247_v29 = vpop.f32.mrb[6].mxu0  ;;  %v1293_v42 = vadd.f32 %v1292_v31, %v4378_v32 }
 0x1c1   : > { %v1249_v30 = vpop.f32.mrb[7].mxu0  ;;  %v1248_v39 = vadd.f32 %v1247_v29, %v4378_v32 }
 0x1c2   : > { %v1250_v41 = vadd.f32 %v1249_v30, %v4378_v32 }
 0x1c7   : > { %v4384_v38 = vpop.permute.xlu0 %1057 }
 0x1c8   : > { %v1160_v43 = vadd.f32 %v1159_v20, %v4384_v38  ;;  %v1203_v44 = vadd.f32 %v1202_v19, %v4384_v38  ;;  %v1158_v45 = vadd.f32 %v1157_v18, %v4384_v38  ;;  %v1201_v46 = vadd.f32 %v1200_v17, %v4384_v38 }
 0x1c9   : > { %v1244_v47 = vadd.f32 %v1243_v26, %v4384_v38  ;;  %v1287_v48 = vadd.f32 %v1286_v25, %v4384_v38  ;;  %v1289_v49 = vadd.f32 %v1288_v27, %v4384_v38  ;;  %v1246_v50 = vadd.f32 %v1245_v28, %v4384_v38 }
 0x1ca   : > { %v1468_v51 = vpack.c.bf16 %v1164_v37, %v1160_v43  ;;  %v1470_v52 = vpack.c.bf16 %v1207_v36, %v1203_v44  ;;  %v1467_v53 = vpack.c.bf16 %v1162_v34, %v1158_v45  ;;  %v1469_v54 = vpack.c.bf16 %v1205_v35, %v1201_v46 }
 0x1cb   : > { %v1471_v55 = vpack.c.bf16 %v1248_v39, %v1244_v47  ;;  %v1473_v56 = vpack.c.bf16 %v1291_v40, %v1287_v48  ;;  %v1472_v57 = vpack.c.bf16 %v1250_v41, %v1246_v50  ;;  %v1474_v58 = vpack.c.bf16 %v1293_v42, %v1289_v49 }
 0x1cc   : > { %v1484_v59 = vmax.bf16 %v3912_v2, %v1468_v51  ;;  %v1486_v60 = vmax.bf16 %v3912_v2, %v1470_v52  ;;  %v1483_v61 = vmax.bf16 %v3912_v2, %v1467_v53  ;;  %v1485_v62 = vmax.bf16 %v3912_v2, %v1469_v54 }
 0x1cd   : > { %v1488_v63 = vmax.bf16 %v3912_v2, %v1472_v57  ;;  %v1490_v0 = vmax.bf16 %v3912_v2, %v1474_v58  ;;  %v1487_v3 = vmax.bf16 %v3912_v2, %v1471_v55  ;;  %v1489_v4 = vmax.bf16 %v3912_v2, %v1473_v56 }
 0x1ce   : > { %1540 = vmatprep.subr.bf16.mxu0 %v1484_v59  ;;  %1593 = vmatprep.subr.bf16.mxu1 %v1486_v60 }
 0x1cf   : > { %1541 = vmatpush1.bf16.msra.mxu0 %v1483_v61  ;;  %1594 = vmatpush1.bf16.msra.mxu1 %v1485_v62 }
 0x1d0   : > { %1646 = vmatprep.subr.bf16.mxu0 %v1488_v63  ;;  %1699 = vmatprep.subr.bf16.mxu1 %v1490_v0 }
 0x1d2   : > { %3444 = vmatmul.mubr.msk.bf16.vlgmr.msra.gmra.mrb[16].mxu0 %vm1533_vm2, %v4407_v1  ;;  %3446 = vmatmul.mubr.msk.bf16.vlgmr.msra.gmra.mrb[16].mxu1 %vm1533_vm2, %v4407_v1 }
 0x1d3   : > { %1635 = vmatprep.mubr.bf16.mxu1 %v3912_v2  ;;  %1582 = vmatprep.mubr.bf16.mxu0 %v3912_v2 }
 0x1d4   : > { %1647 = vmatpush1.bf16.msra.mxu0 %v1487_v3  ;;  %1700 = vmatpush1.bf16.msra.mxu1 %v1489_v4 }
 0x1da   : > { %3445 = vmatmul.mubr.msk.bf16.gmra.mrb[20].mxu0 %vm1533_vm2, %v4420_v5  ;;  %3447 = vmatmul.mubr.msk.bf16.gmra.mrb[20].mxu1 %vm1533_vm2, %v4420_v5 }
 0x1db   : > { %1731 = vmatprep.mubr.bf16.mxu1 %v3912_v2  ;;  %1678 = vmatprep.mubr.bf16.mxu0 %v3912_v2 }
 0x1e2   : > { %3448 = vmatmul.mubr.msk.bf16.vlgmr.msra.gmra.mrb[24].mxu0 %vm1533_vm2, %v4407_v1  ;;  %3450 = vmatmul.mubr.msk.bf16.vlgmr.msra.gmra.mrb[24].mxu1 %vm1533_vm2, %v4407_v1 }
 0x1e3   : > { %1741 = vmatprep.mubr.bf16.mxu1 %v3912_v2  ;;  %1688 = vmatprep.mubr.bf16.mxu0 %v3912_v2 }
 0x1ea   : > { %3449 = vmatmul.mubr.msk.bf16.gmra.mrb[28].mxu0 %vm1533_vm2, %v4420_v5  ;;  %3451 = vmatmul.mubr.msk.bf16.gmra.mrb[28].mxu1 %vm1533_vm2, %v4420_v5 }
 0x1eb   : > { %1784 = vmatprep.mubr.bf16.mxu0 %v3912_v2  ;;  %1837 = vmatprep.mubr.bf16.mxu1 %v3912_v2 }
 0x1fc   : > { %v1372_v6 = vpop.f32.mrb[8].mxu1 }
 0x1fd   : > { %v1374_v8 = vpop.f32.mrb[9].mxu1  ;;  %v1373_v11 = vadd.f32 %v1372_v6, %v4384_v38 }
 0x1fe   : > { %v1329_v7 = vpop.f32.mrb[8].mxu0  ;;  %v1376_v10 = vpop.f32.mrb[10].mxu1  ;;  %v1375_v16 = vadd.f32 %v1374_v8, %v4384_v38 }
 0x1ff   : > { %v1331_v9 = vpop.f32.mrb[9].mxu0  ;;  %v1377_v13 = vadd.f32 %v1376_v10, %v4378_v32  ;;  %v1378_v14 = vpop.f32.mrb[11].mxu1  ;;  %v1330_v15 = vadd.f32 %v1329_v7, %v4384_v38 }
 0x200   : > { %v1333_v12 = vpop.f32.mrb[10].mxu0  ;;  %v1379_v19 = vadd.f32 %v1378_v14, %v4378_v32  ;;  %v1332_v20 = vadd.f32 %v1331_v9, %v4384_v38  ;;  %v4502_v14 = vpop.permute.xlu0 %1520 }
 0x201   : > { %v1334_v17 = vadd.f32 %v1333_v12, %v4378_v32  ;;  %v1335_v18 = vpop.f32.mrb[11].mxu0  ;;  %v1477_v21 = vpack.c.bf16 %v1377_v13, %v1373_v11 }
 0x202   : > { %v1336_v22 = vadd.f32 %v1335_v18, %v4378_v32  ;;  %v1478_v24 = vpack.c.bf16 %v1379_v19, %v1375_v16 }
 0x203   : > { %v1475_v23 = vpack.c.bf16 %v1334_v17, %v1330_v15  ;;  %v1493_v27 = vmax.bf16 %v3912_v2, %v1477_v21 }
 0x204   : > { %v1476_v25 = vpack.c.bf16 %v1336_v22, %v1332_v20  ;;  %v1494_v26 = vmax.bf16 %v3912_v2, %v1478_v24 }
 0x205   : > { %v1491_v29 = vmax.bf16 %v3912_v2, %v1475_v23 }
 0x206   : > { %v1492_v28 = vmax.bf16 %v3912_v2, %v1476_v25  ;;  %1805 = vmatprep.subr.bf16.mxu1 %v1494_v26 }
 0x207   : > { %1806 = vmatpush1.bf16.msra.mxu1 %v1493_v27 }
 0x208   : > { %1752 = vmatprep.subr.bf16.mxu0 %v1492_v28 }
 0x209   : > { %1753 = vmatpush1.bf16.msra.mxu0 %v1491_v29 }
 0x20a   : > { %3454 = vmatmul.mubr.msk.bf16.vlgmr.msra.gmra.mrb[32].mxu1 %vm1533_vm2, %v4407_v1 }
 0x20b   : > { %1847 = vmatprep.mubr.bf16.mxu1 %v3912_v2 }
 0x20c   : > { %3452 = vmatmul.mubr.msk.bf16.vlgmr.msra.gmra.mrb[32].mxu0 %vm1533_vm2, %v4407_v1 }
 0x20d   : > { %1794 = vmatprep.mubr.bf16.mxu0 %v3912_v2 }
 0x212   : > { %3455 = vmatmul.mubr.msk.bf16.gmra.mrb[36].mxu1 %vm1533_vm2, %v4420_v5 }
 0x213   : > { %1943 = vmatprep.mubr.bf16.mxu1 %v3912_v2 }
 0x214   : > { %3453 = vmatmul.mubr.msk.bf16.gmra.mrb[36].mxu0 %vm1533_vm2, %v4420_v5 }
 0x215   : > { %1890 = vmatprep.mubr.bf16.mxu0 %v3912_v2 }
 0x23c   : > { %v1458_v33 = vpop.f32.mrb[12].mxu1 }
 0x23d   : > { %v1460_v31 = vpop.f32.mrb[13].mxu1  ;;  %v1459_v36 = vadd.f32 %v1458_v33, %v4384_v38 }
 0x23e   : > { %v1415_v30 = vpop.f32.mrb[12].mxu0  ;;  %v1462_v35 = vpop.f32.mrb[14].mxu1  ;;  %v1461_v42 = vadd.f32 %v1460_v31, %v4384_v38 }
 0x23f   : > { %v1417_v34 = vpop.f32.mrb[13].mxu0  ;;  %v1463_v39 = vadd.f32 %v1462_v35, %v4378_v32  ;;  %v1464_v40 = vpop.f32.mrb[15].mxu1  ;;  %v1416_v41 = vadd.f32 %v1415_v30, %v4384_v38 }
 0x240   : > { %v1419_v37 = vpop.f32.mrb[14].mxu0  ;;  %v1465_v45 = vadd.f32 %v1464_v40, %v4378_v32  ;;  %v1418_v46 = vadd.f32 %v1417_v34, %v4384_v38 }
 0x241   : > { %v1420_v43 = vadd.f32 %v1419_v37, %v4378_v32  ;;  %v1421_v44 = vpop.f32.mrb[15].mxu0  ;;  %v1481_v47 = vpack.c.bf16 %v1463_v39, %v1459_v36 }
 0x242   : > { %v1422_v48 = vadd.f32 %v1421_v44, %v4378_v32  ;;  %v1482_v50 = vpack.c.bf16 %v1465_v45, %v1461_v42  ;;  %v4488_v32 = vpop.permute.xlu1 %1505 }
 0x243   : > { %v1479_v49 = vpack.c.bf16 %v1420_v43, %v1416_v41  ;;  %v1497_v53 = vmax.bf16 %v3912_v2, %v1481_v47 }
 0x244   : > { %v1480_v51 = vpack.c.bf16 %v1422_v48, %v1418_v46  ;;  %v1498_v52 = vmax.bf16 %v3912_v2, %v1482_v50 }
 0x245   : > { %v1495_v55 = vmax.bf16 %v3912_v2, %v1479_v49 }
 0x246   : > { %v1496_v54 = vmax.bf16 %v3912_v2, %v1480_v51  ;;  %1911 = vmatprep.subr.bf16.mxu1 %v1498_v52  ;;  %v4490_v38 = vpop.permute.xlu1 %1510  ;;  %v4524_v52 = vld [vmem:[%s5181_s3] sm:$0xff]  }
 0x247   : > { %1912 = vmatpush1.bf16.msra.mxu1 %v1497_v53 }
 0x248   : > { %1858 = vmatprep.subr.bf16.mxu0 %v1496_v54 }
 0x249   : > { %1859 = vmatpush1.bf16.msra.mxu0 %v1495_v55 }
 0x24a   : > { %3458 = vmatmul.mubr.msk.bf16.vlgmr.msra.gmra.mrb[40].mxu1 %vm1533_vm2, %v4407_v1  ;;  %v4500_v13 = vpop.permute.xlu1 %1515 }
 0x24b   : > { %1953 = vmatprep.mubr.bf16.mxu1 %v3912_v2 }
 0x24c   : > { %3456 = vmatmul.mubr.msk.bf16.vlgmr.msra.gmra.mrb[40].mxu0 %vm1533_vm2, %v4407_v1 }
 0x24d   : > { %1900 = vmatprep.mubr.bf16.mxu0 %v3912_v2 }
 0x252   : > { %3459 = vmatmul.mubr.msk.bf16.gmra.mrb[44].mxu1 %vm1533_vm2, %v4420_v5 }
 0x253   : > { %2214 = vmatprep.mubr.bf16.mxu1 %v3912_v2 }
 0x254   : > { %3457 = vmatmul.mubr.msk.bf16.gmra.mrb[44].mxu0 %vm1533_vm2, %v4420_v5 }
 0x255   : > { %2141 = vmatprep.mubr.bf16.mxu0 %v3912_v2 }
 0x2a5   : > { %v1574_v56 = vpop.f32.mrb[16].mxu0  ;;  %v1627_v57 = vpop.f32.mrb[16].mxu1 }
 0x2a6   : > { %v1576_v58 = vpop.f32.mrb[17].mxu0  ;;  %v1629_v59 = vpop.f32.mrb[17].mxu1  ;;  %v1575_v62 = vadd.f32 %v1574_v56, %v4488_v32  ;;  %v1628_v63 = vadd.f32 %v1627_v57, %v4488_v32 }
 0x2a7   : > { %v1578_v60 = vpop.f32.mrb[18].mxu0  ;;  %v1631_v61 = vpop.f32.mrb[18].mxu1  ;;  %v1577_v5 = vadd.f32 %v1576_v58, %v4488_v32  ;;  %v1630_v6 = vadd.f32 %v1629_v59, %v4488_v32 }
 0x2a8   : > { %v1579_v0 = vadd.f32 %v1578_v60, %v4490_v38  ;;  %v1632_v1 = vadd.f32 %v1631_v61, %v4490_v38  ;;  %v1580_v3 = vpop.f32.mrb[19].mxu0  ;;  %v1633_v4 = vpop.f32.mrb[19].mxu1 }
 0x2a9   : > { %v1581_v7 = vadd.f32 %v1580_v3, %v4490_v38  ;;  %v1634_v8 = vadd.f32 %v1633_v4, %v4490_v38 }
 0x2aa   : > { %v1964_v9 = vpack.c.bf16 %v1579_v0, %v1575_v62  ;;  %v1966_v10 = vpack.c.bf16 %v1632_v1, %v1628_v63 }
 0x2ab   : > { %v1965_v11 = vpack.c.bf16 %v1581_v7, %v1577_v5  ;;  %v1967_v12 = vpack.c.bf16 %v1634_v8, %v1630_v6 }
 0x2ac   : > { %v1996_v19 = vmax.bf16 %v3912_v2, %v1964_v9  ;;  %v1998_v20 = vmax.bf16 %v3912_v2, %v1966_v10 }
 0x2ad   : > { %v1584_v15 = vpop.f32.mrb[20].mxu0  ;;  %v1637_v16 = vpop.f32.mrb[20].mxu1  ;;  %v1997_v17 = vmax.bf16 %v3912_v2, %v1965_v11  ;;  %v1999_v18 = vmax.bf16 %v3912_v2, %v1967_v12 }
 0x2ae   : > { %v1586_v21 = vpop.f32.mrb[21].mxu0  ;;  %v1639_v22 = vpop.f32.mrb[21].mxu1  ;;  %v1585_v23 = vadd.f32 %v1584_v15, %v4500_v13  ;;  %v1638_v26 = vadd.f32 %v1637_v16, %v4500_v13  ;;  %v4547_v16 = vld [vmem:[%s5181_s3 + $0x8] sm:$0xff]  }
 0x2af   : > { %v1588_v24 = vpop.f32.mrb[22].mxu0  ;;  %v1641_v25 = vpop.f32.mrb[22].mxu1  ;;  %2109 = vmatprep.subr.bf16.mxu0 %v1997_v17  ;;  %2182 = vmatprep.subr.bf16.mxu1 %v1999_v18  ;;  %v1587_v30 = vadd.f32 %v1586_v21, %v4500_v13  ;;  %v1640_v31 = vadd.f32 %v1639_v22, %v4500_v13 }
 0x2b0   : > { %v1589_v27 = vadd.f32 %v1588_v24, %v4502_v14  ;;  %v1642_v28 = vadd.f32 %v1641_v25, %v4502_v14  ;;  %v1590_v29 = vpop.f32.mrb[23].mxu0  ;;  %v1643_v33 = vpop.f32.mrb[23].mxu1  ;;  %2110 = vmatpush1.bf16.msra.mxu0 %v1996_v19  ;;  %2183 = vmatpush1.bf16.msra.mxu1 %v1998_v20 }
 0x2b1   : > { %v1591_v34 = vadd.f32 %v1590_v29, %v4502_v14  ;;  %v1644_v35 = vadd.f32 %v1643_v33, %v4502_v14 }
 0x2b2   : > { %v1980_v36 = vpack.c.bf16 %v1589_v27, %v1585_v23  ;;  %v1982_v37 = vpack.c.bf16 %v1642_v28, %v1638_v26 }
 0x2b3   : > { %v1981_v39 = vpack.c.bf16 %v1591_v34, %v1587_v30  ;;  %v1983_v40 = vpack.c.bf16 %v1644_v35, %v1640_v31  ;;  %v4569_v35 = vld [vmem:[%s5181_s3 + $0x10] sm:$0xff]  }
 0x2b4   : > { %v2012_v45 = vmax.bf16 %v3912_v2, %v1980_v36  ;;  %v2014_v46 = vmax.bf16 %v3912_v2, %v1982_v37  ;;  %v4580_v36 = vld [vmem:[%s5181_s3 + $0x18] sm:$0xff]  }
 0x2b5   : > { %v1680_v41 = vpop.f32.mrb[24].mxu0  ;;  %v1733_v42 = vpop.f32.mrb[24].mxu1  ;;  %v2013_v43 = vmax.bf16 %v3912_v2, %v1981_v39  ;;  %v2015_v44 = vmax.bf16 %v3912_v2, %v1983_v40 }
 0x2b6   : > { %v1682_v47 = vpop.f32.mrb[25].mxu0  ;;  %v1735_v48 = vpop.f32.mrb[25].mxu1  ;;  %v1681_v49 = vadd.f32 %v1680_v41, %v4488_v32  ;;  %v1734_v53 = vadd.f32 %v1733_v42, %v4488_v32 }
 0x2b7   : > { %v1684_v50 = vpop.f32.mrb[26].mxu0  ;;  %v1737_v51 = vpop.f32.mrb[26].mxu1  ;;  %2111 = vmatprep.subr.bf16.mxu0 %v2013_v43  ;;  %2184 = vmatprep.subr.bf16.mxu1 %v2015_v44  ;;  %v1683_v58 = vadd.f32 %v1682_v47, %v4488_v32  ;;  %v1736_v59 = vadd.f32 %v1735_v48, %v4488_v32 }
 0x2b8   : > { %v1685_v54 = vadd.f32 %v1684_v50, %v4490_v38  ;;  %v1738_v55 = vadd.f32 %v1737_v51, %v4490_v38  ;;  %v1686_v56 = vpop.f32.mrb[27].mxu0  ;;  %v1739_v57 = vpop.f32.mrb[27].mxu1  ;;  %2112 = vmatpush1.bf16.msra.mxu0 %v2012_v45  ;;  %2185 = vmatpush1.bf16.msra.mxu1 %v2014_v46 }
 0x2b9   : > { %v1687_v60 = vadd.f32 %v1686_v56, %v4490_v38  ;;  %v1740_v61 = vadd.f32 %v1739_v57, %v4490_v38 }
 0x2ba   : > { %v1968_v62 = vpack.c.bf16 %v1685_v54, %v1681_v49  ;;  %v1970_v63 = vpack.c.bf16 %v1738_v55, %v1734_v53 }
 0x2bb   : > { %v1969_v0 = vpack.c.bf16 %v1687_v60, %v1683_v58  ;;  %v1971_v1 = vpack.c.bf16 %v1740_v61, %v1736_v59  ;;  %3464 = vmatmul.mubr.msk.bf16.vlgmr.msra.gmra.mrb[48].mxu0 %vm2096_vm3, %v4524_v52  ;;  %3468 = vmatmul.mubr.msk.bf16.vlgmr.msra.gmra.mrb[48].mxu1 %vm2096_vm3, %v4524_v52 }
 0x2bc   : > { %2151 = vmatprep.mubr.bf16.mxu0 %v3912_v2  ;;  %2224 = vmatprep.mubr.bf16.mxu1 %v3912_v2  ;;  %v2000_v7 = vmax.bf16 %v3912_v2, %v1968_v62  ;;  %v2002_v8 = vmax.bf16 %v3912_v2, %v1970_v63 }
 0x2bd   : > { %v1690_v3 = vpop.f32.mrb[28].mxu0  ;;  %v1743_v4 = vpop.f32.mrb[28].mxu1  ;;  %v2001_v5 = vmax.bf16 %v3912_v2, %v1969_v0  ;;  %v2003_v6 = vmax.bf16 %v3912_v2, %v1971_v1 }
 0x2be   : > { %v1692_v9 = vpop.f32.mrb[29].mxu0  ;;  %v1745_v10 = vpop.f32.mrb[29].mxu1  ;;  %v1691_v11 = vadd.f32 %v1690_v3, %v4500_v13  ;;  %v1744_v17 = vadd.f32 %v1743_v4, %v4500_v13 }
 0x2bf   : > { %v1694_v12 = vpop.f32.mrb[30].mxu0  ;;  %v1747_v15 = vpop.f32.mrb[30].mxu1  ;;  %2255 = vmatprep.subr.bf16.mxu0 %v2001_v5  ;;  %2328 = vmatprep.subr.bf16.mxu1 %v2003_v6  ;;  %v1693_v22 = vadd.f32 %v1692_v9, %v4500_v13  ;;  %v1746_v23 = vadd.f32 %v1745_v10, %v4500_v13 }
 0x2c0   : > { %v1695_v18 = vadd.f32 %v1694_v12, %v4502_v14  ;;  %v1748_v19 = vadd.f32 %v1747_v15, %v4502_v14  ;;  %v1696_v20 = vpop.f32.mrb[31].mxu0  ;;  %v1749_v21 = vpop.f32.mrb[31].mxu1  ;;  %2256 = vmatpush1.bf16.msra.mxu0 %v2000_v7  ;;  %2329 = vmatpush1.bf16.msra.mxu1 %v2002_v8 }
 0x2c1   : > { %v1697_v24 = vadd.f32 %v1696_v20, %v4502_v14  ;;  %v1750_v25 = vadd.f32 %v1749_v21, %v4502_v14 }
 0x2c2   : > { %v1984_v26 = vpack.c.bf16 %v1695_v18, %v1691_v11  ;;  %v1986_v27 = vpack.c.bf16 %v1748_v19, %v1744_v17 }
 0x2c3   : > { %v1985_v28 = vpack.c.bf16 %v1697_v24, %v1693_v22  ;;  %v1987_v29 = vpack.c.bf16 %v1750_v25, %v1746_v23  ;;  %3465 = vmatmul.mubr.msk.bf16.gmra.mrb[52].mxu0 %vm2096_vm3, %v4547_v16  ;;  %3469 = vmatmul.mubr.msk.bf16.gmra.mrb[52].mxu1 %vm2096_vm3, %v4547_v16 }
 0x2c4   : > { %2161 = vmatprep.mubr.bf16.mxu0 %v3912_v2  ;;  %2234 = vmatprep.mubr.bf16.mxu1 %v3912_v2  ;;  %v2016_v31 = vmax.bf16 %v3912_v2, %v1984_v26  ;;  %v2018_v34 = vmax.bf16 %v3912_v2, %v1986_v27 }
 0x2c5   : > { %v2017_v33 = vmax.bf16 %v3912_v2, %v1985_v28  ;;  %v2019_v30 = vmax.bf16 %v3912_v2, %v1987_v29 }
 0x2c7   : > { %2257 = vmatprep.subr.bf16.mxu0 %v2017_v33  ;;  %2330 = vmatprep.subr.bf16.mxu1 %v2019_v30 }
 0x2c8   : > { %2258 = vmatpush1.bf16.msra.mxu0 %v2016_v31  ;;  %2331 = vmatpush1.bf16.msra.mxu1 %v2018_v34 }
 0x2cb   : > { %3466 = vmatmul.mubr.msk.bf16.gmra.mrb[56].mxu0 %vm2096_vm3, %v4569_v35  ;;  %3470 = vmatmul.mubr.msk.bf16.gmra.mrb[56].mxu1 %vm2096_vm3, %v4569_v35 }
 0x2cc   : > { %2171 = vmatprep.mubr.bf16.mxu0 %v3912_v2  ;;  %2244 = vmatprep.mubr.bf16.mxu1 %v3912_v2 }
 0x2d3   : > { %3467 = vmatmul.mubr.msk.bf16.gmra.mrb[60].mxu0 %vm2096_vm3, %v4580_v36  ;;  %3471 = vmatmul.mubr.msk.bf16.gmra.mrb[60].mxu1 %vm2096_vm3, %v4580_v36 }
 0x2d4   : > { %2287 = vmatprep.mubr.bf16.mxu0 %v3912_v2  ;;  %2360 = vmatprep.mubr.bf16.mxu1 %v3912_v2 }
 0x2db   : > { %3472 = vmatmul.mubr.msk.bf16.vlgmr.msra.gmra.mrb[64].mxu0 %vm2096_vm3, %v4524_v52  ;;  %3476 = vmatmul.mubr.msk.bf16.vlgmr.msra.gmra.mrb[64].mxu1 %vm2096_vm3, %v4524_v52 }
 0x2dc   : > { %2297 = vmatprep.mubr.bf16.mxu0 %v3912_v2  ;;  %2370 = vmatprep.mubr.bf16.mxu1 %v3912_v2 }
 0x2dd   : > { %v1839_v37 = vpop.f32.mrb[32].mxu1 }
 0x2de   : > { %v1841_v40 = vpop.f32.mrb[33].mxu1  ;;  %v1840_v43 = vadd.f32 %v1839_v37, %v4488_v32 }
 0x2df   : > { %v1786_v39 = vpop.f32.mrb[32].mxu0  ;;  %v1843_v42 = vpop.f32.mrb[34].mxu1  ;;  %v1842_v48 = vadd.f32 %v1841_v40, %v4488_v32 }
 0x2e0   : > { %v1788_v41 = vpop.f32.mrb[33].mxu0  ;;  %v1844_v45 = vadd.f32 %v1843_v42, %v4490_v38  ;;  %v1845_v46 = vpop.f32.mrb[35].mxu1  ;;  %v1787_v47 = vadd.f32 %v1786_v39, %v4488_v32 }
 0x2e1   : > { %v1790_v44 = vpop.f32.mrb[34].mxu0  ;;  %v1846_v51 = vadd.f32 %v1845_v46, %v4490_v38  ;;  %v1789_v53 = vadd.f32 %v1788_v41, %v4488_v32 }
 0x2e2   : > { %v1791_v49 = vadd.f32 %v1790_v44, %v4490_v38  ;;  %v1792_v50 = vpop.f32.mrb[35].mxu0  ;;  %v1974_v54 = vpack.c.bf16 %v1844_v45, %v1840_v43 }
 0x2e3   : > { %v1793_v55 = vadd.f32 %v1792_v50, %v4490_v38  ;;  %3473 = vmatmul.mubr.msk.bf16.gmra.mrb[68].mxu0 %vm2096_vm3, %v4547_v16  ;;  %3477 = vmatmul.mubr.msk.bf16.gmra.mrb[68].mxu1 %vm2096_vm3, %v4547_v16  ;;  %v1975_v57 = vpack.c.bf16 %v1846_v51, %v1842_v48 }
 0x2e4   : > { %v1972_v56 = vpack.c.bf16 %v1791_v49, %v1787_v47  ;;  %2307 = vmatprep.mubr.bf16.mxu0 %v3912_v2  ;;  %2380 = vmatprep.mubr.bf16.mxu1 %v3912_v2  ;;  %v2006_v61 = vmax.bf16 %v3912_v2, %v1974_v54 }
 0x2e5   : > { %v1973_v58 = vpack.c.bf16 %v1793_v55, %v1789_v53  ;;  %v1849_v59 = vpop.f32.mrb[36].mxu1  ;;  %v2007_v60 = vmax.bf16 %v3912_v2, %v1975_v57 }
 0x2e6   : > { %v1851_v63 = vpop.f32.mrb[37].mxu1  ;;  %v2004_v1 = vmax.bf16 %v3912_v2, %v1972_v56  ;;  %v1850_v5 = vadd.f32 %v1849_v59, %v4500_v13 }
 0x2e7   : > { %v1796_v62 = vpop.f32.mrb[36].mxu0  ;;  %v2005_v0 = vmax.bf16 %v3912_v2, %v1973_v58  ;;  %v1853_v4 = vpop.f32.mrb[38].mxu1  ;;  %2474 = vmatprep.subr.bf16.mxu1 %v2007_v60  ;;  %v1852_v10 = vadd.f32 %v1851_v63, %v4500_v13 }
 0x2e8   : > { %v1798_v3 = vpop.f32.mrb[37].mxu0  ;;  %v1854_v7 = vadd.f32 %v1853_v4, %v4502_v14  ;;  %v1855_v8 = vpop.f32.mrb[39].mxu1  ;;  %2475 = vmatpush1.bf16.msra.mxu1 %v2006_v61  ;;  %v1797_v9 = vadd.f32 %v1796_v62, %v4500_v13 }
 0x2e9   : > { %v1800_v6 = vpop.f32.mrb[38].mxu0  ;;  %2401 = vmatprep.subr.bf16.mxu0 %v2005_v0  ;;  %v1856_v15 = vadd.f32 %v1855_v8, %v4502_v14  ;;  %v1799_v17 = vadd.f32 %v1798_v3, %v4500_v13 }
 0x2ea   : > { %v1801_v11 = vadd.f32 %v1800_v6, %v4502_v14  ;;  %v1802_v12 = vpop.f32.mrb[39].mxu0  ;;  %2402 = vmatpush1.bf16.msra.mxu0 %v2004_v1  ;;  %v1990_v18 = vpack.c.bf16 %v1854_v7, %v1850_v5 }
 0x2eb   : > { %v1803_v19 = vadd.f32 %v1802_v12, %v4502_v14  ;;  %3474 = vmatmul.mubr.msk.bf16.gmra.mrb[72].mxu0 %vm2096_vm3, %v4569_v35  ;;  %3478 = vmatmul.mubr.msk.bf16.gmra.mrb[72].mxu1 %vm2096_vm3, %v4569_v35  ;;  %v1991_v21 = vpack.c.bf16 %v1856_v15, %v1852_v10 }
 0x2ec   : > { %v1988_v20 = vpack.c.bf16 %v1801_v11, %v1797_v9  ;;  %2317 = vmatprep.mubr.bf16.mxu0 %v3912_v2  ;;  %2390 = vmatprep.mubr.bf16.mxu1 %v3912_v2  ;;  %v2022_v24 = vmax.bf16 %v3912_v2, %v1990_v18 }
 0x2ed   : > { %v1989_v22 = vpack.c.bf16 %v1803_v19, %v1799_v17  ;;  %v2023_v23 = vmax.bf16 %v3912_v2, %v1991_v21  ;;  %v3913_v19 = vmov 1966171168  }
 0x2ee   : > { %v2020_v26 = vmax.bf16 %v3912_v2, %v1988_v20  ;;  %v3249_v20 = vlaneseq }
 0x2ef   : > { %v2021_v25 = vmax.bf16 %v3912_v2, %v1989_v22  ;;  %2476 = vmatprep.subr.bf16.mxu1 %v2023_v23 }
 0x2f0   : > { %2477 = vmatpush1.bf16.msra.mxu1 %v2022_v24 }
 0x2f1   : > { %2403 = vmatprep.subr.bf16.mxu0 %v2021_v25 }
 0x2f2   : > { %2404 = vmatpush1.bf16.msra.mxu0 %v2020_v26 }
 0x2f3   : > { %3475 = vmatmul.mubr.msk.bf16.gmra.mrb[76].mxu0 %vm2096_vm3, %v4580_v36  ;;  %3479 = vmatmul.mubr.msk.bf16.gmra.mrb[76].mxu1 %vm2096_vm3, %v4580_v36 }
 0x2f4   : > { %2433 = vmatprep.mubr.bf16.mxu0 %v3912_v2  ;;  %2506 = vmatprep.mubr.bf16.mxu1 %v3912_v2 }
 0x2fb   : > { %3480 = vmatmul.mubr.msk.bf16.vlgmr.msra.gmra.mrb[80].mxu0 %vm2096_vm3, %v4524_v52  ;;  %3484 = vmatmul.mubr.msk.bf16.vlgmr.msra.gmra.mrb[80].mxu1 %vm2096_vm3, %v4524_v52 }
 0x2fc   : > { %2443 = vmatprep.mubr.bf16.mxu0 %v3912_v2  ;;  %2516 = vmatprep.mubr.bf16.mxu1 %v3912_v2 }
 0x303   : > { %3481 = vmatmul.mubr.msk.bf16.gmra.mrb[84].mxu0 %vm2096_vm3, %v4547_v16  ;;  %3485 = vmatmul.mubr.msk.bf16.gmra.mrb[84].mxu1 %vm2096_vm3, %v4547_v16 }
 0x304   : > { %2453 = vmatprep.mubr.bf16.mxu0 %v3912_v2  ;;  %2526 = vmatprep.mubr.bf16.mxu1 %v3912_v2 }
 0x30b   : > { %3482 = vmatmul.mubr.msk.bf16.gmra.mrb[88].mxu0 %vm2096_vm3, %v4569_v35  ;;  %3486 = vmatmul.mubr.msk.bf16.gmra.mrb[88].mxu1 %vm2096_vm3, %v4569_v35 }
 0x30c   : > { %2463 = vmatprep.mubr.bf16.mxu0 %v3912_v2  ;;  %2536 = vmatprep.mubr.bf16.mxu1 %v3912_v2 }
 0x313   : > { %3483 = vmatmul.mubr.msk.bf16.gmra.mrb[92].mxu0 %vm2096_vm3, %v4580_v36  ;;  %3487 = vmatmul.mubr.msk.bf16.gmra.mrb[92].mxu1 %vm2096_vm3, %v4580_v36 }
 0x314   : > { %2579 = vmatprep.mubr.bf16.mxu0 %v3912_v2  ;;  %2652 = vmatprep.mubr.bf16.mxu1 %v3912_v2 }
 0x31d   : > { %v1945_v27 = vpop.f32.mrb[40].mxu1 }
 0x31e   : > { %v1947_v29 = vpop.f32.mrb[41].mxu1  ;;  %v1946_v31 = vadd.f32 %v1945_v27, %v4488_v32 }
 0x31f   : > { %v1892_v28 = vpop.f32.mrb[40].mxu0  ;;  %v1949_v30 = vpop.f32.mrb[42].mxu1  ;;  %v1948_v41 = vadd.f32 %v1947_v29, %v4488_v32 }
 0x320   : > { %v1894_v33 = vpop.f32.mrb[41].mxu0  ;;  %v1950_v37 = vadd.f32 %v1949_v30, %v4490_v38  ;;  %v1951_v39 = vpop.f32.mrb[43].mxu1  ;;  %v1893_v40 = vadd.f32 %v1892_v28, %v4488_v32 }
 0x321   : > { %v1896_v34 = vpop.f32.mrb[42].mxu0  ;;  %v1952_v44 = vadd.f32 %v1951_v39, %v4490_v38  ;;  %v1895_v45 = vadd.f32 %v1894_v33, %v4488_v32 }
 0x322   : > { %v1897_v42 = vadd.f32 %v1896_v34, %v4490_v38  ;;  %v1898_v43 = vpop.f32.mrb[43].mxu0  ;;  %v1978_v46 = vpack.c.bf16 %v1950_v37, %v1946_v31  ;;  %v3250_v34 = vshrl.u32 %v3249_v20, 7 }
 0x323   : > { %v1899_v47 = vadd.f32 %v1898_v43, %v4490_v38  ;;  %v1979_v49 = vpack.c.bf16 %v1952_v44, %v1948_v41 }
 0x324   : > { %v1976_v48 = vpack.c.bf16 %v1897_v42, %v1893_v40  ;;  %v2010_v54 = vmax.bf16 %v3912_v2, %v1978_v46 }
 0x325   : > { %v1977_v50 = vpack.c.bf16 %v1899_v47, %v1895_v45  ;;  %v1955_v51 = vpop.f32.mrb[44].mxu1  ;;  %v2011_v53 = vmax.bf16 %v3912_v2, %v1979_v49 }
 0x326   : > { %v1957_v56 = vpop.f32.mrb[45].mxu1  ;;  %v2008_v58 = vmax.bf16 %v3912_v2, %v1976_v48  ;;  %v1956_v32 = vadd.f32 %v1955_v51, %v4500_v13 }
 0x327   : > { %v1902_v55 = vpop.f32.mrb[44].mxu0  ;;  %v2009_v57 = vmax.bf16 %v3912_v2, %v1977_v50  ;;  %v1959_v60 = vpop.f32.mrb[46].mxu1  ;;  %2620 = vmatprep.subr.bf16.mxu1 %v2011_v53  ;;  %v1958_v0 = vadd.f32 %v1957_v56, %v4500_v13 }
 0x328   : > { %v1904_v59 = vpop.f32.mrb[45].mxu0  ;;  %v1960_v61 = vadd.f32 %v1959_v60, %v4502_v14  ;;  %v1961_v62 = vpop.f32.mrb[47].mxu1  ;;  %2621 = vmatpush1.bf16.msra.mxu1 %v2010_v54  ;;  %v1903_v63 = vadd.f32 %v1902_v55, %v4500_v13 }
 0x329   : > { %v1906_v38 = vpop.f32.mrb[46].mxu0  ;;  %2547 = vmatprep.subr.bf16.mxu0 %v2009_v57  ;;  %v1962_v4 = vadd.f32 %v1961_v62, %v4502_v14  ;;  %v1905_v5 = vadd.f32 %v1904_v59, %v4500_v13  ;;  %v4706_v13 = vpop.permute.xlu1 %2038 }
 0x32a   : > { %v1907_v1 = vadd.f32 %v1906_v38, %v4502_v14  ;;  %v1908_v3 = vpop.f32.mrb[47].mxu0  ;;  %2548 = vmatpush1.bf16.msra.mxu0 %v2008_v58  ;;  %v1994_v6 = vpack.c.bf16 %v1960_v61, %v1956_v32 }
 0x32b   : > { %v1909_v7 = vadd.f32 %v1908_v3, %v4502_v14  ;;  %v1995_v9 = vpack.c.bf16 %v1962_v4, %v1958_v0  ;;  %v4708_v14 = vpop.permute.xlu0 %2043 }
 0x32c   : > { %v1992_v8 = vpack.c.bf16 %v1907_v1, %v1903_v63  ;;  %v2026_v12 = vmax.bf16 %v3912_v2, %v1994_v6  ;;  %5191 = vst [vmem:[#allocation5_spill] sm:$0xff] %v4708_v14 }
 0x32d   : > { %v1993_v10 = vpack.c.bf16 %v1909_v7, %v1905_v5  ;;  %v2027_v11 = vmax.bf16 %v3912_v2, %v1995_v9 }
 0x32e   : > { %v2024_v17 = vmax.bf16 %v3912_v2, %v1992_v8 }
 0x32f   : > { %v2025_v15 = vmax.bf16 %v3912_v2, %v1993_v10  ;;  %2622 = vmatprep.subr.bf16.mxu1 %v2027_v11 }
 0x330   : > { %2623 = vmatpush1.bf16.msra.mxu1 %v2026_v12 }
 0x331   : > { %2549 = vmatprep.subr.bf16.mxu0 %v2025_v15 }
 0x332   : > { %2550 = vmatpush1.bf16.msra.mxu0 %v2024_v17 }
 0x333   : > { %3492 = vmatmul.mubr.msk.bf16.vlgmr.msra.gmra.mrb[96].mxu1 %vm2096_vm3, %v4524_v52 }
 0x334   : > { %2662 = vmatprep.mubr.bf16.mxu1 %v3912_v2 }
 0x335   : > { %3488 = vmatmul.mubr.msk.bf16.vlgmr.msra.gmra.mrb[96].mxu0 %vm2096_vm3, %v4524_v52  ;;  %v4710_v52 = vpop.permute.xlu1 %2048 }
 0x336   : > { %2589 = vmatprep.mubr.bf16.mxu0 %v3912_v2 }
 0x339   : > { %v4714_v18 = vpop.permute.xlu1 %2831 }
 0x33a   : > { %5192 = vst [vmem:[#allocation6_spill] sm:$0xff] %v4714_v18 }
 0x33b   : > { %3493 = vmatmul.mubr.msk.bf16.gmra.mrb[100].mxu1 %vm2096_vm3, %v4547_v16 }
 0x33c   : > { %2672 = vmatprep.mubr.bf16.mxu1 %v3912_v2 }
 0x33d   : > { %3489 = vmatmul.mubr.msk.bf16.gmra.mrb[100].mxu0 %vm2096_vm3, %v4547_v16  ;;  %v4712_v16 = vpop.permute.xlu0 %2053  ;;  %v4718_v21 = vpop.permute.xlu1 %2058 }
 0x33e   : > { %2599 = vmatprep.mubr.bf16.mxu0 %v3912_v2 }
 0x341   : > { %v4732_v54 = vpop.permute.xlu1 %2063 }
 0x343   : > { %3494 = vmatmul.mubr.msk.bf16.gmra.mrb[104].mxu1 %vm2096_vm3, %v4569_v35 }
 0x344   : > { %2682 = vmatprep.mubr.bf16.mxu1 %v3912_v2 }
 0x345   : > { %3490 = vmatmul.mubr.msk.bf16.gmra.mrb[104].mxu0 %vm2096_vm3, %v4569_v35  ;;  %v4716_v35 = vpop.permute.xlu0 %2836 }
 0x346   : > { %2609 = vmatprep.mubr.bf16.mxu0 %v3912_v2  ;;  %v3247_v2 = vunpack.c.l.s4 %v3913_v19 }
 0x348   : > { %v3248_v31 = vunpack.c.0.s8 %v3247_v2 }
 0x349   : > { %v4720_v22 = vpop.permute.xlu0 %2841 }
 0x34a   : > { %v4730_v53 = vsub.s32 %v3248_v31, %v3250_v34 }
 0x34b   : > { %3495 = vmatmul.mubr.msk.bf16.gmra.mrb[108].mxu1 %vm2096_vm3, %v4580_v36 }
 0x34d   : > { %3491 = vmatmul.mubr.msk.bf16.gmra.mrb[108].mxu0 %vm2096_vm3, %v4580_v36  ;;  %v4734_v55 = vpop.permute.xlu0 %2846 }
 0x38e   : > { %v2143_v36 = vpop.f32.mrb[48].mxu0  ;;  %v2216_v23 = vpop.f32.mrb[48].mxu1 }
 0x38f   : > { %v2144_v24 = vadd.f32 %v2143_v36, %v4706_v13  ;;  %v2217_v25 = vadd.f32 %v2216_v23, %v4706_v13  ;;  %v2145_v26 = vpop.f32.mrb[49].mxu0  ;;  %v2218_v27 = vpop.f32.mrb[49].mxu1 }
 0x390   : > { %v2146_v28 = vadd.f32 %v2145_v26, %v4706_v13  ;;  %v2219_v29 = vadd.f32 %v2218_v27, %v4706_v13  ;;  %v2147_v33 = vpop.f32.mrb[50].mxu0  ;;  %v2220_v30 = vpop.f32.mrb[50].mxu1 }
 0x391   : > { %v2693_v37 = vmax.f32 %v2144_v24, 0.0  ;;  %v2695_v39 = vmax.f32 %v2217_v25, 0.0  ;;  %v2148_v40 = vadd.f32 %v2147_v33, %v4708_v14  ;;  %v2221_v41 = vadd.f32 %v2220_v30, %v4708_v14  ;;  %v2149_v42 = vpop.f32.mrb[51].mxu0  ;;  %v2222_v43 = vpop.f32.mrb[51].mxu1 }
 0x392   : > { %v2694_v44 = vmax.f32 %v2146_v28, 0.0  ;;  %v2696_v45 = vmax.f32 %v2219_v29, 0.0  ;;  %v2150_v46 = vadd.f32 %v2149_v42, %v4708_v14  ;;  %v2223_v47 = vadd.f32 %v2222_v43, %v4708_v14 }
 0x393   : > { %v2709_v48 = vmax.f32 %v2148_v40, 0.0  ;;  %v2711_v49 = vmax.f32 %v2221_v41, 0.0  ;;  %v2869_v56 = vmul.f32 %v4714_v18, %v2693_v37  ;;  %v2871_v57 = vmul.f32 %v4714_v18, %v2695_v39  ;;  %v4756_v39 = vpop.permute.xlu1 %2068  ;;  %v4758_v40 = vpop.permute.xlu0 %2851 }
 0x394   : > { %v2710_v50 = vmax.f32 %v2150_v46, 0.0  ;;  %v2712_v51 = vmax.f32 %v2223_v47, 0.0  ;;  %v2870_v60 = vmul.f32 %v4714_v18, %v2694_v44  ;;  %v2872_v32 = vmul.f32 %v4714_v18, %v2696_v45 }
 0x395   : > { %v2885_v58 = vmul.f32 %v4716_v35, %v2709_v48  ;;  %v2887_v59 = vmul.f32 %v4716_v35, %v2711_v49 }
 0x396   : > { %v2886_v38 = vmul.f32 %v4716_v35, %v2710_v50  ;;  %v2888_v61 = vmul.f32 %v4716_v35, %v2712_v51  ;;  %v2153_v62 = vpop.f32.mrb[52].mxu0  ;;  %v2226_v63 = vpop.f32.mrb[52].mxu1 }
 0x397   : > { %v2997_v0 = vadd.f32 %v2885_v58, %v2869_v56  ;;  %v3023_v1 = vadd.f32 %v2887_v59, %v2871_v57  ;;  %v2154_v3 = vadd.f32 %v2153_v62, %v4710_v52  ;;  %v2227_v4 = vadd.f32 %v2226_v63, %v4710_v52  ;;  %v2155_v5 = vpop.f32.mrb[53].mxu0  ;;  %v2228_v6 = vpop.f32.mrb[53].mxu1 }
 0x398   : > { %v3010_v7 = vadd.f32 %v2886_v38, %v2870_v60  ;;  %v3036_v8 = vadd.f32 %v2888_v61, %v2872_v32  ;;  %v2156_v9 = vadd.f32 %v2155_v5, %v4710_v52  ;;  %v2229_v10 = vadd.f32 %v2228_v6, %v4710_v52  ;;  %v2157_v11 = vpop.f32.mrb[54].mxu0  ;;  %v2230_v12 = vpop.f32.mrb[54].mxu1 }
 0x399   : > { %v2725_v15 = vmax.f32 %v2154_v3, 0.0  ;;  %v2727_v17 = vmax.f32 %v2227_v4, 0.0  ;;  %v2158_v19 = vadd.f32 %v2157_v11, %v4712_v16  ;;  %v2231_v2 = vadd.f32 %v2230_v12, %v4712_v16  ;;  %v2159_v20 = vpop.f32.mrb[55].mxu0  ;;  %v2232_v36 = vpop.f32.mrb[55].mxu1 }
 0x39a   : > { %v2726_v23 = vmax.f32 %v2156_v9, 0.0  ;;  %v2728_v24 = vmax.f32 %v2229_v10, 0.0  ;;  %v2160_v25 = vadd.f32 %v2159_v20, %v4712_v16  ;;  %v2233_v26 = vadd.f32 %v2232_v36, %v4712_v16  ;;  %v4776_v20 = vpop.permute.xlu0 %2856 }
 0x39b   : > { %v2901_v27 = vmul.f32 %v4720_v22, %v2725_v15  ;;  %v2903_v28 = vmul.f32 %v4720_v22, %v2727_v17  ;;  %v2741_v29 = vmax.f32 %v2158_v19, 0.0  ;;  %v2743_v33 = vmax.f32 %v2231_v2, 0.0  ;;  %v4774_v2 = vpop.permute.xlu1 %2073 }
 0x39c   : > { %v2902_v30 = vmul.f32 %v4720_v22, %v2726_v23  ;;  %v2904_v31 = vmul.f32 %v4720_v22, %v2728_v24  ;;  %v2742_v34 = vmax.f32 %v2160_v25, 0.0  ;;  %v2744_v37 = vmax.f32 %v2233_v26, 0.0 }
 0x39d   : > { %v2998_v41 = vadd.f32 %v2997_v0, %v2901_v27  ;;  %v3024_v42 = vadd.f32 %v3023_v1, %v2903_v28  ;;  %v2917_v43 = vmul.f32 %v4734_v55, %v2741_v29  ;;  %v2919_v44 = vmul.f32 %v4734_v55, %v2743_v33 }
 0x39e   : > { %v3011_v45 = vadd.f32 %v3010_v7, %v2902_v30  ;;  %v3037_v46 = vadd.f32 %v3036_v8, %v2904_v31  ;;  %v2918_v47 = vmul.f32 %v4734_v55, %v2742_v34  ;;  %v2920_v48 = vmul.f32 %v4734_v55, %v2744_v37  ;;  %v2163_v49 = vpop.f32.mrb[56].mxu0  ;;  %v2236_v50 = vpop.f32.mrb[56].mxu1 }
 0x39f   : > { %v2999_v51 = vadd.f32 %v2998_v41, %v2917_v43  ;;  %v3025_v56 = vadd.f32 %v3024_v42, %v2919_v44  ;;  %v2164_v57 = vadd.f32 %v2163_v49, %v4718_v21  ;;  %v2237_v58 = vadd.f32 %v2236_v50, %v4718_v21  ;;  %v2165_v59 = vpop.f32.mrb[57].mxu0  ;;  %v2238_v60 = vpop.f32.mrb[57].mxu1 }
 0x3a0   : > { %v3012_v32 = vadd.f32 %v3011_v45, %v2918_v47  ;;  %v3038_v38 = vadd.f32 %v3037_v46, %v2920_v48  ;;  %v2166_v61 = vadd.f32 %v2165_v59, %v4718_v21  ;;  %v2239_v62 = vadd.f32 %v2238_v60, %v4718_v21  ;;  %v2167_v63 = vpop.f32.mrb[58].mxu0  ;;  %v2240_v0 = vpop.f32.mrb[58].mxu1 }
 0x3a1   : > { %v2757_v1 = vmax.f32 %v2164_v57, 0.0  ;;  %v2759_v3 = vmax.f32 %v2237_v58, 0.0  ;;  %v2168_v4 = vadd.f32 %v2167_v63, %v4732_v54  ;;  %v2241_v5 = vadd.f32 %v2240_v0, %v4732_v54  ;;  %v2169_v6 = vpop.f32.mrb[59].mxu0  ;;  %v2242_v7 = vpop.f32.mrb[59].mxu1 }
 0x3a2   : > { %v2758_v8 = vmax.f32 %v2166_v61, 0.0  ;;  %v2760_v9 = vmax.f32 %v2239_v62, 0.0  ;;  %v2170_v10 = vadd.f32 %v2169_v6, %v4732_v54  ;;  %v2243_v11 = vadd.f32 %v2242_v7, %v4732_v54  ;;  %v4790_v62 = vpop.permute.xlu1 %2861 }
 0x3a3   : > { %v2933_v12 = vmul.f32 %v4758_v40, %v2757_v1  ;;  %v2935_v15 = vmul.f32 %v4758_v40, %v2759_v3  ;;  %v2773_v17 = vmax.f32 %v2168_v4, 0.0  ;;  %v2775_v19 = vmax.f32 %v2241_v5, 0.0 }
 0x3a4   : > { %v2934_v36 = vmul.f32 %v4758_v40, %v2758_v8  ;;  %v2936_v23 = vmul.f32 %v4758_v40, %v2760_v9  ;;  %v2774_v24 = vmax.f32 %v2170_v10, 0.0  ;;  %v2776_v25 = vmax.f32 %v2243_v11, 0.0  ;;  %v4796_v8 = vpop.permute.xlu0 %2866 }
 0x3a5   : > { %v3000_v26 = vadd.f32 %v2999_v51, %v2933_v12  ;;  %v3026_v27 = vadd.f32 %v3025_v56, %v2935_v15  ;;  %v2949_v28 = vmul.f32 %v4776_v20, %v2773_v17  ;;  %v2951_v29 = vmul.f32 %v4776_v20, %v2775_v19 }
 0x3a6   : > { %v3013_v33 = vadd.f32 %v3012_v32, %v2934_v36  ;;  %v3039_v30 = vadd.f32 %v3038_v38, %v2936_v23  ;;  %v2950_v31 = vmul.f32 %v4776_v20, %v2774_v24  ;;  %v2952_v34 = vmul.f32 %v4776_v20, %v2776_v25  ;;  %v2173_v37 = vpop.f32.mrb[60].mxu0  ;;  %v2246_v41 = vpop.f32.mrb[60].mxu1 }
 0x3a7   : > { %v3001_v42 = vadd.f32 %v3000_v26, %v2949_v28  ;;  %v3027_v43 = vadd.f32 %v3026_v27, %v2951_v29  ;;  %v2174_v44 = vadd.f32 %v2173_v37, %v4756_v39  ;;  %v2247_v45 = vadd.f32 %v2246_v41, %v4756_v39  ;;  %v2175_v46 = vpop.f32.mrb[61].mxu0  ;;  %v2248_v47 = vpop.f32.mrb[61].mxu1 }
 0x3a8   : > { %v3014_v48 = vadd.f32 %v3013_v33, %v2950_v31  ;;  %v3040_v49 = vadd.f32 %v3039_v30, %v2952_v34  ;;  %v2176_v50 = vadd.f32 %v2175_v46, %v4756_v39  ;;  %v2249_v51 = vadd.f32 %v2248_v47, %v4756_v39  ;;  %v2177_v56 = vpop.f32.mrb[62].mxu0  ;;  %v2250_v57 = vpop.f32.mrb[62].mxu1 }
 0x3a9   : > { %v2789_v58 = vmax.f32 %v2174_v44, 0.0  ;;  %v2791_v59 = vmax.f32 %v2247_v45, 0.0  ;;  %v2178_v60 = vadd.f32 %v2177_v56, %v4774_v2  ;;  %v2251_v32 = vadd.f32 %v2250_v57, %v4774_v2  ;;  %v2179_v38 = vpop.f32.mrb[63].mxu0  ;;  %v2252_v61 = vpop.f32.mrb[63].mxu1 }
 0x3aa   : > { %v2790_v63 = vmax.f32 %v2176_v50, 0.0  ;;  %v2792_v0 = vmax.f32 %v2249_v51, 0.0  ;;  %v2180_v1 = vadd.f32 %v2179_v38, %v4774_v2  ;;  %v2253_v3 = vadd.f32 %v2252_v61, %v4774_v2 }
 0x3ab   : > { %v2965_v4 = vmul.f32 %v4790_v62, %v2789_v58  ;;  %v2967_v5 = vmul.f32 %v4790_v62, %v2791_v59  ;;  %v2805_v6 = vmax.f32 %v2178_v60, 0.0  ;;  %v2807_v7 = vmax.f32 %v2251_v32, 0.0 }
 0x3ac   : > { %v2966_v9 = vmul.f32 %v4790_v62, %v2790_v63  ;;  %v2968_v10 = vmul.f32 %v4790_v62, %v2792_v0  ;;  %v2806_v11 = vmax.f32 %v2180_v1, 0.0  ;;  %v2808_v12 = vmax.f32 %v2253_v3, 0.0 }
 0x3ad   : > { %v3002_v15 = vadd.f32 %v3001_v42, %v2965_v4  ;;  %v3028_v17 = vadd.f32 %v3027_v43, %v2967_v5  ;;  %v2981_v19 = vmul.f32 %v4796_v8, %v2805_v6  ;;  %v2983_v36 = vmul.f32 %v4796_v8, %v2807_v7 }
 0x3ae   : > { %v3015_v23 = vadd.f32 %v3014_v48, %v2966_v9  ;;  %v3041_v24 = vadd.f32 %v3040_v49, %v2968_v10  ;;  %v2982_v25 = vmul.f32 %v4796_v8, %v2806_v11  ;;  %v2984_v26 = vmul.f32 %v4796_v8, %v2808_v12  ;;  %v2289_v27 = vpop.f32.mrb[64].mxu0  ;;  %v2362_v28 = vpop.f32.mrb[64].mxu1 }
 0x3af   : > { %v3003_v29 = vadd.f32 %v3002_v15, %v2981_v19  ;;  %v3029_v33 = vadd.f32 %v3028_v17, %v2983_v36  ;;  %v2290_v30 = vadd.f32 %v2289_v27, %v4706_v13  ;;  %v2363_v31 = vadd.f32 %v2362_v28, %v4706_v13  ;;  %v2291_v34 = vpop.f32.mrb[65].mxu0  ;;  %v2364_v37 = vpop.f32.mrb[65].mxu1 }
 0x3b0   : > { %v3016_v41 = vadd.f32 %v3015_v23, %v2982_v25  ;;  %v3042_v42 = vadd.f32 %v3041_v24, %v2984_v26  ;;  %v2292_v43 = vadd.f32 %v2291_v34, %v4706_v13  ;;  %v2365_v44 = vadd.f32 %v2364_v37, %v4706_v13  ;;  %v2293_v45 = vpop.f32.mrb[66].mxu0  ;;  %v2366_v46 = vpop.f32.mrb[66].mxu1 }
 0x3b1   : > { %v3004_v47 = vrot.slane %v3003_v29, 4  ;;  %v3030_v48 = vrot.slane %v3029_v33, 4  ;;  %v2697_v49 = vmax.f32 %v2290_v30, 0.0  ;;  %v2699_v50 = vmax.f32 %v2363_v31, 0.0  ;;  %v2295_v51 = vpop.f32.mrb[67].mxu0  ;;  %v2368_v56 = vpop.f32.mrb[67].mxu1 }
 0x3b2   : > { %v3017_v57 = vrot.slane %v3016_v41, 4  ;;  %v3043_v58 = vrot.slane %v3042_v42, 4  ;;  %v2698_v59 = vmax.f32 %v2292_v43, 0.0  ;;  %v2700_v60 = vmax.f32 %v2365_v44, 0.0 }
 0x3b3   : > { %v3005_v32 = vadd.f32 %v3004_v47, %v3003_v29  ;;  %v3031_v38 = vadd.f32 %v3030_v48, %v3029_v33  ;;  %v2873_v61 = vmul.f32 %v4714_v18, %v2697_v49  ;;  %v2875_v63 = vmul.f32 %v4714_v18, %v2699_v50 }
 0x3b4   : > { %v3018_v0 = vadd.f32 %v3017_v57, %v3016_v41  ;;  %v3044_v1 = vadd.f32 %v3043_v58, %v3042_v42  ;;  %v2874_v3 = vmul.f32 %v4714_v18, %v2698_v59  ;;  %v2876_v4 = vmul.f32 %v4714_v18, %v2700_v60  ;;  %v4820_v58 = vpop.permute.xlu1 %3207 }
 0x3b5   : > { %v3006_v5 = vrot.slane %v3005_v32, 2  ;;  %v3032_v6 = vrot.slane %v3031_v38, 2  ;;  %v2294_v7 = vadd.f32 %v2293_v45, %v4708_v14  ;;  %v2367_v9 = vadd.f32 %v2366_v46, %v4708_v14 }
 0x3b6   : > { %v3019_v10 = vrot.slane %v3018_v0, 2  ;;  %v3045_v11 = vrot.slane %v3044_v1, 2  ;;  %v2296_v12 = vadd.f32 %v2295_v51, %v4708_v14  ;;  %v2369_v15 = vadd.f32 %v2368_v56, %v4708_v14  ;;  %v2299_v17 = vpop.f32.mrb[68].mxu0  ;;  %v2372_v19 = vpop.f32.mrb[68].mxu1 }
 0x3b7   : > { %v3007_v36 = vadd.f32 %v3006_v5, %v3005_v32  ;;  %v3033_v23 = vadd.f32 %v3032_v6, %v3031_v38  ;;  %v2713_v24 = vmax.f32 %v2294_v7, 0.0  ;;  %v2715_v25 = vmax.f32 %v2367_v9, 0.0  ;;  %v2301_v26 = vpop.f32.mrb[69].mxu0  ;;  %v2374_v27 = vpop.f32.mrb[69].mxu1 }
 0x3b8   : > { %v3020_v28 = vadd.f32 %v3019_v10, %v3018_v0  ;;  %v3046_v29 = vadd.f32 %v3045_v11, %v3044_v1  ;;  %v2714_v33 = vmax.f32 %v2296_v12, 0.0  ;;  %v2716_v30 = vmax.f32 %v2369_v15, 0.0  ;;  %v2303_v31 = vpop.f32.mrb[70].mxu0  ;;  %v2376_v34 = vpop.f32.mrb[70].mxu1 }
 0x3b9   : > { %v3008_v37 = vrot.slane %v3007_v36, 1  ;;  %v3034_v41 = vrot.slane %v3033_v23, 1  ;;  %v2889_v42 = vmul.f32 %v4716_v35, %v2713_v24  ;;  %v2891_v43 = vmul.f32 %v4716_v35, %v2715_v25  ;;  %v2305_v44 = vpop.f32.mrb[71].mxu0  ;;  %v2378_v45 = vpop.f32.mrb[71].mxu1 }
 0x3ba   : > { %v3021_v46 = vrot.slane %v3020_v28, 1  ;;  %v3047_v47 = vrot.slane %v3046_v29, 1  ;;  %v2890_v48 = vmul.f32 %v4716_v35, %v2714_v33  ;;  %v2892_v49 = vmul.f32 %v4716_v35, %v2716_v30 }
 0x3bb   : > { %v3009_v50 = vadd.f32 %v3008_v37, %v3007_v36  ;;  %v3035_v51 = vadd.f32 %v3034_v41, %v3033_v23  ;;  %v3049_v56 = vadd.f32 %v2889_v42, %v2873_v61  ;;  %v3075_v57 = vadd.f32 %v2891_v43, %v2875_v63 }
 0x3bc   : > { %v3022_v59 = vadd.f32 %v3021_v46, %v3020_v28  ;;  %v3048_v60 = vadd.f32 %v3047_v47, %v3046_v29  ;;  %v3062_v32 = vadd.f32 %v2890_v48, %v2874_v3  ;;  %v3088_v38 = vadd.f32 %v2892_v49, %v2876_v4 }
 0x3bd   : > { %v4823_v0 = vadd.f32 %v4820_v58, %v3009_v50  ;;  %v4826_v1 = vadd.f32 %v4820_v58, %v3035_v51  ;;  %v2300_v5 = vadd.f32 %v2299_v17, %v4710_v52  ;;  %v2373_v6 = vadd.f32 %v2372_v19, %v4710_v52 }
 0x3be   : > { %v4831_v7 = vadd.f32 %v4820_v58, %v3022_v59  ;;  %v4834_v61 = vadd.f32 %v4820_v58, %v3048_v60  ;;  %v2302_v63 = vadd.f32 %v2301_v26, %v4710_v52  ;;  %v2375_v3 = vadd.f32 %v2374_v27, %v4710_v52  ;;  %v2309_v4 = vpop.f32.mrb[72].mxu0  ;;  %v2382_v9 = vpop.f32.mrb[72].mxu1 }
 0x3bf   : > { %v2729_v10 = vmax.f32 %v2300_v5, 0.0  ;;  %v2731_v11 = vmax.f32 %v2373_v6, 0.0  ;;  %v2304_v12 = vadd.f32 %v2303_v31, %v4712_v16  ;;  %v2377_v15 = vadd.f32 %v2376_v34, %v4712_v16  ;;  %v2311_v17 = vpop.f32.mrb[73].mxu0  ;;  %v2384_v19 = vpop.f32.mrb[73].mxu1 }
 0x3c0   : > { %v2730_v24 = vmax.f32 %v2302_v63, 0.0  ;;  %v2732_v25 = vmax.f32 %v2375_v3, 0.0  ;;  %v2313_v26 = vpop.f32.mrb[74].mxu0  ;;  %v2386_v27 = vpop.f32.mrb[74].mxu1  ;;  %v2306_v42 = vadd.f32 %v2305_v44, %v4712_v16  ;;  %v2379_v43 = vadd.f32 %v2378_v45, %v4712_v16 }
 0x3c1   : > { %v2905_v28 = vmul.f32 %v4720_v22, %v2729_v10  ;;  %v2907_v29 = vmul.f32 %v4720_v22, %v2731_v11  ;;  %v2745_v33 = vmax.f32 %v2304_v12, 0.0  ;;  %v2747_v30 = vmax.f32 %v2377_v15, 0.0  ;;  %v2315_v31 = vpop.f32.mrb[75].mxu0  ;;  %v2388_v34 = vpop.f32.mrb[75].mxu1 }
 0x3c2   : > { %v2906_v37 = vmul.f32 %v4720_v22, %v2730_v24  ;;  %v2908_v41 = vmul.f32 %v4720_v22, %v2732_v25  ;;  %v2746_v59 = vmax.f32 %v2306_v42, 0.0  ;;  %v2748_v60 = vmax.f32 %v2379_v43, 0.0 }
 0x3c3   : > { %v3050_v46 = vadd.f32 %v3049_v56, %v2905_v28  ;;  %v3076_v47 = vadd.f32 %v3075_v57, %v2907_v29  ;;  %v2921_v48 = vmul.f32 %v4734_v55, %v2745_v33  ;;  %v2923_v49 = vmul.f32 %v4734_v55, %v2747_v30 }
 0x3c4   : > { %v3063_v50 = vadd.f32 %v3062_v32, %v2906_v37  ;;  %v3089_v51 = vadd.f32 %v3088_v38, %v2908_v41  ;;  %v2310_v63 = vadd.f32 %v2309_v4, %v4718_v21  ;;  %v2383_v3 = vadd.f32 %v2382_v9, %v4718_v21 }
 0x3c5   : > { %v3051_v5 = vadd.f32 %v3050_v46, %v2921_v48  ;;  %v3077_v6 = vadd.f32 %v3076_v47, %v2923_v49  ;;  %v2922_v44 = vmul.f32 %v4734_v55, %v2746_v59  ;;  %v2924_v45 = vmul.f32 %v4734_v55, %v2748_v60 }
 0x3c6   : > { %v2312_v56 = vadd.f32 %v2311_v17, %v4718_v21  ;;  %v2385_v57 = vadd.f32 %v2384_v19, %v4718_v21  ;;  %v2319_v10 = vpop.f32.mrb[76].mxu0  ;;  %v2392_v11 = vpop.f32.mrb[76].mxu1  ;;  %v2761_v32 = vmax.f32 %v2310_v63, 0.0  ;;  %v2763_v38 = vmax.f32 %v2383_v3, 0.0 }
 0x3c7   : > { %v2314_v12 = vadd.f32 %v2313_v26, %v4732_v54  ;;  %v2387_v15 = vadd.f32 %v2386_v27, %v4732_v54  ;;  %v2321_v24 = vpop.f32.mrb[77].mxu0  ;;  %v2394_v4 = vpop.f32.mrb[77].mxu1  ;;  %v3064_v25 = vadd.f32 %v3063_v50, %v2922_v44  ;;  %v3090_v9 = vadd.f32 %v3089_v51, %v2924_v45 }
 0x3c8   : > { %v2762_v28 = vmax.f32 %v2312_v56, 0.0  ;;  %v2764_v29 = vmax.f32 %v2385_v57, 0.0  ;;  %v2323_v33 = vpop.f32.mrb[78].mxu0  ;;  %v2396_v30 = vpop.f32.mrb[78].mxu1  ;;  %v2937_v17 = vmul.f32 %v4758_v40, %v2761_v32  ;;  %v2939_v19 = vmul.f32 %v4758_v40, %v2763_v38 }
 0x3c9   : > { %v2777_v37 = vmax.f32 %v2314_v12, 0.0  ;;  %v2779_v41 = vmax.f32 %v2387_v15, 0.0  ;;  %v2325_v42 = vpop.f32.mrb[79].mxu0  ;;  %v2398_v43 = vpop.f32.mrb[79].mxu1  ;;  %v2316_v46 = vadd.f32 %v2315_v31, %v4732_v54  ;;  %v2389_v47 = vadd.f32 %v2388_v34, %v4732_v54 }
 0x3ca   : > { %v2938_v26 = vmul.f32 %v4758_v40, %v2762_v28  ;;  %v2940_v27 = vmul.f32 %v4758_v40, %v2764_v29  ;;  %v3052_v48 = vadd.f32 %v3051_v5, %v2937_v17  ;;  %v3078_v49 = vadd.f32 %v3077_v6, %v2939_v19 }
 0x3cb   : > { %v2953_v50 = vmul.f32 %v4776_v20, %v2777_v37  ;;  %v2955_v51 = vmul.f32 %v4776_v20, %v2779_v41  ;;  %v2778_v63 = vmax.f32 %v2316_v46, 0.0  ;;  %v2780_v3 = vmax.f32 %v2389_v47, 0.0 }
 0x3cc   : > { %v3065_v59 = vadd.f32 %v3064_v25, %v2938_v26  ;;  %v3091_v60 = vadd.f32 %v3090_v9, %v2940_v27  ;;  %v2320_v56 = vadd.f32 %v2319_v10, %v4756_v39  ;;  %v2393_v57 = vadd.f32 %v2392_v11, %v4756_v39 }
 0x3cd   : > { %v3053_v44 = vadd.f32 %v3052_v48, %v2953_v50  ;;  %v3079_v45 = vadd.f32 %v3078_v49, %v2955_v51  ;;  %v2954_v31 = vmul.f32 %v4776_v20, %v2778_v63  ;;  %v2956_v34 = vmul.f32 %v4776_v20, %v2780_v3 }
 0x3ce   : > { %v2322_v5 = vadd.f32 %v2321_v24, %v4756_v39  ;;  %v2395_v6 = vadd.f32 %v2394_v4, %v4756_v39  ;;  %v2435_v32 = vpop.f32.mrb[80].mxu0  ;;  %v2508_v38 = vpop.f32.mrb[80].mxu1  ;;  %v2793_v12 = vmax.f32 %v2320_v56, 0.0  ;;  %v2795_v15 = vmax.f32 %v2393_v57, 0.0 }
 0x3cf   : > { %v2324_v25 = vadd.f32 %v2323_v33, %v4774_v2  ;;  %v2397_v9 = vadd.f32 %v2396_v30, %v4774_v2  ;;  %v2437_v28 = vpop.f32.mrb[81].mxu0  ;;  %v2510_v10 = vpop.f32.mrb[81].mxu1  ;;  %v3066_v29 = vadd.f32 %v3065_v59, %v2954_v31  ;;  %v3092_v11 = vadd.f32 %v3091_v60, %v2956_v34 }
 0x3d0   : > { %v2794_v17 = vmax.f32 %v2322_v5, 0.0  ;;  %v2796_v19 = vmax.f32 %v2395_v6, 0.0  ;;  %v2439_v37 = vpop.f32.mrb[82].mxu0  ;;  %v2512_v41 = vpop.f32.mrb[82].mxu1  ;;  %v2969_v24 = vmul.f32 %v4790_v62, %v2793_v12  ;;  %v2971_v4 = vmul.f32 %v4790_v62, %v2795_v15 }
 0x3d1   : > { %v2809_v26 = vmax.f32 %v2324_v25, 0.0  ;;  %v2811_v27 = vmax.f32 %v2397_v9, 0.0  ;;  %v2441_v46 = vpop.f32.mrb[83].mxu0  ;;  %v2514_v47 = vpop.f32.mrb[83].mxu1  ;;  %v2326_v48 = vadd.f32 %v2325_v42, %v4774_v2  ;;  %v2399_v49 = vadd.f32 %v2398_v43, %v4774_v2 }
 0x3d2   : > { %v2970_v33 = vmul.f32 %v4790_v62, %v2794_v17  ;;  %v2972_v30 = vmul.f32 %v4790_v62, %v2796_v19  ;;  %v3054_v50 = vadd.f32 %v3053_v44, %v2969_v24  ;;  %v3080_v51 = vadd.f32 %v3079_v45, %v2971_v4 }
 0x3d3   : > { %v2985_v59 = vmul.f32 %v4796_v8, %v2809_v26  ;;  %v2987_v60 = vmul.f32 %v4796_v8, %v2811_v27  ;;  %v2810_v56 = vmax.f32 %v2326_v48, 0.0  ;;  %v2812_v57 = vmax.f32 %v2399_v49, 0.0 }
 0x3d4   : > { %v3067_v63 = vadd.f32 %v3066_v29, %v2970_v33  ;;  %v3093_v3 = vadd.f32 %v3092_v11, %v2972_v30  ;;  %v2436_v5 = vadd.f32 %v2435_v32, %v4706_v13  ;;  %v2509_v6 = vadd.f32 %v2508_v38, %v4706_v13 }
 0x3d5   : > { %v3055_v31 = vadd.f32 %v3054_v50, %v2985_v59  ;;  %v3081_v34 = vadd.f32 %v3080_v51, %v2987_v60  ;;  %v2986_v42 = vmul.f32 %v4796_v8, %v2810_v56  ;;  %v2988_v43 = vmul.f32 %v4796_v8, %v2812_v57 }
 0x3d6   : > { %v2438_v44 = vadd.f32 %v2437_v28, %v4706_v13  ;;  %v2511_v45 = vadd.f32 %v2510_v10, %v4706_v13  ;;  %v4890_v12 = vpop.f32.mrb[84].mxu0  ;;  %v4892_v15 = vpop.f32.mrb[84].mxu1  ;;  %v2701_v29 = vmax.f32 %v2436_v5, 0.0  ;;  %v2703_v11 = vmax.f32 %v2509_v6, 0.0 }
 0x3d7   : > { %v3056_v25 = vrot.slane %v3055_v31, 4  ;;  %v3082_v9 = vrot.slane %v3081_v34, 4  ;;  %v4894_v17 = vpop.f32.mrb[85].mxu0  ;;  %v4896_v32 = vpop.f32.mrb[85].mxu1  ;;  %v3068_v38 = vadd.f32 %v3067_v63, %v2986_v42  ;;  %v3094_v19 = vadd.f32 %v3093_v3, %v2988_v43 }
 0x3d8   : > { %v2702_v24 = vmax.f32 %v2438_v44, 0.0  ;;  %v2704_v4 = vmax.f32 %v2511_v45, 0.0  ;;  %v2449_v26 = vpop.f32.mrb[86].mxu0  ;;  %v2522_v28 = vpop.f32.mrb[86].mxu1  ;;  %v2877_v33 = vmul.f32 %v4714_v18, %v2701_v29  ;;  %v2879_v30 = vmul.f32 %v4714_v18, %v2703_v11 }
 0x3d9   : > { %v3057_v27 = vadd.f32 %v3056_v25, %v3055_v31  ;;  %v3083_v10 = vadd.f32 %v3082_v9, %v3081_v34  ;;  %v4900_v48 = vpop.f32.mrb[87].mxu0  ;;  %v4902_v49 = vpop.f32.mrb[87].mxu1  ;;  %v3069_v50 = vrot.slane %v3068_v38, 4  ;;  %v3095_v51 = vrot.slane %v3094_v19, 4 }
 0x3da   : > { %v2878_v59 = vmul.f32 %v4714_v18, %v2702_v24  ;;  %v2880_v60 = vmul.f32 %v4714_v18, %v2704_v4  ;;  %v2440_v56 = vadd.f32 %v2439_v37, %v4708_v14  ;;  %v2513_v57 = vadd.f32 %v2512_v41, %v4708_v14 }
 0x3db   : > { %v3058_v63 = vrot.slane %v3057_v27, 2  ;;  %v3084_v3 = vrot.slane %v3083_v10, 2  ;;  %v3070_v31 = vadd.f32 %v3069_v50, %v3068_v38  ;;  %v3096_v34 = vadd.f32 %v3095_v51, %v3094_v19 }
 0x3dc   : > { %v2442_v5 = vadd.f32 %v2441_v46, %v4708_v14  ;;  %v2515_v6 = vadd.f32 %v2514_v47, %v4708_v14  ;;  %v2717_v44 = vmax.f32 %v2440_v56, 0.0  ;;  %v2719_v45 = vmax.f32 %v2513_v57, 0.0 }
 0x3dd   : > { %v3059_v42 = vadd.f32 %v3058_v63, %v3057_v27  ;;  %v3085_v43 = vadd.f32 %v3084_v3, %v3083_v10  ;;  %v3071_v25 = vrot.slane %v3070_v31, 2  ;;  %v3097_v9 = vrot.slane %v3096_v34, 2 }
 0x3de   : > { %v2718_v29 = vmax.f32 %v2442_v5, 0.0  ;;  %v2720_v11 = vmax.f32 %v2515_v6, 0.0  ;;  %v4910_v24 = vpop.f32.mrb[88].mxu0  ;;  %v4912_v4 = vpop.f32.mrb[88].mxu1  ;;  %v2893_v38 = vmul.f32 %v4716_v35, %v2717_v44  ;;  %v2895_v46 = vmul.f32 %v4716_v35, %v2719_v45 }
 0x3df   : > { %v3060_v37 = vrot.slane %v3059_v42, 1  ;;  %v3086_v41 = vrot.slane %v3085_v43, 1  ;;  %v4916_v19 = vpop.f32.mrb[89].mxu0  ;;  %v4918_v47 = vpop.f32.mrb[89].mxu1  ;;  %v3072_v27 = vadd.f32 %v3071_v25, %v3070_v31  ;;  %v3098_v10 = vadd.f32 %v3097_v9, %v3096_v34 }
 0x3e0   : > { %v2894_v50 = vmul.f32 %v4716_v35, %v2718_v29  ;;  %v2896_v51 = vmul.f32 %v4716_v35, %v2720_v11  ;;  %v2459_v63 = vpop.f32.mrb[90].mxu0  ;;  %v2532_v3 = vpop.f32.mrb[90].mxu1  ;;  %v3101_v5 = vadd.f32 %v2893_v38, %v2877_v33  ;;  %v3127_v6 = vadd.f32 %v2895_v46, %v2879_v30 }
 0x3e1   : > { %v3061_v56 = vadd.f32 %v3060_v37, %v3059_v42  ;;  %v3087_v57 = vadd.f32 %v3086_v41, %v3085_v43  ;;  %v4922_v23 = vpop.f32.mrb[91].mxu0  ;;  %v4924_v44 = vpop.f32.mrb[91].mxu1  ;;  %v3073_v45 = vrot.slane %v3072_v27, 1  ;;  %v3099_v36 = vrot.slane %v3098_v10, 1 }
 0x3e2   : > { %v3114_v18 = vadd.f32 %v2894_v50, %v2878_v59  ;;  %v3140_v14 = vadd.f32 %v2896_v51, %v2880_v60  ;;  %v2446_v42 = vadd.f32 %v4890_v12, %v4710_v52  ;;  %v2519_v33 = vadd.f32 %v4892_v15, %v4710_v52 }
 0x3e3   : > { %v4927_v31 = vadd.f32 %v4820_v58, %v3061_v56  ;;  %v4930_v34 = vadd.f32 %v4820_v58, %v3087_v57  ;;  %v3074_v30 = vadd.f32 %v3073_v45, %v3072_v27  ;;  %v3100_v43 = vadd.f32 %v3099_v36, %v3098_v10 }
 0x3e4   : > { %v2448_v25 = vadd.f32 %v4894_v17, %v4710_v52  ;;  %v2521_v59 = vadd.f32 %v4896_v32, %v4710_v52  ;;  %v2733_v60 = vmax.f32 %v2446_v42, 0.0  ;;  %v2735_v9 = vmax.f32 %v2519_v33, 0.0 }
 0x3e5   : > { %v2450_v29 = vadd.f32 %v2449_v26, %v4712_v16  ;;  %v2523_v11 = vadd.f32 %v2522_v28, %v4712_v16  ;;  %v4943_v37 = vadd.f32 %v4820_v58, %v3074_v30  ;;  %v4946_v12 = vadd.f32 %v4820_v58, %v3100_v43 }
 0x3e6   : > { %v2734_v15 = vmax.f32 %v2448_v25, 0.0  ;;  %v2736_v36 = vmax.f32 %v2521_v59, 0.0  ;;  %v2465_v41 = vpop.f32.mrb[92].mxu0  ;;  %v2538_v38 = vpop.f32.mrb[92].mxu1  ;;  %v2909_v17 = vmul.f32 %v4720_v22, %v2733_v60  ;;  %v2911_v32 = vmul.f32 %v4720_v22, %v2735_v9 }
 0x3e7   : > { %v2749_v46 = vmax.f32 %v2450_v29, 0.0  ;;  %v2751_v27 = vmax.f32 %v2523_v11, 0.0  ;;  %v2467_v10 = vpop.f32.mrb[93].mxu0  ;;  %v2540_v26 = vpop.f32.mrb[93].mxu1  ;;  %v3244_v28 = vcombine.low %v4927_v31, %v4943_v37  ;;  %v3245_v50 = vcombine.low %v4930_v34, %v4946_v12 }
 0x3e8   : > { %v2910_v51 = vmul.f32 %v4720_v22, %v2734_v15  ;;  %v2912_v56 = vmul.f32 %v4720_v22, %v2736_v36  ;;  %v2469_v57 = vpop.f32.mrb[94].mxu0  ;;  %v2542_v45 = vpop.f32.mrb[94].mxu1  ;;  %v3102_v42 = vadd.f32 %v3101_v5, %v2909_v17  ;;  %v3128_v33 = vadd.f32 %v3127_v6, %v2911_v32 }
 0x3e9   : > { %v2925_v30 = vmul.f32 %v4734_v55, %v2749_v46  ;;  %v2927_v43 = vmul.f32 %v4734_v55, %v2751_v27  ;;  %v4958_v25 = vpop.f32.mrb[95].mxu0  ;;  %v4960_v59 = vpop.f32.mrb[95].mxu1  ;;  %v2452_v29 = vadd.f32 %v4900_v48, %v4712_v16  ;;  %v2525_v11 = vadd.f32 %v4902_v49, %v4712_v16 }
 0x3ea   : > { %v3115_v60 = vadd.f32 %v3114_v18, %v2910_v51  ;;  %v3141_v9 = vadd.f32 %v3140_v14, %v2912_v56  ;;  %v2456_v5 = vadd.f32 %v4910_v24, %v4718_v21  ;;  %v2529_v6 = vadd.f32 %v4912_v4, %v4718_v21 }
 0x3eb   : > { %v3103_v15 = vadd.f32 %v3102_v42, %v2925_v30  ;;  %v3129_v36 = vadd.f32 %v3128_v33, %v2927_v43  ;;  %v2750_v17 = vmax.f32 %v2452_v29, 0.0  ;;  %v2752_v32 = vmax.f32 %v2525_v11, 0.0 }
 0x3ec   : > { %v2458_v18 = vadd.f32 %v4916_v19, %v4718_v21  ;;  %v2531_v14 = vadd.f32 %v4918_v47, %v4718_v21  ;;  %v2765_v48 = vmax.f32 %v2456_v5, 0.0  ;;  %v2767_v46 = vmax.f32 %v2529_v6, 0.0 }
 0x3ed   : > { %v2460_v49 = vadd.f32 %v2459_v63, %v4732_v54  ;;  %v2533_v27 = vadd.f32 %v2532_v3, %v4732_v54  ;;  %v2926_v51 = vmul.f32 %v4734_v55, %v2750_v17  ;;  %v2928_v24 = vmul.f32 %v4734_v55, %v2752_v32 }
 0x3ee   : > { %v2766_v56 = vmax.f32 %v2458_v18, 0.0  ;;  %v2768_v4 = vmax.f32 %v2531_v14, 0.0  ;;  %v2941_v42 = vmul.f32 %v4758_v40, %v2765_v48  ;;  %v2943_v33 = vmul.f32 %v4758_v40, %v2767_v46 }
 0x3ef   : > { %v2781_v19 = vmax.f32 %v2460_v49, 0.0  ;;  %v2783_v30 = vmax.f32 %v2533_v27, 0.0  ;;  %v3116_v43 = vadd.f32 %v3115_v60, %v2926_v51  ;;  %v3142_v47 = vadd.f32 %v3141_v9, %v2928_v24 }
 0x3f0   : > { %v2942_v29 = vmul.f32 %v4758_v40, %v2766_v56  ;;  %v2944_v63 = vmul.f32 %v4758_v40, %v2768_v4  ;;  %v3104_v11 = vadd.f32 %v3103_v15, %v2941_v42  ;;  %v3130_v3 = vadd.f32 %v3129_v36, %v2943_v33 }
 0x3f1   : > { %v2957_v5 = vmul.f32 %v4776_v20, %v2781_v19  ;;  %v2959_v6 = vmul.f32 %v4776_v20, %v2783_v30  ;;  %v2462_v18 = vadd.f32 %v4922_v23, %v4732_v54  ;;  %v2535_v14 = vadd.f32 %v4924_v44, %v4732_v54 }
 0x3f2   : > { %v3117_v17 = vadd.f32 %v3116_v43, %v2942_v29  ;;  %v3143_v32 = vadd.f32 %v3142_v47, %v2944_v63  ;;  %v2466_v48 = vadd.f32 %v2465_v41, %v4756_v39  ;;  %v2539_v46 = vadd.f32 %v2538_v38, %v4756_v39 }
 0x3f3   : > { %v3105_v60 = vadd.f32 %v3104_v11, %v2957_v5  ;;  %v3131_v9 = vadd.f32 %v3130_v3, %v2959_v6  ;;  %v2782_v15 = vmax.f32 %v2462_v18, 0.0  ;;  %v2784_v36 = vmax.f32 %v2535_v14, 0.0 }
 0x3f4   : > { %v2468_v49 = vadd.f32 %v2467_v10, %v4756_v39  ;;  %v2541_v27 = vadd.f32 %v2540_v26, %v4756_v39  ;;  %v2797_v51 = vmax.f32 %v2466_v48, 0.0  ;;  %v2799_v24 = vmax.f32 %v2539_v46, 0.0 }
 0x3f5   : > { %v2470_v56 = vadd.f32 %v2469_v57, %v4774_v2  ;;  %v2543_v23 = vadd.f32 %v2542_v45, %v4774_v2  ;;  %v2958_v44 = vmul.f32 %v4776_v20, %v2782_v15  ;;  %v2960_v4 = vmul.f32 %v4776_v20, %v2784_v36 }
 0x3f6   : > { %v2798_v42 = vmax.f32 %v2468_v49, 0.0  ;;  %v2800_v41 = vmax.f32 %v2541_v27, 0.0  ;;  %v2973_v38 = vmul.f32 %v4790_v62, %v2797_v51  ;;  %v2975_v33 = vmul.f32 %v4790_v62, %v2799_v24 }
 0x3f7   : > { %v2813_v19 = vmax.f32 %v2470_v56, 0.0  ;;  %v2815_v10 = vmax.f32 %v2543_v23, 0.0  ;;  %v3118_v26 = vadd.f32 %v3117_v17, %v2958_v44  ;;  %v3144_v30 = vadd.f32 %v3143_v32, %v2960_v4 }
 0x3f8   : > { %v2974_v43 = vmul.f32 %v4790_v62, %v2798_v42  ;;  %v2976_v57 = vmul.f32 %v4790_v62, %v2800_v41  ;;  %v3106_v45 = vadd.f32 %v3105_v60, %v2973_v38  ;;  %v3132_v47 = vadd.f32 %v3131_v9, %v2975_v33 }
 0x3f9   : > { %v2989_v29 = vmul.f32 %v4796_v8, %v2813_v19  ;;  %v2991_v63 = vmul.f32 %v4796_v8, %v2815_v10  ;;  %v2472_v5 = vadd.f32 %v4958_v25, %v4774_v2  ;;  %v2545_v6 = vadd.f32 %v4960_v59, %v4774_v2 }
 0x3fa   : > { %v3119_v11 = vadd.f32 %v3118_v26, %v2974_v43  ;;  %v3145_v3 = vadd.f32 %v3144_v30, %v2976_v57  ;;  %v5193_v18 = vcombine.low %v4823_v0, %v4831_v7  ;;  %v5194_v60 = vcombine.low %v4826_v1, %v4834_v61 }
 0x3fb   : > { %v3107_v17 = vadd.f32 %v3106_v45, %v2989_v29  ;;  %v3133_v32 = vadd.f32 %v3132_v47, %v2991_v63  ;;  %v2814_v48 = vmax.f32 %v2472_v5, 0.0  ;;  %v2816_v46 = vmax.f32 %v2545_v6, 0.0 }
 0x3fc   : > { %v3252_v14 = vrot.slane %v5193_v18, %v4730_v53  ;;  %v3259_v9 = vrot.slane %v5194_v60, %v4730_v53  ;;  %v3266_v25 = vrot.slane %v3244_v28, %v4730_v53  ;;  %v3273_v59 = vrot.slane %v3245_v50, %v4730_v53 }
 0x3fd   : > { %v3108_v15 = vrot.slane %v3107_v17, 4  ;;  %v3134_v0 = vrot.slane %v3133_v32, 4  ;;  %v2990_v36 = vmul.f32 %v4796_v8, %v2814_v48  ;;  %v2992_v1 = vmul.f32 %v4796_v8, %v2816_v46 }
 0x3fe   : > { %v3274_v7 = vcombine.low %v3252_v14, %v3259_v9  ;;  %v3275_v61 = vcombine.low %v3266_v25, %v3273_v59  ;;  %v5195_v25 = vld [vmem:[#allocation5_spill] sm:$0xff] }
 0x3ff   : > { %v3109_v49 = vadd.f32 %v3108_v15, %v3107_v17  ;;  %v3135_v27 = vadd.f32 %v3134_v0, %v3133_v32  ;;  %v3120_v51 = vadd.f32 %v3119_v11, %v2990_v36  ;;  %v3146_v31 = vadd.f32 %v3145_v3, %v2992_v1 }
 0x400   : > { %v3282_v37 = vrot.slane %v3274_v7, %v4730_v53  ;;  %v3289_v28 = vrot.slane %v3275_v61, %v4730_v53 }
 0x401   : > { %v3110_v34 = vrot.slane %v3109_v49, 2  ;;  %v3136_v12 = vrot.slane %v3135_v27, 2  ;;  %v3121_v50 = vrot.slane %v3120_v51, 4  ;;  %v3147_v24 = vrot.slane %v3146_v31, 4 }
 0x402   : > { %v3290_v56 = vcombine.low %v3282_v37, %v3289_v28 }
 0x403   : > { %v3111_v23 = vadd.f32 %v3110_v34, %v3109_v49  ;;  %v3137_v44 = vadd.f32 %v3136_v12, %v3135_v27  ;;  %v3122_v4 = vadd.f32 %v3121_v50, %v3120_v51  ;;  %v3148_v42 = vadd.f32 %v3147_v24, %v3146_v31  ;;  %v5196_v49 = vld [vmem:[#allocation6_spill] sm:$0xff] }
 0x404   : > { %3342 = vst [vmem:[%s5029_s17] sm:$0xff] %v3290_v56 }
 0x405   : > { %v3112_v41 = vrot.slane %v3111_v23, 1  ;;  %v3138_v38 = vrot.slane %v3137_v44, 1  ;;  %v3123_v33 = vrot.slane %v3122_v4, 2  ;;  %v3149_v19 = vrot.slane %v3148_v42, 2 }
 0x406   : > { %v2654_v26 = vpop.f32.mrb[96].mxu1 }
 0x407   : > { %v3113_v10 = vadd.f32 %v3112_v41, %v3111_v23  ;;  %v3139_v30 = vadd.f32 %v3138_v38, %v3137_v44  ;;  %v3124_v43 = vadd.f32 %v3123_v33, %v3122_v4  ;;  %v3150_v57 = vadd.f32 %v3149_v19, %v3148_v42  ;;  %v2656_v29 = vpop.f32.mrb[97].mxu1 }
 0x408   : > { %v2581_v45 = vpop.f32.mrb[96].mxu0  ;;  %v2655_v47 = vadd.f32 %v2654_v26, %v4706_v13  ;;  %v2657_v5 = vadd.f32 %v2656_v29, %v4706_v13  ;;  %v2658_v6 = vpop.f32.mrb[98].mxu1 }
 0x409   : > { %v5034_v63 = vadd.f32 %v4820_v58, %v3113_v10  ;;  %v2582_v11 = vadd.f32 %v2581_v45, %v4706_v13  ;;  %v2583_v3 = vpop.f32.mrb[97].mxu0  ;;  %v3125_v17 = vrot.slane %v3124_v43, 1  ;;  %v3151_v32 = vrot.slane %v3150_v57, 1  ;;  %v2660_v9 = vpop.f32.mrb[99].mxu1 }
 0x40a   : > { %v2707_v18 = vmax.f32 %v2655_v47, 0.0  ;;  %v2584_v14 = vadd.f32 %v2583_v3, %v4706_v13  ;;  %v2585_v60 = vpop.f32.mrb[98].mxu0  ;;  %v2708_v46 = vmax.f32 %v2657_v5, 0.0  ;;  %v2659_v15 = vadd.f32 %v2658_v6, %v5195_v25 }
 0x40b   : > { %v2705_v48 = vmax.f32 %v2582_v11, 0.0  ;;  %v2586_v59 = vadd.f32 %v2585_v60, %v5195_v25  ;;  %v2587_v0 = vpop.f32.mrb[99].mxu0  ;;  %v5042_v7 = vadd.f32 %v4820_v58, %v3139_v30  ;;  %v3126_v36 = vadd.f32 %v3125_v17, %v3124_v43 }
 0x40c   : > { %v3152_v1 = vadd.f32 %v3151_v32, %v3150_v57  ;;  %v2706_v61 = vmax.f32 %v2584_v14, 0.0  ;;  %v2883_v51 = vmul.f32 %v5196_v49, %v2707_v18  ;;  %v2723_v31 = vmax.f32 %v2659_v15, 0.0 }
 0x40d   : > { %v2881_v27 = vmul.f32 %v5196_v49, %v2705_v48  ;;  %v2721_v13 = vmax.f32 %v2586_v59, 0.0  ;;  %v5047_v37 = vadd.f32 %v4820_v58, %v3126_v36  ;;  %v2884_v34 = vmul.f32 %v5196_v49, %v2708_v46 }
 0x40e   : > { %v5050_v28 = vadd.f32 %v4820_v58, %v3152_v1  ;;  %v2588_v12 = vadd.f32 %v2587_v0, %v5195_v25  ;;  %v2882_v50 = vmul.f32 %v5196_v49, %v2706_v61  ;;  %v2899_v56 = vmul.f32 %v4716_v35, %v2723_v31  ;;  %v2664_v44 = vpop.f32.mrb[100].mxu1 }
 0x40f   : > { %v2897_v24 = vmul.f32 %v4716_v35, %v2721_v13  ;;  %v2661_v23 = vadd.f32 %v2660_v9, %v5195_v25  ;;  %v3291_v4 = vcombine.low %v5034_v63, %v5047_v37  ;;  %v2665_v33 = vadd.f32 %v2664_v44, %v4710_v52  ;;  %v2666_v19 = vpop.f32.mrb[101].mxu1 }
 0x410   : > { %v3292_v42 = vcombine.low %v5042_v7, %v5050_v28  ;;  %v2722_v41 = vmax.f32 %v2588_v12, 0.0  ;;  %v2591_v38 = vpop.f32.mrb[100].mxu0  ;;  %v3179_v26 = vadd.f32 %v2899_v56, %v2883_v51  ;;  %v2668_v45 = vpop.f32.mrb[102].mxu1  ;;  %v2667_v3 = vadd.f32 %v2666_v19, %v4710_v52 }
 0x411   : > { %v3153_v10 = vadd.f32 %v2897_v24, %v2881_v27  ;;  %v2724_v30 = vmax.f32 %v2661_v23, 0.0  ;;  %v2592_v43 = vadd.f32 %v2591_v38, %v4710_v52  ;;  %v2593_v57 = vpop.f32.mrb[101].mxu0  ;;  %v2739_v29 = vmax.f32 %v2665_v33, 0.0  ;;  %v2670_v6 = vpop.f32.mrb[103].mxu1 }
 0x412   : > { %v2898_v47 = vmul.f32 %v4716_v35, %v2722_v41  ;;  %v2594_v11 = vadd.f32 %v2593_v57, %v4710_v52  ;;  %v2595_v5 = vpop.f32.mrb[102].mxu0  ;;  %v2669_v14 = vadd.f32 %v2668_v45, %v4712_v16  ;;  %v2740_v25 = vmax.f32 %v2667_v3, 0.0 }
 0x413   : > { %v2900_v17 = vmul.f32 %v4716_v35, %v2724_v30  ;;  %v2737_v32 = vmax.f32 %v2592_v43, 0.0  ;;  %v2596_v18 = vadd.f32 %v2595_v5, %v4712_v16  ;;  %v2597_v60 = vpop.f32.mrb[103].mxu0  ;;  %v2915_v48 = vmul.f32 %v4720_v22, %v2739_v29 }
 0x414   : > { %v3166_v9 = vadd.f32 %v2898_v47, %v2882_v50  ;;  %v2738_v46 = vmax.f32 %v2594_v11, 0.0  ;;  %v2755_v52 = vmax.f32 %v2669_v14, 0.0  ;;  %v2916_v35 = vmul.f32 %v4720_v22, %v2740_v25 }
 0x415   : > { %v3192_v59 = vadd.f32 %v2900_v17, %v2884_v34  ;;  %v2913_v15 = vmul.f32 %v4720_v22, %v2737_v32  ;;  %v2753_v0 = vmax.f32 %v2596_v18, 0.0  ;;  %v3180_v36 = vadd.f32 %v3179_v26, %v2915_v48 }
 0x416   : > { %v2914_v1 = vmul.f32 %v4720_v22, %v2738_v46  ;;  %v2598_v61 = vadd.f32 %v2597_v60, %v4712_v16  ;;  %v2931_v51 = vmul.f32 %v4734_v55, %v2755_v52  ;;  %v2671_v13 = vadd.f32 %v2670_v6, %v4712_v16  ;;  %v2674_v31 = vpop.f32.mrb[104].mxu1 }
 0x417   : > { %v3154_v49 = vadd.f32 %v3153_v10, %v2913_v15  ;;  %v2929_v27 = vmul.f32 %v4734_v55, %v2753_v0  ;;  %v3193_v12 = vadd.f32 %v3192_v59, %v2916_v35  ;;  %v2675_v56 = vadd.f32 %v2674_v31, %v4718_v21  ;;  %v2676_v23 = vpop.f32.mrb[105].mxu1 }
 0x418   : > { %v3167_v34 = vadd.f32 %v3166_v9, %v2914_v1  ;;  %v2754_v50 = vmax.f32 %v2598_v61, 0.0  ;;  %v2601_v24 = vpop.f32.mrb[104].mxu0  ;;  %v3181_v41 = vadd.f32 %v3180_v36, %v2931_v51  ;;  %v2756_v22 = vmax.f32 %v2671_v13, 0.0  ;;  %v2678_v19 = vpop.f32.mrb[106].mxu1 }
 0x419   : > { %v3155_v44 = vadd.f32 %v3154_v49, %v2929_v27  ;;  %v2602_v38 = vadd.f32 %v2601_v24, %v4718_v21  ;;  %v2603_v33 = vpop.f32.mrb[105].mxu0  ;;  %v2771_v26 = vmax.f32 %v2675_v56, 0.0  ;;  %v2677_v30 = vadd.f32 %v2676_v23, %v4718_v21  ;;  %v2680_v57 = vpop.f32.mrb[107].mxu1 }
 0x41a   : > { %v2930_v10 = vmul.f32 %v4734_v55, %v2754_v50  ;;  %v2604_v16 = vadd.f32 %v2603_v33, %v4718_v21  ;;  %v2605_v43 = vpop.f32.mrb[106].mxu0  ;;  %v2932_v45 = vmul.f32 %v4734_v55, %v2756_v22  ;;  %v2679_v11 = vadd.f32 %v2678_v19, %v4732_v54 }
 0x41b   : > { %v2769_v47 = vmax.f32 %v2602_v38, 0.0  ;;  %v2606_v29 = vadd.f32 %v2605_v43, %v4732_v54  ;;  %v2607_v3 = vpop.f32.mrb[107].mxu0  ;;  %v2947_v6 = vmul.f32 %v4758_v40, %v2771_v26  ;;  %v2772_v32 = vmax.f32 %v2677_v30, 0.0 }
 0x41c   : > { %v3168_v5 = vadd.f32 %v3167_v34, %v2930_v10  ;;  %v2770_v17 = vmax.f32 %v2604_v16, 0.0  ;;  %v3194_v18 = vadd.f32 %v3193_v12, %v2932_v45  ;;  %v2787_v21 = vmax.f32 %v2679_v11, 0.0 }
 0x41d   : > { %v2945_v14 = vmul.f32 %v4758_v40, %v2769_v47  ;;  %v2785_v60 = vmax.f32 %v2606_v29, 0.0  ;;  %v3182_v9 = vadd.f32 %v3181_v41, %v2947_v6  ;;  %v2948_v55 = vmul.f32 %v4758_v40, %v2772_v32 }
 0x41e   : > { %v2946_v48 = vmul.f32 %v4758_v40, %v2770_v17  ;;  %v2608_v46 = vadd.f32 %v2607_v3, %v4732_v54  ;;  %v2963_v15 = vmul.f32 %v4776_v20, %v2787_v21  ;;  %v2681_v0 = vadd.f32 %v2680_v57, %v4732_v54  ;;  %v2684_v52 = vpop.f32.mrb[108].mxu1 }
 0x41f   : > { %v3156_v25 = vadd.f32 %v3155_v44, %v2945_v14  ;;  %v2961_v59 = vmul.f32 %v4776_v20, %v2785_v60  ;;  %v3195_v1 = vadd.f32 %v3194_v18, %v2948_v55  ;;  %v2685_v49 = vadd.f32 %v2684_v52, %v4756_v39  ;;  %v2686_v27 = vpop.f32.mrb[109].mxu1 }
 0x420   : > { %v3169_v36 = vadd.f32 %v3168_v5, %v2946_v48  ;;  %v2786_v35 = vmax.f32 %v2608_v46, 0.0  ;;  %v2611_v61 = vpop.f32.mrb[108].mxu0  ;;  %v3183_v13 = vadd.f32 %v3182_v9, %v2963_v15  ;;  %v2788_v40 = vmax.f32 %v2681_v0, 0.0  ;;  %v2688_v12 = vpop.f32.mrb[110].mxu1 }
 0x421   : > { %v3157_v51 = vadd.f32 %v3156_v25, %v2961_v59  ;;  %v2612_v31 = vadd.f32 %v2611_v61, %v4756_v39  ;;  %v2613_v34 = vpop.f32.mrb[109].mxu0  ;;  %v2803_v24 = vmax.f32 %v2685_v49, 0.0  ;;  %v2687_v56 = vadd.f32 %v2686_v27, %v4756_v39  ;;  %v2690_v44 = vpop.f32.mrb[111].mxu1 }
 0x422   : > { %v2962_v50 = vmul.f32 %v4776_v20, %v2786_v35  ;;  %v2614_v54 = vadd.f32 %v2613_v34, %v4756_v39  ;;  %v2615_v23 = vpop.f32.mrb[110].mxu0  ;;  %v2964_v41 = vmul.f32 %v4776_v20, %v2788_v40  ;;  %v2689_v33 = vadd.f32 %v2688_v12, %v4774_v2 }
 0x423   : > { %v2801_v22 = vmax.f32 %v2612_v31, 0.0  ;;  %v2616_v38 = vadd.f32 %v2615_v23, %v4774_v2  ;;  %v2617_v19 = vpop.f32.mrb[111].mxu0  ;;  %v2979_v26 = vmul.f32 %v4790_v62, %v2803_v24  ;;  %v2804_v30 = vmax.f32 %v2687_v56, 0.0 }
 0x424   : > { %v3170_v10 = vadd.f32 %v3169_v36, %v2962_v50  ;;  %v2802_v16 = vmax.f32 %v2614_v54, 0.0  ;;  %v3196_v43 = vadd.f32 %v3195_v1, %v2964_v41  ;;  %v2819_v39 = vmax.f32 %v2689_v33, 0.0 }
 0x425   : > { %v2977_v57 = vmul.f32 %v4790_v62, %v2801_v22  ;;  %v2817_v45 = vmax.f32 %v2616_v38, 0.0  ;;  %v3184_v47 = vadd.f32 %v3183_v13, %v2979_v26  ;;  %v2980_v20 = vmul.f32 %v4790_v62, %v2804_v30 }
 0x426   : > { %v2978_v29 = vmul.f32 %v4790_v62, %v2802_v16  ;;  %v2618_v11 = vadd.f32 %v2617_v19, %v4774_v2  ;;  %v2995_v6 = vmul.f32 %v4796_v8, %v2819_v39  ;;  %v2691_v17 = vadd.f32 %v2690_v44, %v4774_v2 }
 0x427   : > { %v3158_v3 = vadd.f32 %v3157_v51, %v2977_v57  ;;  %v2993_v5 = vmul.f32 %v4796_v8, %v2817_v45  ;;  %v3197_v18 = vadd.f32 %v3196_v43, %v2980_v20  ;;  %v3301_v60 = vrot.slane %v3291_v4, %v4730_v53 }
 0x428   : > { %v3171_v32 = vadd.f32 %v3170_v10, %v2978_v29  ;;  %v2818_v14 = vmax.f32 %v2618_v11, 0.0  ;;  %v3185_v9 = vadd.f32 %v3184_v47, %v2995_v6  ;;  %v2820_v62 = vmax.f32 %v2691_v17, 0.0 }
 0x429   : > { %v3159_v21 = vadd.f32 %v3158_v3, %v2993_v5  ;;  %v3308_v48 = vrot.slane %v3292_v42, %v4730_v53 }
 0x42a   : > { %v2994_v55 = vmul.f32 %v4796_v8, %v2818_v14  ;;  %v3186_v2 = vrot.slane %v3185_v9, 4  ;;  %v2996_v25 = vmul.f32 %v4796_v8, %v2820_v62 }
 0x42b   : > { %v3160_v46 = vrot.slane %v3159_v21, 4  ;;  %v3323_v59 = vcombine.low %v3301_v60, %v3308_v48 }
 0x42c   : > { %v3172_v15 = vadd.f32 %v3171_v32, %v2994_v55  ;;  %v3187_v52 = vadd.f32 %v3186_v2, %v3185_v9  ;;  %v3198_v63 = vadd.f32 %v3197_v18, %v2996_v25 }
 0x42d   : > { %v3161_v0 = vadd.f32 %v3160_v46, %v3159_v21  ;;  %v3331_v10 = vrot.slane %v3323_v59, %v4730_v53 }
 0x42e   : > { %v3173_v37 = vrot.slane %v3172_v15, 4  ;;  %v3188_v36 = vrot.slane %v3187_v52, 2  ;;  %v3199_v1 = vrot.slane %v3198_v63, 4 }
 0x42f   : > { %v3162_v4 = vrot.slane %v3161_v0, 2 }
 0x430   : > { %v3174_v35 = vadd.f32 %v3173_v37, %v3172_v15  ;;  %v3189_v49 = vadd.f32 %v3188_v36, %v3187_v52  ;;  %v3200_v7 = vadd.f32 %v3199_v1, %v3198_v63 }
 0x431   : > { %v3163_v61 = vadd.f32 %v3162_v4, %v3161_v0 }
 0x432   : > { %v3175_v28 = vrot.slane %v3174_v35, 2  ;;  %v3190_v27 = vrot.slane %v3189_v49, 1  ;;  %v3201_v51 = vrot.slane %v3200_v7, 2 }
 0x433   : > { %v3164_v42 = vrot.slane %v3163_v61, 1 }
 0x434   : > { %v3176_v13 = vadd.f32 %v3175_v28, %v3174_v35  ;;  %v3191_v8 = vadd.f32 %v3190_v27, %v3189_v49  ;;  %v3202_v31 = vadd.f32 %v3201_v51, %v3200_v7 }
 0x435   : > { %v3165_v40 = vadd.f32 %v3164_v42, %v3163_v61 }
 0x436   : > { %v3177_v34 = vrot.slane %v3176_v13, 1  ;;  %v3203_v12 = vrot.slane %v3202_v31, 1  ;;  %v3224_v54 = vadd.f32 %v4820_v58, %v3191_v8 }
 0x437   : > { %v3222_v50 = vadd.f32 %v4820_v58, %v3165_v40 }
 0x438   : > { %v3178_v24 = vadd.f32 %v3177_v34, %v3176_v13  ;;  %v3204_v56 = vadd.f32 %v3203_v12, %v3202_v31 }
 0x43a   : > { %v3223_v23 = vadd.f32 %v4820_v58, %v3178_v24  ;;  %v3225_v44 = vadd.f32 %v4820_v58, %v3204_v56 }
 0x43c   : > { %v3293_v41 = vcombine.low %v3222_v50, %v3223_v23  ;;  %v3294_v22 = vcombine.low %v3224_v54, %v3225_v44 }
 0x43e   : > { %v3315_v38 = vrot.slane %v3293_v41, %v4730_v53  ;;  %v3322_v33 = vrot.slane %v3294_v22, %v4730_v53 }
 0x440   : > { %v3324_v19 = vcombine.low %v3315_v38, %v3322_v33 }
 0x442   : > { %v3338_v26 = vrot.slane %v3324_v19, %v4730_v53 }
 0x444   : > { %v3339_v16 = vcombine.low %v3331_v10, %v3338_v26 }
 0x446   : > { %3343 = vst [vmem:[%s5029_s17 + $0x8] sm:$0xff] %v3339_v16 }
 0x447   : > { %3861 = shalt.err (!%p3858_p3)
}
 0x448   : > { %s3862_s9 = scalar_lea.hbm %s5133_s25, 256  ;;  %s3866_s14 = scalar_lea.hbm %s5184_s6, 512 }
 0x449   : > { %p3863_p4 = scmp.ne.s32.totalorder %s5133_s25, %s3862_s9  ;;  %p3867_p9 = scmp.lt.u32.totalorder %s5133_s25, %s5184_s6 }
 0x44a   : > { %p3868_p10 = scmp.lt.u32.totalorder %s3866_s14, %s3862_s9  ;;  %p3870_p12 = scmp.lt.u32.totalorder %s3862_s9, %s5133_s25 }
 0x44b   : > { %p3864_p7 = pnand %p3863_p4, %p3985_p5 }
 0x44c   : > { %p3869_p11 = por %p3868_p10, %p3867_p9 }
 0x44d   : > { %p3865_p8 = pneg %p3864_p7 }
 0x44e   : > { %p3871_p13 = por %p3870_p12, %p3869_p11 }
 0x450   : > { %p3872_p0 = pnand %p3871_p13, %p3865_p8 }
 0x452   : > { %3875 = shalt.err (!%p3872_p0)
}
 0x453   : > { %3502 = dma.vmem_to_hbm [thread:$0]  (%p3985_p5), %s5135_s18, 256, %s5133_s25, %s3345_s26  }
 0x454 PF: > { %p3508_p1 = scmp.ge.s32.totalorder %s3910_s24, 2  ;;  %s3371_s17 = sand.u32 1, %s3898_s21  }
 0x455   : > { %s3372_s19 = scalar_lea.sflag [#allocation3], %s3371_s17 }
 0x456   : > { %p3505_p2 = pnand %p3508_p1, %p3989_p6 }
 0x458   : > { %3893 = dma.done.wait (!%p3505_p2), %s3372_s19, 256  }
 0x459   : > { %3895 = vsyncadd (!%p3505_p2), %s3372_s19, 4294967040  ;;  %p16_p3 = scmp.ge.s32.totalorder %s3973_s27, 4   ;;  %s5197_s21 = smov %s3902_s22 }
 0x45a   : > { %s5198_s22 = smov %s3906_s23  ;;  %s5199_s23 = smov %s3983_s30 }
 0x45b   : > { %s5200_s24 = smov %s3973_s27  ;;  %18 = sbr.rel (!%p16_p3) target bundleno = 3 (0x3), region = 79 }
 0x462   :  { %3377 = vsyncpa [#allocation3], 1 }
 0x463   :  { %3379 = vsyncpa [#allocation3 + $0x1], 1 }

</bundles_post_ra>
